<compile_context>
chip_gen: v7x
topology: tpu7x:2x2x1
jax: 0.10.0
libtpu: 0.0.40
codegen_flags: <defaults>
</compile_context>

<pallas_src>
import jax
import jax.numpy as jnp
from jax.experimental import pallas as pl
from jax.experimental.pallas import tpu as pltpu

_GUARD = 8  # extra zero rows at both ends of the padded slab (keeps the
            # dx = +/-1 flat slices in-bounds and dx = 0 slices 8-aligned)


def _make_resblk_kernel(H, W, C, TM):
    """Build the fused ResBlk kernel for a fixed (H, W, C) and row-chunk TM."""
    HW = H * W
    NT = HW // TM
    top = _GUARD + W          # first interior row of the padded flat slabs

    def kernel(scal_ref, x_ref, w1_ref, w2_ref, out_ref, pad1_ref, pad2_ref):
        # scalars ride in SMEM
        bias1a = scal_ref[0]
        alpha1 = scal_ref[1]
        bias1b = scal_ref[2]
        bias2a = scal_ref[3]
        alpha2 = scal_ref[4]
        bias2b = scal_ref[5]
        scale = scal_ref[6]

        # x-position of every row inside one TM-row chunk.  TM and the chunk
        # starts are multiples of W, so a single (TM, 1) mask serves every
        # chunk and both convs (computed once, reused).
        xpos = jax.lax.broadcasted_iota(jnp.int32, (TM, 1), 0) % W
        mask_l = (xpos > 0).astype(jnp.float32)        # dx = -1 needs x-1 >= 0
        mask_r = (xpos < (W - 1)).astype(jnp.float32)  # dx = +1 needs x+1 <  W

        zeros_border = jnp.zeros((top, C), jnp.float32)

        def zero_borders(pad_ref):
            # Only the guard + 1-row vertical padding strips need to be zero;
            # the interior is fully overwritten every time.
            pad_ref[pl.ds(0, top), :] = zeros_border
            pad_ref[pl.ds(top + HW, top), :] = zeros_border

        def conv_chunk(pad_ref, w_ref, m):
            """3x3 conv (padding=1) for output slab rows [m, m+TM)."""
            acc = jnp.zeros((TM, C), jnp.float32)
            for k in range(9):                         # static unroll: 9 taps
                dy = k // 3                            # 0,1,2  == true_dy + 1
                dx = k % 3 - 1                         # -1, 0, +1
                # Flat-slab window: interior row y*W+x + (true_dy)*W + dx.
                win = pad_ref[pl.ds(_GUARD + dy * W + m + dx, TM), :]
                if dx == -1:
                    win = win * mask_l                 # kill wrapped x == 0 rows
                elif dx == 1:
                    win = win * mask_r                 # kill wrapped x == W-1 rows
                acc = acc + jnp.dot(
                    win.astype(jnp.bfloat16),
                    w_ref[pl.ds(k * C, C), :],         # (C, C) bf16 tap weights
                    preferred_element_type=jnp.float32)
            return acc

        zero_borders(pad1_ref)
        zero_borders(pad2_ref)

        # ---- stage 1: PReLU(x + b1a) + b1b  ->  pad1 interior ---------------
        for t in range(NT):
            m = t * TM
            xm = x_ref[pl.ds(m, TM), :]
            a = xm + bias1a
            a = jnp.where(a >= 0.0, a, alpha1 * a) + bias1b
            pad1_ref[pl.ds(top + m, TM), :] = a

        # ---- conv1 -> PReLU(. + b2a) + b2b  ->  pad2 interior ---------------
        for t in range(NT):
            m = t * TM
            c1 = conv_chunk(pad1_ref, w1_ref, m)
            a = c1 + bias2a
            a = jnp.where(a >= 0.0, a, alpha2 * a) + bias2b
            pad2_ref[pl.ds(top + m, TM), :] = a

        # ---- conv2 -> * scale + residual  ->  output -------------------------
        for t in range(NT):
            m = t * TM
            c2 = conv_chunk(pad2_ref, w2_ref, m)
            out_ref[pl.ds(m, TM), :] = c2 * scale + x_ref[pl.ds(m, TM), :]

    return kernel


def resblk_forward(x, params):
    """x: (B, C, H, W) float32. Returns (B, C, H, W) float32 (NCHW like torch)."""
    B, C, H, W = x.shape
    assert C % 128 == 0, "channels must be a multiple of 128 for lane density"
    assert W % 8 == 0, "width must be a multiple of 8 (sublane alignment)"
    HW = H * W

    # Row-chunk: largest multiple of W that divides HW and is <= 128 slab rows
    # (keeps the f32 accumulator small enough to live in vregs).
    cands = [r for r in range(1, H + 1) if H % r == 0 and r * W <= 128]
    rows = max(cands) if cands else 1
    TM = rows * W

    # NCHW -> flat (B, HW, C): channels on the 128-wide lane axis, spatial on
    # sublanes.  (Kept NCHW at the interface to match the PyTorch module; in a
    # real model keep NHWC end-to-end so these transposes disappear.)
    x_flat = jnp.transpose(x, (0, 2, 3, 1)).reshape(B, HW, C)

    # Conv weights (C_out, C_in, 3, 3) -> stacked (9*C_in, C_out) in bf16,
    # rows ordered (ky, kx, c_in) to match the tap order in the kernel.
    w1s = jnp.transpose(params["w1"], (2, 3, 1, 0)).reshape(9 * C, C).astype(jnp.bfloat16)
    w2s = jnp.transpose(params["w2"], (2, 3, 1, 0)).reshape(9 * C, C).astype(jnp.bfloat16)

    scalars = jnp.stack([
        params["bias1a"], params["alpha1"], params["bias1b"],
        params["bias2a"], params["alpha2"], params["bias2b"],
        params["scale"],
    ]).astype(jnp.float32)

    npad = 2 * (_GUARD + W) + HW
    kernel = _make_resblk_kernel(H, W, C, TM)

    out_flat = pl.pallas_call(
        kernel,
        out_shape=jax.ShapeDtypeStruct((B, HW, C), jnp.float32),
        grid=(B,),
        in_specs=[
            pl.BlockSpec(memory_space=pltpu.MemorySpace.SMEM),       # scalars (7,)
            pl.BlockSpec((None, HW, C), lambda b: (b, 0, 0)),        # x slab
            pl.BlockSpec((9 * C, C), lambda b: (0, 0)),              # conv1 w (bf16)
            pl.BlockSpec((9 * C, C), lambda b: (0, 0)),              # conv2 w (bf16)
        ],
        out_specs=pl.BlockSpec((None, HW, C), lambda b: (b, 0, 0)),
        scratch_shapes=[
            pltpu.VMEM((npad, C), jnp.float32),                      # padded act 1
            pltpu.VMEM((npad, C), jnp.float32),                      # padded act 2
        ],
        compiler_params=pltpu.CompilerParams(
            dimension_semantics=("parallel",)),
    )(scalars, x_flat, w1s, w2s)

    return jnp.transpose(out_flat.reshape(B, H, W, C), (0, 3, 1, 2))


# ---------------------------------------------------------------------------
# Deterministic synthetic parameters (shapes mirror the nn.Module).
# ---------------------------------------------------------------------------
def init_params(key, channels):
    k1, k2, k3 = jax.random.split(key, 3)
    std = (2.0 / (channels * 9)) ** 0.5
    w1 = jax.random.normal(k1, (channels, channels, 3, 3), jnp.float32) * std
    w2 = jax.random.normal(k2, (channels, channels, 3, 3), jnp.float32) * std
    b = jax.random.normal(k3, (4,), jnp.float32) * 0.1
    return dict(
        w1=w1, w2=w2,
        bias1a=b[0], bias1b=b[1], bias2a=b[2], bias2b=b[3],
        alpha1=jnp.float32(0.25), alpha2=jnp.float32(0.25),   # PReLU default slope
        scale=jnp.float32(0.9),
    )


# Pure-JAX reference mirroring the PyTorch forward (stride=1, downsample=None).
def reference(x, params):
    dn = ("NCHW", "OIHW", "NCHW")
    prec = jax.lax.Precision.HIGHEST
    identity = x
    out = x + params["bias1a"]
    out = jnp.where(out >= 0, out, params["alpha1"] * out)
    out = jax.lax.conv_general_dilated(
        out + params["bias1b"], params["w1"], (1, 1), "SAME",
        dimension_numbers=dn, precision=prec)
    out = out + params["bias2a"]
    out = jnp.where(out >= 0, out, params["alpha2"] * out)
    out = jax.lax.conv_general_dilated(
        out + params["bias2b"], params["w2"], (1, 1), "SAME",
        dimension_numbers=dn, precision=prec)
    return out * params["scale"] + identity


if __name__ == "__main__":
    # inplanes == planes (required for the residual when downsample is None),
    # C = 128 so channels exactly fill the lane axis.
    B, C, H, W = 2, 128, 16, 16
    key = jax.random.PRNGKey(0)
    kx, kp = jax.random.split(key)
    x = jax.random.normal(kx, (B, C, H, W), jnp.float32)
    params = init_params(kp, C)

    out = jax.jit(resblk_forward)(x, params)
    out = jax.block_until_ready(out)
    assert out.shape == (B, C, H, W)

    ref = reference(x, params)
    max_err = float(jnp.max(jnp.abs(out - ref)))
    # Tolerance accounts for bf16 matmul operands (f32 accumulate) vs the f32
    # reference: K = 9*C = 1152 gives ~0.2-0.5% relative error on conv outputs.
    assert max_err < 5e-2, f"mismatch vs reference: {max_err}"
    print("KERNEL_OK")
</pallas_src>

<mosaic_0001>
module attributes {stable_mosaic.version = 11 : i64} {
  func.func @kernel(%arg0: i32, %arg1: memref<7xf32, #tpu.memory_space<smem>>, %arg2: memref<1x256x128xf32, #tpu.memory_space<vmem>>, %arg3: memref<1152x128xbf16, #tpu.memory_space<vmem>>, %arg4: memref<1152x128xbf16, #tpu.memory_space<vmem>>, %arg5: memref<1x256x128xf32, #tpu.memory_space<vmem>>, %arg6: memref<304x128xf32, #tpu.memory_space<vmem>>, %arg7: memref<304x128xf32, #tpu.memory_space<vmem>>) attributes {dimension_semantics = [#tpu.dimension_semantics<parallel>], iteration_bounds = array<i64: 2>, scalar_prefetch = 0 : i64, scratch_operands = 2 : i64, tpu.core_type = #tpu.core_type<tc>, window_params = [{transform_indices = @transform_0, window_bounds = array<i64: 7>}, {transform_indices = @transform_1, window_bounds = array<i64: 1, 256, 128>}, {pipeline_mode = #tpu.pipeline_mode<synchronous>, transform_indices = @transform_2, window_bounds = array<i64: 1152, 128>}, {pipeline_mode = #tpu.pipeline_mode<synchronous>, transform_indices = @transform_3, window_bounds = array<i64: 1152, 128>}, {transform_indices = @transform_4, window_bounds = array<i64: 1, 256, 128>}]} {
    %c0 = arith.constant 0 : index
    %0 = memref.load %arg1[%c0] : memref<7xf32, #tpu.memory_space<smem>>
    %c1 = arith.constant 1 : index
    %1 = memref.load %arg1[%c1] : memref<7xf32, #tpu.memory_space<smem>>
    %c2 = arith.constant 2 : index
    %2 = memref.load %arg1[%c2] : memref<7xf32, #tpu.memory_space<smem>>
    %c3 = arith.constant 3 : index
    %3 = memref.load %arg1[%c3] : memref<7xf32, #tpu.memory_space<smem>>
    %c4 = arith.constant 4 : index
    %4 = memref.load %arg1[%c4] : memref<7xf32, #tpu.memory_space<smem>>
    %c5 = arith.constant 5 : index
    %5 = memref.load %arg1[%c5] : memref<7xf32, #tpu.memory_space<smem>>
    %c6 = arith.constant 6 : index
    %6 = memref.load %arg1[%c6] : memref<7xf32, #tpu.memory_space<smem>>
    %7 = tpu.iota {dimensions = array<i32: 0>} : vector<128x1xi32>
    %c16_i32 = arith.constant 16 : i32
    %c0_i32 = arith.constant 0 : i32
    %8 = arith.cmpi eq, %c16_i32, %c0_i32 : i32
    %c1_i32 = arith.constant 1 : i32
    %9 = arith.select %8, %c1_i32, %c16_i32 : i32
    %10 = vector.broadcast %9 : i32 to vector<128x1xi32>
    %11 = arith.remsi %7, %10 : vector<128x1xi32>
    %c0_i32_0 = arith.constant 0 : i32
    %12 = vector.broadcast %c0_i32_0 : i32 to vector<128x1xi32>
    %13 = arith.cmpi ne, %11, %12 : vector<128x1xi32>
    %c0_i32_1 = arith.constant 0 : i32
    %14 = vector.broadcast %c0_i32_1 : i32 to vector<128x1xi32>
    %15 = arith.cmpi slt, %11, %14 : vector<128x1xi32>
    %c0_i32_2 = arith.constant 0 : i32
    %16 = arith.cmpi slt, %9, %c0_i32_2 : i32
    %17 = vector.broadcast %16 : i1 to vector<128x1xi1>
    %18 = vector.broadcast %17 : vector<128x1xi1> to vector<128x1xi1>
    %19 = arith.xori %15, %18 : vector<128x1xi1>
    %20 = arith.andi %19, %13 : vector<128x1xi1>
    %21 = vector.broadcast %9 : i32 to vector<128x1xi32>
    %22 = arith.addi %11, %21 : vector<128x1xi32>
    %23 = arith.select %20, %22, %11 : vector<128x1xi1>, vector<128x1xi32>
    %c0_i32_3 = arith.constant 0 : i32
    %24 = vector.broadcast %c0_i32_3 : i32 to vector<128x1xi32>
    %25 = arith.cmpi sgt, %23, %24 : vector<128x1xi32>
    %26 = arith.extui %25 : vector<128x1xi1> to vector<128x1xi32>
    %27 = arith.sitofp %26 : vector<128x1xi32> to vector<128x1xf32>
    %c15_i32 = arith.constant 15 : i32
    %28 = vector.broadcast %c15_i32 : i32 to vector<128x1xi32>
    %29 = arith.cmpi slt, %23, %28 : vector<128x1xi32>
    %30 = arith.extui %29 : vector<128x1xi1> to vector<128x1xi32>
    %31 = arith.sitofp %30 : vector<128x1xi32> to vector<128x1xf32>
    %cst = arith.constant 0.000000e+00 : f32
    %32 = vector.broadcast %cst : f32 to vector<24x128xf32>
    %c0_4 = arith.constant 0 : index
    %c0_5 = arith.constant 0 : index
    %33 = vector.load %arg6[%c0_4, %c0_5] : memref<304x128xf32, #tpu.memory_space<vmem>>, vector<24x128xf32>
    tpu.vector_store %arg6[%c0_4, %c0_5], %32 {strides = array<i32>} : memref<304x128xf32, #tpu.memory_space<vmem>>, vector<24x128xf32>,
    %c280 = arith.constant 280 : index
    %c0_6 = arith.constant 0 : index
    %34 = vector.load %arg6[%c280, %c0_6] : memref<304x128xf32, #tpu.memory_space<vmem>>, vector<24x128xf32>
    tpu.vector_store %arg6[%c280, %c0_6], %32 {strides = array<i32>} : memref<304x128xf32, #tpu.memory_space<vmem>>, vector<24x128xf32>,
    %c0_7 = arith.constant 0 : index
    %c0_8 = arith.constant 0 : index
    %35 = vector.load %arg7[%c0_7, %c0_8] : memref<304x128xf32, #tpu.memory_space<vmem>>, vector<24x128xf32>
    tpu.vector_store %arg7[%c0_7, %c0_8], %32 {strides = array<i32>} : memref<304x128xf32, #tpu.memory_space<vmem>>, vector<24x128xf32>,
    %c280_9 = arith.constant 280 : index
    %c0_10 = arith.constant 0 : index
    %36 = vector.load %arg7[%c280_9, %c0_10] : memref<304x128xf32, #tpu.memory_space<vmem>>, vector<24x128xf32>
    tpu.vector_store %arg7[%c280_9, %c0_10], %32 {strides = array<i32>} : memref<304x128xf32, #tpu.memory_space<vmem>>, vector<24x128xf32>,
    %c0_11 = arith.constant 0 : index
    %c0_12 = arith.constant 0 : index
    %c0_13 = arith.constant 0 : index
    %37 = vector.load %arg2[%c0_11, %c0_12, %c0_13] : memref<1x256x128xf32, #tpu.memory_space<vmem>>, vector<1x128x128xf32>
    %38 = vector.shape_cast %37 : vector<1x128x128xf32> to vector<128x128xf32>
    %39 = vector.broadcast %0 : f32 to vector<128x128xf32>
    %40 = arith.addf %38, %39 : vector<128x128xf32>
    %cst_14 = arith.constant 0.000000e+00 : f32
    %41 = vector.broadcast %cst_14 : f32 to vector<128x128xf32>
    %42 = arith.cmpf oge, %40, %41 : vector<128x128xf32>
    %43 = vector.broadcast %1 : f32 to vector<128x128xf32>
    %44 = arith.mulf %43, %40 : vector<128x128xf32>
    %45 = arith.select %42, %40, %44 : vector<128x128xi1>, vector<128x128xf32>
    %46 = vector.broadcast %2 : f32 to vector<128x128xf32>
    %47 = arith.addf %45, %46 : vector<128x128xf32>
    %c24 = arith.constant 24 : index
    %c0_15 = arith.constant 0 : index
    %48 = vector.load %arg6[%c24, %c0_15] : memref<304x128xf32, #tpu.memory_space<vmem>>, vector<128x128xf32>
    tpu.vector_store %arg6[%c24, %c0_15], %47 {strides = array<i32>} : memref<304x128xf32, #tpu.memory_space<vmem>>, vector<128x128xf32>,
    %c0_16 = arith.constant 0 : index
    %c128 = arith.constant 128 : index
    %c0_17 = arith.constant 0 : index
    %49 = vector.load %arg2[%c0_16, %c128, %c0_17] : memref<1x256x128xf32, #tpu.memory_space<vmem>>, vector<1x128x128xf32>
    %50 = vector.shape_cast %49 : vector<1x128x128xf32> to vector<128x128xf32>
    %51 = vector.broadcast %0 : f32 to vector<128x128xf32>
    %52 = arith.addf %50, %51 : vector<128x128xf32>
    %cst_18 = arith.constant 0.000000e+00 : f32
    %53 = vector.broadcast %cst_18 : f32 to vector<128x128xf32>
    %54 = arith.cmpf oge, %52, %53 : vector<128x128xf32>
    %55 = vector.broadcast %1 : f32 to vector<128x128xf32>
    %56 = arith.mulf %55, %52 : vector<128x128xf32>
    %57 = arith.select %54, %52, %56 : vector<128x128xi1>, vector<128x128xf32>
    %58 = vector.broadcast %2 : f32 to vector<128x128xf32>
    %59 = arith.addf %57, %58 : vector<128x128xf32>
    %c152 = arith.constant 152 : index
    %c0_19 = arith.constant 0 : index
    %60 = vector.load %arg6[%c152, %c0_19] : memref<304x128xf32, #tpu.memory_space<vmem>>, vector<128x128xf32>
    tpu.vector_store %arg6[%c152, %c0_19], %59 {strides = array<i32>} : memref<304x128xf32, #tpu.memory_space<vmem>>, vector<128x128xf32>,
    %cst_20 = arith.constant 0.000000e+00 : f32
    %61 = vector.broadcast %cst_20 : f32 to vector<128x128xf32>
    %c7 = arith.constant 7 : index
    %c0_21 = arith.constant 0 : index
    %62 = vector.load %arg6[%c7, %c0_21] : memref<304x128xf32, #tpu.memory_space<vmem>>, vector<128x128xf32>
    %63 = vector.broadcast %27 : vector<128x1xf32> to vector<128x128xf32>
    %64 = arith.mulf %62, %63 : vector<128x128xf32>
    %65 = arith.truncf %64 : vector<128x128xf32> to vector<128x128xbf16>
    %c0_22 = arith.constant 0 : index
    %c0_23 = arith.constant 0 : index
    %66 = vector.load %arg3[%c0_22, %c0_23] : memref<1152x128xbf16, #tpu.memory_space<vmem>>, vector<128x128xbf16>
    %cst_24 = arith.constant dense<0.000000e+00> : vector<128x128xf32>
    %67 = tpu.matmul %65, %66, %cst_24 {dimension_numbers = #tpu.dot_dimension_numbers<[1], [0], [0], [1], [0, 0, 1, 1], [], []>} : vector<128x128xbf16>, vector<128x128xbf16>, vector<128x128xf32> -> vector<128x128xf32>
    %68 = arith.addf %61, %67 : vector<128x128xf32>
    %c8 = arith.constant 8 : index
    %c0_25 = arith.constant 0 : index
    %69 = vector.load %arg6[%c8, %c0_25] : memref<304x128xf32, #tpu.memory_space<vmem>>, vector<128x128xf32>
    %70 = arith.truncf %69 : vector<128x128xf32> to vector<128x128xbf16>
    %c128_26 = arith.constant 128 : index
    %c0_27 = arith.constant 0 : index
    %71 = vector.load %arg3[%c128_26, %c0_27] : memref<1152x128xbf16, #tpu.memory_space<vmem>>, vector<128x128xbf16>
    %cst_28 = arith.constant dense<0.000000e+00> : vector<128x128xf32>
    %72 = tpu.matmul %70, %71, %cst_28 {dimension_numbers = #tpu.dot_dimension_numbers<[1], [0], [0], [1], [0, 0, 1, 1], [], []>} : vector<128x128xbf16>, vector<128x128xbf16>, vector<128x128xf32> -> vector<128x128xf32>
    %73 = arith.addf %68, %72 : vector<128x128xf32>
    %c9 = arith.constant 9 : index
    %c0_29 = arith.constant 0 : index
    %74 = vector.load %arg6[%c9, %c0_29] : memref<304x128xf32, #tpu.memory_space<vmem>>, vector<128x128xf32>
    %75 = vector.broadcast %31 : vector<128x1xf32> to vector<128x128xf32>
    %76 = arith.mulf %74, %75 : vector<128x128xf32>
    %77 = arith.truncf %76 : vector<128x128xf32> to vector<128x128xbf16>
    %c256 = arith.constant 256 : index
    %c0_30 = arith.constant 0 : index
    %78 = vector.load %arg3[%c256, %c0_30] : memref<1152x128xbf16, #tpu.memory_space<vmem>>, vector<128x128xbf16>
    %cst_31 = arith.constant dense<0.000000e+00> : vector<128x128xf32>
    %79 = tpu.matmul %77, %78, %cst_31 {dimension_numbers = #tpu.dot_dimension_numbers<[1], [0], [0], [1], [0, 0, 1, 1], [], []>} : vector<128x128xbf16>, vector<128x128xbf16>, vector<128x128xf32> -> vector<128x128xf32>
    %80 = arith.addf %73, %79 : vector<128x128xf32>
    %c23 = arith.constant 23 : index
    %c0_32 = arith.constant 0 : index
    %81 = vector.load %arg6[%c23, %c0_32] : memref<304x128xf32, #tpu.memory_space<vmem>>, vector<128x128xf32>
    %82 = vector.broadcast %27 : vector<128x1xf32> to vector<128x128xf32>
    %83 = arith.mulf %81, %82 : vector<128x128xf32>
    %84 = arith.truncf %83 : vector<128x128xf32> to vector<128x128xbf16>
    %c384 = arith.constant 384 : index
    %c0_33 = arith.constant 0 : index
    %85 = vector.load %arg3[%c384, %c0_33] : memref<1152x128xbf16, #tpu.memory_space<vmem>>, vector<128x128xbf16>
    %cst_34 = arith.constant dense<0.000000e+00> : vector<128x128xf32>
    %86 = tpu.matmul %84, %85, %cst_34 {dimension_numbers = #tpu.dot_dimension_numbers<[1], [0], [0], [1], [0, 0, 1, 1], [], []>} : vector<128x128xbf16>, vector<128x128xbf16>, vector<128x128xf32> -> vector<128x128xf32>
    %87 = arith.addf %80, %86 : vector<128x128xf32>
    %c24_35 = arith.constant 24 : index
    %c0_36 = arith.constant 0 : index
    %88 = vector.load %arg6[%c24_35, %c0_36] : memref<304x128xf32, #tpu.memory_space<vmem>>, vector<128x128xf32>
    %89 = arith.truncf %88 : vector<128x128xf32> to vector<128x128xbf16>
    %c512 = arith.constant 512 : index
    %c0_37 = arith.constant 0 : index
    %90 = vector.load %arg3[%c512, %c0_37] : memref<1152x128xbf16, #tpu.memory_space<vmem>>, vector<128x128xbf16>
    %cst_38 = arith.constant dense<0.000000e+00> : vector<128x128xf32>
    %91 = tpu.matmul %89, %90, %cst_38 {dimension_numbers = #tpu.dot_dimension_numbers<[1], [0], [0], [1], [0, 0, 1, 1], [], []>} : vector<128x128xbf16>, vector<128x128xbf16>, vector<128x128xf32> -> vector<128x128xf32>
    %92 = arith.addf %87, %91 : vector<128x128xf32>
    %c25 = arith.constant 25 : index
    %c0_39 = arith.constant 0 : index
    %93 = vector.load %arg6[%c25, %c0_39] : memref<304x128xf32, #tpu.memory_space<vmem>>, vector<128x128xf32>
    %94 = vector.broadcast %31 : vector<128x1xf32> to vector<128x128xf32>
    %95 = arith.mulf %93, %94 : vector<128x128xf32>
    %96 = arith.truncf %95 : vector<128x128xf32> to vector<128x128xbf16>
    %c640 = arith.constant 640 : index
    %c0_40 = arith.constant 0 : index
    %97 = vector.load %arg3[%c640, %c0_40] : memref<1152x128xbf16, #tpu.memory_space<vmem>>, vector<128x128xbf16>
    %cst_41 = arith.constant dense<0.000000e+00> : vector<128x128xf32>
    %98 = tpu.matmul %96, %97, %cst_41 {dimension_numbers = #tpu.dot_dimension_numbers<[1], [0], [0], [1], [0, 0, 1, 1], [], []>} : vector<128x128xbf16>, vector<128x128xbf16>, vector<128x128xf32> -> vector<128x128xf32>
    %99 = arith.addf %92, %98 : vector<128x128xf32>
    %c39 = arith.constant 39 : index
    %c0_42 = arith.constant 0 : index
    %100 = vector.load %arg6[%c39, %c0_42] : memref<304x128xf32, #tpu.memory_space<vmem>>, vector<128x128xf32>
    %101 = vector.broadcast %27 : vector<128x1xf32> to vector<128x128xf32>
    %102 = arith.mulf %100, %101 : vector<128x128xf32>
    %103 = arith.truncf %102 : vector<128x128xf32> to vector<128x128xbf16>
    %c768 = arith.constant 768 : index
    %c0_43 = arith.constant 0 : index
    %104 = vector.load %arg3[%c768, %c0_43] : memref<1152x128xbf16, #tpu.memory_space<vmem>>, vector<128x128xbf16>
    %cst_44 = arith.constant dense<0.000000e+00> : vector<128x128xf32>
    %105 = tpu.matmul %103, %104, %cst_44 {dimension_numbers = #tpu.dot_dimension_numbers<[1], [0], [0], [1], [0, 0, 1, 1], [], []>} : vector<128x128xbf16>, vector<128x128xbf16>, vector<128x128xf32> -> vector<128x128xf32>
    %106 = arith.addf %99, %105 : vector<128x128xf32>
    %c40 = arith.constant 40 : index
    %c0_45 = arith.constant 0 : index
    %107 = vector.load %arg6[%c40, %c0_45] : memref<304x128xf32, #tpu.memory_space<vmem>>, vector<128x128xf32>
    %108 = arith.truncf %107 : vector<128x128xf32> to vector<128x128xbf16>
    %c896 = arith.constant 896 : index
    %c0_46 = arith.constant 0 : index
    %109 = vector.load %arg3[%c896, %c0_46] : memref<1152x128xbf16, #tpu.memory_space<vmem>>, vector<128x128xbf16>
    %cst_47 = arith.constant dense<0.000000e+00> : vector<128x128xf32>
    %110 = tpu.matmul %108, %109, %cst_47 {dimension_numbers = #tpu.dot_dimension_numbers<[1], [0], [0], [1], [0, 0, 1, 1], [], []>} : vector<128x128xbf16>, vector<128x128xbf16>, vector<128x128xf32> -> vector<128x128xf32>
    %111 = arith.addf %106, %110 : vector<128x128xf32>
    %c41 = arith.constant 41 : index
    %c0_48 = arith.constant 0 : index
    %112 = vector.load %arg6[%c41, %c0_48] : memref<304x128xf32, #tpu.memory_space<vmem>>, vector<128x128xf32>
    %113 = vector.broadcast %31 : vector<128x1xf32> to vector<128x128xf32>
    %114 = arith.mulf %112, %113 : vector<128x128xf32>
    %115 = arith.truncf %114 : vector<128x128xf32> to vector<128x128xbf16>
    %c1024 = arith.constant 1024 : index
    %c0_49 = arith.constant 0 : index
    %116 = vector.load %arg3[%c1024, %c0_49] : memref<1152x128xbf16, #tpu.memory_space<vmem>>, vector<128x128xbf16>
    %cst_50 = arith.constant dense<0.000000e+00> : vector<128x128xf32>
    %117 = tpu.matmul %115, %116, %cst_50 {dimension_numbers = #tpu.dot_dimension_numbers<[1], [0], [0], [1], [0, 0, 1, 1], [], []>} : vector<128x128xbf16>, vector<128x128xbf16>, vector<128x128xf32> -> vector<128x128xf32>
    %118 = arith.addf %111, %117 : vector<128x128xf32>
    %119 = vector.broadcast %3 : f32 to vector<128x128xf32>
    %120 = arith.addf %118, %119 : vector<128x128xf32>
    %cst_51 = arith.constant 0.000000e+00 : f32
    %121 = vector.broadcast %cst_51 : f32 to vector<128x128xf32>
    %122 = arith.cmpf oge, %120, %121 : vector<128x128xf32>
    %123 = vector.broadcast %4 : f32 to vector<128x128xf32>
    %124 = arith.mulf %123, %120 : vector<128x128xf32>
    %125 = arith.select %122, %120, %124 : vector<128x128xi1>, vector<128x128xf32>
    %126 = vector.broadcast %5 : f32 to vector<128x128xf32>
    %127 = arith.addf %125, %126 : vector<128x128xf32>
    %c24_52 = arith.constant 24 : index
    %c0_53 = arith.constant 0 : index
    %128 = vector.load %arg7[%c24_52, %c0_53] : memref<304x128xf32, #tpu.memory_space<vmem>>, vector<128x128xf32>
    tpu.vector_store %arg7[%c24_52, %c0_53], %127 {strides = array<i32>} : memref<304x128xf32, #tpu.memory_space<vmem>>, vector<128x128xf32>,
    %cst_54 = arith.constant 0.000000e+00 : f32
    %129 = vector.broadcast %cst_54 : f32 to vector<128x128xf32>
    %c135 = arith.constant 135 : index
    %c0_55 = arith.constant 0 : index
    %130 = vector.load %arg6[%c135, %c0_55] : memref<304x128xf32, #tpu.memory_space<vmem>>, vector<128x128xf32>
    %131 = vector.broadcast %27 : vector<128x1xf32> to vector<128x128xf32>
    %132 = arith.mulf %130, %131 : vector<128x128xf32>
    %133 = arith.truncf %132 : vector<128x128xf32> to vector<128x128xbf16>
    %c0_56 = arith.constant 0 : index
    %c0_57 = arith.constant 0 : index
    %134 = vector.load %arg3[%c0_56, %c0_57] : memref<1152x128xbf16, #tpu.memory_space<vmem>>, vector<128x128xbf16>
    %cst_58 = arith.constant dense<0.000000e+00> : vector<128x128xf32>
    %135 = tpu.matmul %133, %134, %cst_58 {dimension_numbers = #tpu.dot_dimension_numbers<[1], [0], [0], [1], [0, 0, 1, 1], [], []>} : vector<128x128xbf16>, vector<128x128xbf16>, vector<128x128xf32> -> vector<128x128xf32>
    %136 = arith.addf %129, %135 : vector<128x128xf32>
    %c136 = arith.constant 136 : index
    %c0_59 = arith.constant 0 : index
    %137 = vector.load %arg6[%c136, %c0_59] : memref<304x128xf32, #tpu.memory_space<vmem>>, vector<128x128xf32>
    %138 = arith.truncf %137 : vector<128x128xf32> to vector<128x128xbf16>
    %c128_60 = arith.constant 128 : index
    %c0_61 = arith.constant 0 : index
    %139 = vector.load %arg3[%c128_60, %c0_61] : memref<1152x128xbf16, #tpu.memory_space<vmem>>, vector<128x128xbf16>
    %cst_62 = arith.constant dense<0.000000e+00> : vector<128x128xf32>
    %140 = tpu.matmul %138, %139, %cst_62 {dimension_numbers = #tpu.dot_dimension_numbers<[1], [0], [0], [1], [0, 0, 1, 1], [], []>} : vector<128x128xbf16>, vector<128x128xbf16>, vector<128x128xf32> -> vector<128x128xf32>
    %141 = arith.addf %136, %140 : vector<128x128xf32>
    %c137 = arith.constant 137 : index
    %c0_63 = arith.constant 0 : index
    %142 = vector.load %arg6[%c137, %c0_63] : memref<304x128xf32, #tpu.memory_space<vmem>>, vector<128x128xf32>
    %143 = vector.broadcast %31 : vector<128x1xf32> to vector<128x128xf32>
    %144 = arith.mulf %142, %143 : vector<128x128xf32>
    %145 = arith.truncf %144 : vector<128x128xf32> to vector<128x128xbf16>
    %c256_64 = arith.constant 256 : index
    %c0_65 = arith.constant 0 : index
    %146 = vector.load %arg3[%c256_64, %c0_65] : memref<1152x128xbf16, #tpu.memory_space<vmem>>, vector<128x128xbf16>
    %cst_66 = arith.constant dense<0.000000e+00> : vector<128x128xf32>
    %147 = tpu.matmul %145, %146, %cst_66 {dimension_numbers = #tpu.dot_dimension_numbers<[1], [0], [0], [1], [0, 0, 1, 1], [], []>} : vector<128x128xbf16>, vector<128x128xbf16>, vector<128x128xf32> -> vector<128x128xf32>
    %148 = arith.addf %141, %147 : vector<128x128xf32>
    %c151 = arith.constant 151 : index
    %c0_67 = arith.constant 0 : index
    %149 = vector.load %arg6[%c151, %c0_67] : memref<304x128xf32, #tpu.memory_space<vmem>>, vector<128x128xf32>
    %150 = vector.broadcast %27 : vector<128x1xf32> to vector<128x128xf32>
    %151 = arith.mulf %149, %150 : vector<128x128xf32>
    %152 = arith.truncf %151 : vector<128x128xf32> to vector<128x128xbf16>
    %c384_68 = arith.constant 384 : index
    %c0_69 = arith.constant 0 : index
    %153 = vector.load %arg3[%c384_68, %c0_69] : memref<1152x128xbf16, #tpu.memory_space<vmem>>, vector<128x128xbf16>
    %cst_70 = arith.constant dense<0.000000e+00> : vector<128x128xf32>
    %154 = tpu.matmul %152, %153, %cst_70 {dimension_numbers = #tpu.dot_dimension_numbers<[1], [0], [0], [1], [0, 0, 1, 1], [], []>} : vector<128x128xbf16>, vector<128x128xbf16>, vector<128x128xf32> -> vector<128x128xf32>
    %155 = arith.addf %148, %154 : vector<128x128xf32>
    %c152_71 = arith.constant 152 : index
    %c0_72 = arith.constant 0 : index
    %156 = vector.load %arg6[%c152_71, %c0_72] : memref<304x128xf32, #tpu.memory_space<vmem>>, vector<128x128xf32>
    %157 = arith.truncf %156 : vector<128x128xf32> to vector<128x128xbf16>
    %c512_73 = arith.constant 512 : index
    %c0_74 = arith.constant 0 : index
    %158 = vector.load %arg3[%c512_73, %c0_74] : memref<1152x128xbf16, #tpu.memory_space<vmem>>, vector<128x128xbf16>
    %cst_75 = arith.constant dense<0.000000e+00> : vector<128x128xf32>
    %159 = tpu.matmul %157, %158, %cst_75 {dimension_numbers = #tpu.dot_dimension_numbers<[1], [0], [0], [1], [0, 0, 1, 1], [], []>} : vector<128x128xbf16>, vector<128x128xbf16>, vector<128x128xf32> -> vector<128x128xf32>
    %160 = arith.addf %155, %159 : vector<128x128xf32>
    %c153 = arith.constant 153 : index
    %c0_76 = arith.constant 0 : index
    %161 = vector.load %arg6[%c153, %c0_76] : memref<304x128xf32, #tpu.memory_space<vmem>>, vector<128x128xf32>
    %162 = vector.broadcast %31 : vector<128x1xf32> to vector<128x128xf32>
    %163 = arith.mulf %161, %162 : vector<128x128xf32>
    %164 = arith.truncf %163 : vector<128x128xf32> to vector<128x128xbf16>
    %c640_77 = arith.constant 640 : index
    %c0_78 = arith.constant 0 : index
    %165 = vector.load %arg3[%c640_77, %c0_78] : memref<1152x128xbf16, #tpu.memory_space<vmem>>, vector<128x128xbf16>
    %cst_79 = arith.constant dense<0.000000e+00> : vector<128x128xf32>
    %166 = tpu.matmul %164, %165, %cst_79 {dimension_numbers = #tpu.dot_dimension_numbers<[1], [0], [0], [1], [0, 0, 1, 1], [], []>} : vector<128x128xbf16>, vector<128x128xbf16>, vector<128x128xf32> -> vector<128x128xf32>
    %167 = arith.addf %160, %166 : vector<128x128xf32>
    %c167 = arith.constant 167 : index
    %c0_80 = arith.constant 0 : index
    %168 = vector.load %arg6[%c167, %c0_80] : memref<304x128xf32, #tpu.memory_space<vmem>>, vector<128x128xf32>
    %169 = vector.broadcast %27 : vector<128x1xf32> to vector<128x128xf32>
    %170 = arith.mulf %168, %169 : vector<128x128xf32>
    %171 = arith.truncf %170 : vector<128x128xf32> to vector<128x128xbf16>
    %c768_81 = arith.constant 768 : index
    %c0_82 = arith.constant 0 : index
    %172 = vector.load %arg3[%c768_81, %c0_82] : memref<1152x128xbf16, #tpu.memory_space<vmem>>, vector<128x128xbf16>
    %cst_83 = arith.constant dense<0.000000e+00> : vector<128x128xf32>
    %173 = tpu.matmul %171, %172, %cst_83 {dimension_numbers = #tpu.dot_dimension_numbers<[1], [0], [0], [1], [0, 0, 1, 1], [], []>} : vector<128x128xbf16>, vector<128x128xbf16>, vector<128x128xf32> -> vector<128x128xf32>
    %174 = arith.addf %167, %173 : vector<128x128xf32>
    %c168 = arith.constant 168 : index
    %c0_84 = arith.constant 0 : index
    %175 = vector.load %arg6[%c168, %c0_84] : memref<304x128xf32, #tpu.memory_space<vmem>>, vector<128x128xf32>
    %176 = arith.truncf %175 : vector<128x128xf32> to vector<128x128xbf16>
    %c896_85 = arith.constant 896 : index
    %c0_86 = arith.constant 0 : index
    %177 = vector.load %arg3[%c896_85, %c0_86] : memref<1152x128xbf16, #tpu.memory_space<vmem>>, vector<128x128xbf16>
    %cst_87 = arith.constant dense<0.000000e+00> : vector<128x128xf32>
    %178 = tpu.matmul %176, %177, %cst_87 {dimension_numbers = #tpu.dot_dimension_numbers<[1], [0], [0], [1], [0, 0, 1, 1], [], []>} : vector<128x128xbf16>, vector<128x128xbf16>, vector<128x128xf32> -> vector<128x128xf32>
    %179 = arith.addf %174, %178 : vector<128x128xf32>
    %c169 = arith.constant 169 : index
    %c0_88 = arith.constant 0 : index
    %180 = vector.load %arg6[%c169, %c0_88] : memref<304x128xf32, #tpu.memory_space<vmem>>, vector<128x128xf32>
    %181 = vector.broadcast %31 : vector<128x1xf32> to vector<128x128xf32>
    %182 = arith.mulf %180, %181 : vector<128x128xf32>
    %183 = arith.truncf %182 : vector<128x128xf32> to vector<128x128xbf16>
    %c1024_89 = arith.constant 1024 : index
    %c0_90 = arith.constant 0 : index
    %184 = vector.load %arg3[%c1024_89, %c0_90] : memref<1152x128xbf16, #tpu.memory_space<vmem>>, vector<128x128xbf16>
    %cst_91 = arith.constant dense<0.000000e+00> : vector<128x128xf32>
    %185 = tpu.matmul %183, %184, %cst_91 {dimension_numbers = #tpu.dot_dimension_numbers<[1], [0], [0], [1], [0, 0, 1, 1], [], []>} : vector<128x128xbf16>, vector<128x128xbf16>, vector<128x128xf32> -> vector<128x128xf32>
    %186 = arith.addf %179, %185 : vector<128x128xf32>
    %187 = vector.broadcast %3 : f32 to vector<128x128xf32>
    %188 = arith.addf %186, %187 : vector<128x128xf32>
    %cst_92 = arith.constant 0.000000e+00 : f32
    %189 = vector.broadcast %cst_92 : f32 to vector<128x128xf32>
    %190 = arith.cmpf oge, %188, %189 : vector<128x128xf32>
    %191 = vector.broadcast %4 : f32 to vector<128x128xf32>
    %192 = arith.mulf %191, %188 : vector<128x128xf32>
    %193 = arith.select %190, %188, %192 : vector<128x128xi1>, vector<128x128xf32>
    %194 = vector.broadcast %5 : f32 to vector<128x128xf32>
    %195 = arith.addf %193, %194 : vector<128x128xf32>
    %c152_93 = arith.constant 152 : index
    %c0_94 = arith.constant 0 : index
    %196 = vector.load %arg7[%c152_93, %c0_94] : memref<304x128xf32, #tpu.memory_space<vmem>>, vector<128x128xf32>
    tpu.vector_store %arg7[%c152_93, %c0_94], %195 {strides = array<i32>} : memref<304x128xf32, #tpu.memory_space<vmem>>, vector<128x128xf32>,
    %cst_95 = arith.constant 0.000000e+00 : f32
    %197 = vector.broadcast %cst_95 : f32 to vector<128x128xf32>
    %c7_96 = arith.constant 7 : index
    %c0_97 = arith.constant 0 : index
    %198 = vector.load %arg7[%c7_96, %c0_97] : memref<304x128xf32, #tpu.memory_space<vmem>>, vector<128x128xf32>
    %199 = vector.broadcast %27 : vector<128x1xf32> to vector<128x128xf32>
    %200 = arith.mulf %198, %199 : vector<128x128xf32>
    %201 = arith.truncf %200 : vector<128x128xf32> to vector<128x128xbf16>
    %c0_98 = arith.constant 0 : index
    %c0_99 = arith.constant 0 : index
    %202 = vector.load %arg4[%c0_98, %c0_99] : memref<1152x128xbf16, #tpu.memory_space<vmem>>, vector<128x128xbf16>
    %cst_100 = arith.constant dense<0.000000e+00> : vector<128x128xf32>
    %203 = tpu.matmul %201, %202, %cst_100 {dimension_numbers = #tpu.dot_dimension_numbers<[1], [0], [0], [1], [0, 0, 1, 1], [], []>} : vector<128x128xbf16>, vector<128x128xbf16>, vector<128x128xf32> -> vector<128x128xf32>
    %204 = arith.addf %197, %203 : vector<128x128xf32>
    %c8_101 = arith.constant 8 : index
    %c0_102 = arith.constant 0 : index
    %205 = vector.load %arg7[%c8_101, %c0_102] : memref<304x128xf32, #tpu.memory_space<vmem>>, vector<128x128xf32>
    %206 = arith.truncf %205 : vector<128x128xf32> to vector<128x128xbf16>
    %c128_103 = arith.constant 128 : index
    %c0_104 = arith.constant 0 : index
    %207 = vector.load %arg4[%c128_103, %c0_104] : memref<1152x128xbf16, #tpu.memory_space<vmem>>, vector<128x128xbf16>
    %cst_105 = arith.constant dense<0.000000e+00> : vector<128x128xf32>
    %208 = tpu.matmul %206, %207, %cst_105 {dimension_numbers = #tpu.dot_dimension_numbers<[1], [0], [0], [1], [0, 0, 1, 1], [], []>} : vector<128x128xbf16>, vector<128x128xbf16>, vector<128x128xf32> -> vector<128x128xf32>
    %209 = arith.addf %204, %208 : vector<128x128xf32>
    %c9_106 = arith.constant 9 : index
    %c0_107 = arith.constant 0 : index
    %210 = vector.load %arg7[%c9_106, %c0_107] : memref<304x128xf32, #tpu.memory_space<vmem>>, vector<128x128xf32>
    %211 = vector.broadcast %31 : vector<128x1xf32> to vector<128x128xf32>
    %212 = arith.mulf %210, %211 : vector<128x128xf32>
    %213 = arith.truncf %212 : vector<128x128xf32> to vector<128x128xbf16>
    %c256_108 = arith.constant 256 : index
    %c0_109 = arith.constant 0 : index
    %214 = vector.load %arg4[%c256_108, %c0_109] : memref<1152x128xbf16, #tpu.memory_space<vmem>>, vector<128x128xbf16>
    %cst_110 = arith.constant dense<0.000000e+00> : vector<128x128xf32>
    %215 = tpu.matmul %213, %214, %cst_110 {dimension_numbers = #tpu.dot_dimension_numbers<[1], [0], [0], [1], [0, 0, 1, 1], [], []>} : vector<128x128xbf16>, vector<128x128xbf16>, vector<128x128xf32> -> vector<128x128xf32>
    %216 = arith.addf %209, %215 : vector<128x128xf32>
    %c23_111 = arith.constant 23 : index
    %c0_112 = arith.constant 0 : index
    %217 = vector.load %arg7[%c23_111, %c0_112] : memref<304x128xf32, #tpu.memory_space<vmem>>, vector<128x128xf32>
    %218 = vector.broadcast %27 : vector<128x1xf32> to vector<128x128xf32>
    %219 = arith.mulf %217, %218 : vector<128x128xf32>
    %220 = arith.truncf %219 : vector<128x128xf32> to vector<128x128xbf16>
    %c384_113 = arith.constant 384 : index
    %c0_114 = arith.constant 0 : index
    %221 = vector.load %arg4[%c384_113, %c0_114] : memref<1152x128xbf16, #tpu.memory_space<vmem>>, vector<128x128xbf16>
    %cst_115 = arith.constant dense<0.000000e+00> : vector<128x128xf32>
    %222 = tpu.matmul %220, %221, %cst_115 {dimension_numbers = #tpu.dot_dimension_numbers<[1], [0], [0], [1], [0, 0, 1, 1], [], []>} : vector<128x128xbf16>, vector<128x128xbf16>, vector<128x128xf32> -> vector<128x128xf32>
    %223 = arith.addf %216, %222 : vector<128x128xf32>
    %c24_116 = arith.constant 24 : index
    %c0_117 = arith.constant 0 : index
    %224 = vector.load %arg7[%c24_116, %c0_117] : memref<304x128xf32, #tpu.memory_space<vmem>>, vector<128x128xf32>
    %225 = arith.truncf %224 : vector<128x128xf32> to vector<128x128xbf16>
    %c512_118 = arith.constant 512 : index
    %c0_119 = arith.constant 0 : index
    %226 = vector.load %arg4[%c512_118, %c0_119] : memref<1152x128xbf16, #tpu.memory_space<vmem>>, vector<128x128xbf16>
    %cst_120 = arith.constant dense<0.000000e+00> : vector<128x128xf32>
    %227 = tpu.matmul %225, %226, %cst_120 {dimension_numbers = #tpu.dot_dimension_numbers<[1], [0], [0], [1], [0, 0, 1, 1], [], []>} : vector<128x128xbf16>, vector<128x128xbf16>, vector<128x128xf32> -> vector<128x128xf32>
    %228 = arith.addf %223, %227 : vector<128x128xf32>
    %c25_121 = arith.constant 25 : index
    %c0_122 = arith.constant 0 : index
    %229 = vector.load %arg7[%c25_121, %c0_122] : memref<304x128xf32, #tpu.memory_space<vmem>>, vector<128x128xf32>
    %230 = vector.broadcast %31 : vector<128x1xf32> to vector<128x128xf32>
    %231 = arith.mulf %229, %230 : vector<128x128xf32>
    %232 = arith.truncf %231 : vector<128x128xf32> to vector<128x128xbf16>
    %c640_123 = arith.constant 640 : index
    %c0_124 = arith.constant 0 : index
    %233 = vector.load %arg4[%c640_123, %c0_124] : memref<1152x128xbf16, #tpu.memory_space<vmem>>, vector<128x128xbf16>
    %cst_125 = arith.constant dense<0.000000e+00> : vector<128x128xf32>
    %234 = tpu.matmul %232, %233, %cst_125 {dimension_numbers = #tpu.dot_dimension_numbers<[1], [0], [0], [1], [0, 0, 1, 1], [], []>} : vector<128x128xbf16>, vector<128x128xbf16>, vector<128x128xf32> -> vector<128x128xf32>
    %235 = arith.addf %228, %234 : vector<128x128xf32>
    %c39_126 = arith.constant 39 : index
    %c0_127 = arith.constant 0 : index
    %236 = vector.load %arg7[%c39_126, %c0_127] : memref<304x128xf32, #tpu.memory_space<vmem>>, vector<128x128xf32>
    %237 = vector.broadcast %27 : vector<128x1xf32> to vector<128x128xf32>
    %238 = arith.mulf %236, %237 : vector<128x128xf32>
    %239 = arith.truncf %238 : vector<128x128xf32> to vector<128x128xbf16>
    %c768_128 = arith.constant 768 : index
    %c0_129 = arith.constant 0 : index
    %240 = vector.load %arg4[%c768_128, %c0_129] : memref<1152x128xbf16, #tpu.memory_space<vmem>>, vector<128x128xbf16>
    %cst_130 = arith.constant dense<0.000000e+00> : vector<128x128xf32>
    %241 = tpu.matmul %239, %240, %cst_130 {dimension_numbers = #tpu.dot_dimension_numbers<[1], [0], [0], [1], [0, 0, 1, 1], [], []>} : vector<128x128xbf16>, vector<128x128xbf16>, vector<128x128xf32> -> vector<128x128xf32>
    %242 = arith.addf %235, %241 : vector<128x128xf32>
    %c40_131 = arith.constant 40 : index
    %c0_132 = arith.constant 0 : index
    %243 = vector.load %arg7[%c40_131, %c0_132] : memref<304x128xf32, #tpu.memory_space<vmem>>, vector<128x128xf32>
    %244 = arith.truncf %243 : vector<128x128xf32> to vector<128x128xbf16>
    %c896_133 = arith.constant 896 : index
    %c0_134 = arith.constant 0 : index
    %245 = vector.load %arg4[%c896_133, %c0_134] : memref<1152x128xbf16, #tpu.memory_space<vmem>>, vector<128x128xbf16>
    %cst_135 = arith.constant dense<0.000000e+00> : vector<128x128xf32>
    %246 = tpu.matmul %244, %245, %cst_135 {dimension_numbers = #tpu.dot_dimension_numbers<[1], [0], [0], [1], [0, 0, 1, 1], [], []>} : vector<128x128xbf16>, vector<128x128xbf16>, vector<128x128xf32> -> vector<128x128xf32>
    %247 = arith.addf %242, %246 : vector<128x128xf32>
    %c41_136 = arith.constant 41 : index
    %c0_137 = arith.constant 0 : index
    %248 = vector.load %arg7[%c41_136, %c0_137] : memref<304x128xf32, #tpu.memory_space<vmem>>, vector<128x128xf32>
    %249 = vector.broadcast %31 : vector<128x1xf32> to vector<128x128xf32>
    %250 = arith.mulf %248, %249 : vector<128x128xf32>
    %251 = arith.truncf %250 : vector<128x128xf32> to vector<128x128xbf16>
    %c1024_138 = arith.constant 1024 : index
    %c0_139 = arith.constant 0 : index
    %252 = vector.load %arg4[%c1024_138, %c0_139] : memref<1152x128xbf16, #tpu.memory_space<vmem>>, vector<128x128xbf16>
    %cst_140 = arith.constant dense<0.000000e+00> : vector<128x128xf32>
    %253 = tpu.matmul %251, %252, %cst_140 {dimension_numbers = #tpu.dot_dimension_numbers<[1], [0], [0], [1], [0, 0, 1, 1], [], []>} : vector<128x128xbf16>, vector<128x128xbf16>, vector<128x128xf32> -> vector<128x128xf32>
    %254 = arith.addf %247, %253 : vector<128x128xf32>
    %255 = vector.broadcast %6 : f32 to vector<128x128xf32>
    %256 = arith.mulf %254, %255 : vector<128x128xf32>
    %c0_141 = arith.constant 0 : index
    %c0_142 = arith.constant 0 : index
    %c0_143 = arith.constant 0 : index
    %257 = vector.load %arg2[%c0_141, %c0_142, %c0_143] : memref<1x256x128xf32, #tpu.memory_space<vmem>>, vector<1x128x128xf32>
    %258 = vector.shape_cast %257 : vector<1x128x128xf32> to vector<128x128xf32>
    %259 = arith.addf %256, %258 : vector<128x128xf32>
    %c0_144 = arith.constant 0 : index
    %c0_145 = arith.constant 0 : index
    %c0_146 = arith.constant 0 : index
    %260 = vector.load %arg5[%c0_144, %c0_145, %c0_146] : memref<1x256x128xf32, #tpu.memory_space<vmem>>, vector<1x128x128xf32>
    %261 = vector.shape_cast %260 : vector<1x128x128xf32> to vector<128x128xf32>
    %262 = vector.shape_cast %259 : vector<128x128xf32> to vector<1x128x128xf32>
    tpu.vector_store %arg5[%c0_144, %c0_145, %c0_146], %262 {strides = array<i32>} : memref<1x256x128xf32, #tpu.memory_space<vmem>>, vector<1x128x128xf32>,
    %cst_147 = arith.constant 0.000000e+00 : f32
    %263 = vector.broadcast %cst_147 : f32 to vector<128x128xf32>
    %c135_148 = arith.constant 135 : index
    %c0_149 = arith.constant 0 : index
    %264 = vector.load %arg7[%c135_148, %c0_149] : memref<304x128xf32, #tpu.memory_space<vmem>>, vector<128x128xf32>
    %265 = vector.broadcast %27 : vector<128x1xf32> to vector<128x128xf32>
    %266 = arith.mulf %264, %265 : vector<128x128xf32>
    %267 = arith.truncf %266 : vector<128x128xf32> to vector<128x128xbf16>
    %c0_150 = arith.constant 0 : index
    %c0_151 = arith.constant 0 : index
    %268 = vector.load %arg4[%c0_150, %c0_151] : memref<1152x128xbf16, #tpu.memory_space<vmem>>, vector<128x128xbf16>
    %cst_152 = arith.constant dense<0.000000e+00> : vector<128x128xf32>
    %269 = tpu.matmul %267, %268, %cst_152 {dimension_numbers = #tpu.dot_dimension_numbers<[1], [0], [0], [1], [0, 0, 1, 1], [], []>} : vector<128x128xbf16>, vector<128x128xbf16>, vector<128x128xf32> -> vector<128x128xf32>
    %270 = arith.addf %263, %269 : vector<128x128xf32>
    %c136_153 = arith.constant 136 : index
    %c0_154 = arith.constant 0 : index
    %271 = vector.load %arg7[%c136_153, %c0_154] : memref<304x128xf32, #tpu.memory_space<vmem>>, vector<128x128xf32>
    %272 = arith.truncf %271 : vector<128x128xf32> to vector<128x128xbf16>
    %c128_155 = arith.constant 128 : index
    %c0_156 = arith.constant 0 : index
    %273 = vector.load %arg4[%c128_155, %c0_156] : memref<1152x128xbf16, #tpu.memory_space<vmem>>, vector<128x128xbf16>
    %cst_157 = arith.constant dense<0.000000e+00> : vector<128x128xf32>
    %274 = tpu.matmul %272, %273, %cst_157 {dimension_numbers = #tpu.dot_dimension_numbers<[1], [0], [0], [1], [0, 0, 1, 1], [], []>} : vector<128x128xbf16>, vector<128x128xbf16>, vector<128x128xf32> -> vector<128x128xf32>
    %275 = arith.addf %270, %274 : vector<128x128xf32>
    %c137_158 = arith.constant 137 : index
    %c0_159 = arith.constant 0 : index
    %276 = vector.load %arg7[%c137_158, %c0_159] : memref<304x128xf32, #tpu.memory_space<vmem>>, vector<128x128xf32>
    %277 = vector.broadcast %31 : vector<128x1xf32> to vector<128x128xf32>
    %278 = arith.mulf %276, %277 : vector<128x128xf32>
    %279 = arith.truncf %278 : vector<128x128xf32> to vector<128x128xbf16>
    %c256_160 = arith.constant 256 : index
    %c0_161 = arith.constant 0 : index
    %280 = vector.load %arg4[%c256_160, %c0_161] : memref<1152x128xbf16, #tpu.memory_space<vmem>>, vector<128x128xbf16>
    %cst_162 = arith.constant dense<0.000000e+00> : vector<128x128xf32>
    %281 = tpu.matmul %279, %280, %cst_162 {dimension_numbers = #tpu.dot_dimension_numbers<[1], [0], [0], [1], [0, 0, 1, 1], [], []>} : vector<128x128xbf16>, vector<128x128xbf16>, vector<128x128xf32> -> vector<128x128xf32>
    %282 = arith.addf %275, %281 : vector<128x128xf32>
    %c151_163 = arith.constant 151 : index
    %c0_164 = arith.constant 0 : index
    %283 = vector.load %arg7[%c151_163, %c0_164] : memref<304x128xf32, #tpu.memory_space<vmem>>, vector<128x128xf32>
    %284 = vector.broadcast %27 : vector<128x1xf32> to vector<128x128xf32>
    %285 = arith.mulf %283, %284 : vector<128x128xf32>
    %286 = arith.truncf %285 : vector<128x128xf32> to vector<128x128xbf16>
    %c384_165 = arith.constant 384 : index
    %c0_166 = arith.constant 0 : index
    %287 = vector.load %arg4[%c384_165, %c0_166] : memref<1152x128xbf16, #tpu.memory_space<vmem>>, vector<128x128xbf16>
    %cst_167 = arith.constant dense<0.000000e+00> : vector<128x128xf32>
    %288 = tpu.matmul %286, %287, %cst_167 {dimension_numbers = #tpu.dot_dimension_numbers<[1], [0], [0], [1], [0, 0, 1, 1], [], []>} : vector<128x128xbf16>, vector<128x128xbf16>, vector<128x128xf32> -> vector<128x128xf32>
    %289 = arith.addf %282, %288 : vector<128x128xf32>
    %c152_168 = arith.constant 152 : index
    %c0_169 = arith.constant 0 : index
    %290 = vector.load %arg7[%c152_168, %c0_169] : memref<304x128xf32, #tpu.memory_space<vmem>>, vector<128x128xf32>
    %291 = arith.truncf %290 : vector<128x128xf32> to vector<128x128xbf16>
    %c512_170 = arith.constant 512 : index
    %c0_171 = arith.constant 0 : index
    %292 = vector.load %arg4[%c512_170, %c0_171] : memref<1152x128xbf16, #tpu.memory_space<vmem>>, vector<128x128xbf16>
    %cst_172 = arith.constant dense<0.000000e+00> : vector<128x128xf32>
    %293 = tpu.matmul %291, %292, %cst_172 {dimension_numbers = #tpu.dot_dimension_numbers<[1], [0], [0], [1], [0, 0, 1, 1], [], []>} : vector<128x128xbf16>, vector<128x128xbf16>, vector<128x128xf32> -> vector<128x128xf32>
    %294 = arith.addf %289, %293 : vector<128x128xf32>
    %c153_173 = arith.constant 153 : index
    %c0_174 = arith.constant 0 : index
    %295 = vector.load %arg7[%c153_173, %c0_174] : memref<304x128xf32, #tpu.memory_space<vmem>>, vector<128x128xf32>
    %296 = vector.broadcast %31 : vector<128x1xf32> to vector<128x128xf32>
    %297 = arith.mulf %295, %296 : vector<128x128xf32>
    %298 = arith.truncf %297 : vector<128x128xf32> to vector<128x128xbf16>
    %c640_175 = arith.constant 640 : index
    %c0_176 = arith.constant 0 : index
    %299 = vector.load %arg4[%c640_175, %c0_176] : memref<1152x128xbf16, #tpu.memory_space<vmem>>, vector<128x128xbf16>
    %cst_177 = arith.constant dense<0.000000e+00> : vector<128x128xf32>
    %300 = tpu.matmul %298, %299, %cst_177 {dimension_numbers = #tpu.dot_dimension_numbers<[1], [0], [0], [1], [0, 0, 1, 1], [], []>} : vector<128x128xbf16>, vector<128x128xbf16>, vector<128x128xf32> -> vector<128x128xf32>
    %301 = arith.addf %294, %300 : vector<128x128xf32>
    %c167_178 = arith.constant 167 : index
    %c0_179 = arith.constant 0 : index
    %302 = vector.load %arg7[%c167_178, %c0_179] : memref<304x128xf32, #tpu.memory_space<vmem>>, vector<128x128xf32>
    %303 = vector.broadcast %27 : vector<128x1xf32> to vector<128x128xf32>
    %304 = arith.mulf %302, %303 : vector<128x128xf32>
    %305 = arith.truncf %304 : vector<128x128xf32> to vector<128x128xbf16>
    %c768_180 = arith.constant 768 : index
    %c0_181 = arith.constant 0 : index
    %306 = vector.load %arg4[%c768_180, %c0_181] : memref<1152x128xbf16, #tpu.memory_space<vmem>>, vector<128x128xbf16>
    %cst_182 = arith.constant dense<0.000000e+00> : vector<128x128xf32>
    %307 = tpu.matmul %305, %306, %cst_182 {dimension_numbers = #tpu.dot_dimension_numbers<[1], [0], [0], [1], [0, 0, 1, 1], [], []>} : vector<128x128xbf16>, vector<128x128xbf16>, vector<128x128xf32> -> vector<128x128xf32>
    %308 = arith.addf %301, %307 : vector<128x128xf32>
    %c168_183 = arith.constant 168 : index
    %c0_184 = arith.constant 0 : index
    %309 = vector.load %arg7[%c168_183, %c0_184] : memref<304x128xf32, #tpu.memory_space<vmem>>, vector<128x128xf32>
    %310 = arith.truncf %309 : vector<128x128xf32> to vector<128x128xbf16>
    %c896_185 = arith.constant 896 : index
    %c0_186 = arith.constant 0 : index
    %311 = vector.load %arg4[%c896_185, %c0_186] : memref<1152x128xbf16, #tpu.memory_space<vmem>>, vector<128x128xbf16>
    %cst_187 = arith.constant dense<0.000000e+00> : vector<128x128xf32>
    %312 = tpu.matmul %310, %311, %cst_187 {dimension_numbers = #tpu.dot_dimension_numbers<[1], [0], [0], [1], [0, 0, 1, 1], [], []>} : vector<128x128xbf16>, vector<128x128xbf16>, vector<128x128xf32> -> vector<128x128xf32>
    %313 = arith.addf %308, %312 : vector<128x128xf32>
    %c169_188 = arith.constant 169 : index
    %c0_189 = arith.constant 0 : index
    %314 = vector.load %arg7[%c169_188, %c0_189] : memref<304x128xf32, #tpu.memory_space<vmem>>, vector<128x128xf32>
    %315 = vector.broadcast %31 : vector<128x1xf32> to vector<128x128xf32>
    %316 = arith.mulf %314, %315 : vector<128x128xf32>
    %317 = arith.truncf %316 : vector<128x128xf32> to vector<128x128xbf16>
    %c1024_190 = arith.constant 1024 : index
    %c0_191 = arith.constant 0 : index
    %318 = vector.load %arg4[%c1024_190, %c0_191] : memref<1152x128xbf16, #tpu.memory_space<vmem>>, vector<128x128xbf16>
    %cst_192 = arith.constant dense<0.000000e+00> : vector<128x128xf32>
    %319 = tpu.matmul %317, %318, %cst_192 {dimension_numbers = #tpu.dot_dimension_numbers<[1], [0], [0], [1], [0, 0, 1, 1], [], []>} : vector<128x128xbf16>, vector<128x128xbf16>, vector<128x128xf32> -> vector<128x128xf32>
    %320 = arith.addf %313, %319 : vector<128x128xf32>
    %321 = vector.broadcast %6 : f32 to vector<128x128xf32>
    %322 = arith.mulf %320, %321 : vector<128x128xf32>
    %c0_193 = arith.constant 0 : index
    %c128_194 = arith.constant 128 : index
    %c0_195 = arith.constant 0 : index
    %323 = vector.load %arg2[%c0_193, %c128_194, %c0_195] : memref<1x256x128xf32, #tpu.memory_space<vmem>>, vector<1x128x128xf32>
    %324 = vector.shape_cast %323 : vector<1x128x128xf32> to vector<128x128xf32>
    %325 = arith.addf %322, %324 : vector<128x128xf32>
    %c0_196 = arith.constant 0 : index
    %c128_197 = arith.constant 128 : index
    %c0_198 = arith.constant 0 : index
    %326 = vector.load %arg5[%c0_196, %c128_197, %c0_198] : memref<1x256x128xf32, #tpu.memory_space<vmem>>, vector<1x128x128xf32>
    %327 = vector.shape_cast %326 : vector<1x128x128xf32> to vector<128x128xf32>
    %328 = vector.shape_cast %325 : vector<128x128xf32> to vector<1x128x128xf32>
    tpu.vector_store %arg5[%c0_196, %c128_197, %c0_198], %328 {strides = array<i32>} : memref<1x256x128xf32, #tpu.memory_space<vmem>>, vector<1x128x128xf32>,
    return
  }
  func.func @transform_0(%arg0: i32) -> i32 {
    %c0_i32 = arith.constant 0 : i32
    %c0_i32_0 = arith.constant 0 : i32
    return %c0_i32 : i32
  }
  func.func @transform_1(%arg0: i32) -> (i32, i32, i32) {
    %c0_i32 = arith.constant 0 : i32
    %c0_i32_0 = arith.constant 0 : i32
    %c0_i32_1 = arith.constant 0 : i32
    return %arg0, %c0_i32, %c0_i32_0 : i32, i32, i32
  }
  func.func @transform_2(%arg0: i32) -> (i32, i32) {
    %c0_i32 = arith.constant 0 : i32
    %c0_i32_0 = arith.constant 0 : i32
    %c0_i32_1 = arith.constant 0 : i32
    return %c0_i32, %c0_i32_0 : i32, i32
  }
  func.func @transform_3(%arg0: i32) -> (i32, i32) {
    %c0_i32 = arith.constant 0 : i32
    %c0_i32_0 = arith.constant 0 : i32
    %c0_i32_1 = arith.constant 0 : i32
    return %c0_i32, %c0_i32_0 : i32, i32
  }
  func.func @transform_4(%arg0: i32) -> (i32, i32, i32) {
    %c0_i32 = arith.constant 0 : i32
    %c0_i32_0 = arith.constant 0 : i32
    %c0_i32_1 = arith.constant 0 : i32
    return %arg0, %c0_i32, %c0_i32_0 : i32, i32, i32
  }
}

</mosaic_0001>

<bundles_post_ra>
// kernel: resblk_forward.1
= control target key start
LH: loop header
LB: loop body
LE: loop exit
PB: predicated region body
PF: predicated region fallthrough
CT: control target
= control target key end

     0   :  { %9 = vsyncpa [#allocation6], 0  ;;  %s14444_s0 = inlined_call_operand.vmem [shape: f32[7], index: 0, kind: input, shape index: {}]   ;;  %s14445_s1 = inlined_call_operand.vmem [shape: f32[2,256,128], index: 1, kind: input, shape index: {}]   ;;  %s14446_s2 = inlined_call_operand.vmem [shape: bf16[1152,128], index: 2, kind: input, shape index: {}]   ;;  %s14447_s3 = inlined_call_operand.vmem [shape: bf16[1152,128], index: 3, kind: input, shape index: {}]   ;;  %s14448_s4 = inlined_call_operand.hbm [shape: f32[2,256,128], index: 4, kind: output, shape index: {}]  }
   0x1   :  { %10 = vsyncpa [#allocation5], 0 }
   0x2   :  { %12 = vsyncpa [#allocation5 + $0x1], 0  ;;  %s11690_s15 = smov 0   ;;  %s11692_s16 = smov 0  }
   0x3   :  { %s11694_s17 = smov 0   ;;  %s11696_s18 = smov 0  }
   0x4 LB: > { %s11711_s19 = sadd.s32 4294967295, %s11657_s18   ;;  %s8666_s20 = sadd.s32 4294967294, %s11657_s18   ;;  %s11657_s18 = sphi %s11696_s18, %s14756_s18   ;;  %s11653_s17 = sphi %s11694_s17, %s14755_s17   ;;  %s11649_s16 = sphi %s11692_s16, %s14754_s16   ;;  %s11645_s15 = sphi %s11690_s15, %s14753_s15  }
   0x5   : > { %s11715_s21 = sadd.s32 1, %s11657_s18   ;;  %s114_s22 = sadd.s32 1, %s11653_s17 }
   0x6   : > { %s111_s23 = ssub.s32 %s11657_s18, %s11715_s21  ;;  %p124_p0 = scmp.ne.s32.totalorder %s11653_s17, %s11649_s16 }
   0x7   : > { %p112_p1 = scmp.eq.s32.totalorder %s111_s23, 0  ;;  %p125_p2 = scmp.eq.s32.totalorder %s11711_s19, 1 }
   0x8   : > { %p130_p3 = scmp.ne.s32.totalorder %s11649_s16, %s11645_s15  ;;  %p131_p4 = scmp.eq.s32.totalorder %s8666_s20, 1 }
   0x9   : > { %s11726_s24 = scalar_select %p112_p1, %s11653_s17, %s114_s22  }
   0xa   : > { %p11728_p5 = por %p125_p2, %p124_p0  ;;  %p11732_p6 = por %p131_p4, %p130_p3 }
   0xb   : > { %p8667_p7 = scmp.ge.s32.totalorder %s11657_s18, 1  ;;  %p138_p8 = scmp.lt.s32.totalorder %s11657_s18, 3 }
   0xc   : > { %p11246_p9 = scmp.eq.s32.totalorder %s11711_s19, 0  ;;  %s151_s30 = sshll.u32 %s14444_s0, 4  ;;  %s152_s30 = int_to_ptr.vmem [resolvable:$true] %s151_s30 }
   0xd   : > { %p11739_p10 = pnand %p8667_p7, %p138_p8  ;;  %s11576_s5 = scalar_lea.vmem %s152_s30, 16 }
   0xe   : > { %p11577_p13 = scmp.ne.s32.totalorder %s152_s30, %s11576_s5  ;;  %p11584_p3 = scmp.lt.s32.totalorder %s152_s30, %s152_s30 }
   0xf   : > { %p11238_p11 = pneg %p11739_p10  ;;  %p11585_p4 = scmp.lt.s32.totalorder %s11576_s5, %s11576_s5 }
  0x11   : > { %p11239_p12 = pnand %p11246_p9, %p11238_p11  ;;  %p11586_p7 = por %p11585_p4, %p11584_p3 }
  0x13   : > { %p11578_p0 = pneg %p11239_p12 }
  0x15   : > { %p11579_p1 = pnand %p11578_p0, %p11577_p13 }
  0x17   : > { %p11580_p2 = pneg %p11579_p1 }
  0x19   : > { %p11587_p8 = pnand %p11586_p7, %p11580_p2 }
  0x1b   : > { %11590 = shalt.err (!%p11587_p8)
}
  0x1c   : > { %s11659_s6 = smov [#allocation4]   ;;  %178 = sbr.rel (%p11739_p10) target bundleno = 1104 (0x450), region = 36 }
  0x1d   : > { %11241 = dma.vmem_to_smem (!%p11239_p12), %s152_s30, 16, %s11659_s6, [#allocation6]  }
  0x23   : > { %11636 = dma.done.wait (%p11246_p9), [#allocation6], 16  }
  0x24   : > { %11638 = vsyncadd (%p11246_p9), [#allocation6], 4294967280 }
  0x25   : > { %184 = sfence }
  0x26   : > { %v11285_v0 = vld [vmem:[%s14446_s2 + $0x40] sm:$0xff]   ;;  %v11660_v2 = vmov 0.0   ;;  %v11287_v3 = vld [vmem:[%s14446_s2 + $0x48] sm:$0xff]   ;;  %v11289_v5 = vld [vmem:[%s14446_s2 + $0x50] sm:$0xff]   ;;  %p205_p9 = scmp.lt.s32.totalorder %s11711_s19, 1  ;;  %v11661_v7 = vmov 0.0|0.0   ;;  %v218_v8 = vlaneseq }
  0x27   : > { %v11286_v1 = vld [vmem:[%s14446_s2 + $0x40] sm:$0xff]   ;;  %524 = vst [vmem:[#allocation2 + $0x8] sm:$0xff] %v11660_v2  ;;  %525 = vst [vmem:[#allocation2 + $0x10] sm:$0xff] %v11660_v2  ;;  %9568 = vmatprep.subr.bf16.mxu0 %v11285_v0  ;;  %v11288_v4 = vld [vmem:[%s14446_s2 + $0x48] sm:$0xff]   ;;  %9584 = vmatprep.mubr.bf16.mxu0 %v11661_v7  ;;  %s211_s23 = sld [smem:[#allocation4]]  ;;  %s8675_s27 = sld [smem:[#allocation4 + $0x1]] }
  0x28   : > { %523 = vst [vmem:[#allocation2] sm:$0xff] %v11660_v2  ;;  %526 = vst [vmem:[#allocation2 + $0x118] sm:$0xff] %v11660_v2  ;;  %9856 = vmatprep.subr.bf16.mxu1 %v11286_v1  ;;  %9569 = vmatpush3.bf16.msra.mxu0 %v11285_v0  ;;  %v11290_v6 = vld [vmem:[%s14446_s2 + $0x50] sm:$0xff]   ;;  %v11291_v9 = vld [vmem:[%s14446_s2 + $0x58] sm:$0xff]   ;;  %s206_s30 = scalar_select %p205_p9, %s11711_s19, 1  ;;  %v11794_v11 = vshrl.u32 %v218_v8, 7 }
  0x29   : > { %527 = vst [vmem:[#allocation2 + $0x120] sm:$0xff] %v11660_v2  ;;  %528 = vst [vmem:[#allocation2 + $0x128] sm:$0xff] %v11660_v2  ;;  %9857 = vmatpush3.bf16.msra.mxu1 %v11286_v1  ;;  %9570 = vmatprep.subr.bf16.mxu0 %v11287_v3  ;;  %v11292_v10 = vld [vmem:[%s14446_s2 + $0x58] sm:$0xff]   ;;  %v11293_v12 = vld [vmem:[%s14446_s2 + $0x60] sm:$0xff]   ;;  %s8678_s28 = sld [smem:[#allocation4 + $0x4]]  ;;  %s8679_s29 = sld [smem:[#allocation4 + $0x5]] }
  0x2a   : > { %529 = vst [vmem:[#allocation3] sm:$0xff] %v11660_v2  ;;  %530 = vst [vmem:[#allocation3 + $0x8] sm:$0xff] %v11660_v2  ;;  %9858 = vmatprep.subr.bf16.mxu1 %v11288_v4  ;;  %s8990_s9 = sshll.u32 %s206_s30, 8  ;;  %v11294_v13 = vld [vmem:[%s14446_s2 + $0x60] sm:$0xff]   ;;  %v239_v14 = vand.u32 15, %v11794_v11  ;;  %v11295_v15 = vld [vmem:[%s14446_s2 + $0x68] sm:$0xff]  }
  0x2b   : > { %531 = vst [vmem:[#allocation3 + $0x10] sm:$0xff] %v11660_v2  ;;  %532 = vst [vmem:[#allocation3 + $0x118] sm:$0xff] %v11660_v2  ;;  %s11806_s14 = scalar_lea.vmem %s14445_s1, %s8990_s9  ;;  %v11296_v16 = vld [vmem:[%s14446_s2 + $0x68] sm:$0xff]   ;;  %s8676_s30 = sld [smem:[#allocation4 + $0x2]]  ;;  %v11297_v17 = vld [vmem:[%s14446_s2 + $0x70] sm:$0xff]   ;;  %v11825_v23 = vadd.s32 16, %v11794_v11 }
  0x2c   : > { %533 = vst [vmem:[#allocation3 + $0x120] sm:$0xff] %v11660_v2  ;;  %534 = vst [vmem:[#allocation3 + $0x128] sm:$0xff] %v11660_v2  ;;  %9571 = vmatpush3.bf16.msra.mxu0 %v11287_v3  ;;  %v549_v18 = vld [vmem:[%s11806_s14 + $0x70] sm:$0xff]  ;;  %v550_v19 = vld [vmem:[%s11806_s14 + $0x78] sm:$0xff]  ;;  %vm427_vm0 = vcmp.gt.s32.totalorder %v239_v14, 0  ;;  %v11837_v29 = vadd.s32 32, %v11794_v11 }
  0x2d   : > { %9859 = vmatpush3.bf16.msra.mxu1 %v11288_v4  ;;  %9572 = vmatprep.subr.bf16.mxu0 %v11289_v5  ;;  %v535_v20 = vld [vmem:[%s11806_s14] sm:$0xff]  ;;  %v11298_v21 = vld [vmem:[%s14446_s2 + $0x70] sm:$0xff]   ;;  %v536_v22 = vld [vmem:[%s11806_s14 + $0x8] sm:$0xff]  ;;  %v11829_v26 = vstv %s211_s23  ;;  %v11834_v28 = vsel %vm427_vm0, 1.0, %v11660_v2  ;;  %v253_v33 = vand.u32 15, %v11825_v23  ;;  %s8680_s23 = sld [smem:[#allocation4 + $0x6]] }
  0x2e   : > { %9860 = vmatprep.subr.bf16.mxu1 %v11290_v6  ;;  %v650_v24 = vld [vmem:[%s11806_s14 + $0x80] sm:$0xff]  ;;  %v651_v25 = vld [vmem:[%s11806_s14 + $0x88] sm:$0xff]  ;;  %v11831_v27 = vstv %s8675_s27  ;;  %v566_v30 = vadd.f32 %v11829_v26, %v549_v18  ;;  %v567_v31 = vadd.f32 %v11829_v26, %v550_v19  ;;  %v552_v32 = vadd.f32 %v11829_v26, %v535_v20  ;;  %v11299_v34 = vld [vmem:[%s14446_s2 + $0x78] sm:$0xff]   ;;  %s8677_s27 = sld [smem:[#allocation4 + $0x3]]  ;;  %s11662_s9 = smov [#allocation7]  }
  0x2f   : > { %v553_v36 = vadd.f32 %v11829_v26, %v536_v22  ;;  %v666_v37 = vadd.f32 %v650_v24, %v11829_v26  ;;  %v667_v38 = vadd.f32 %v651_v25, %v11829_v26  ;;  %v11300_v39 = vld [vmem:[%s14446_s2 + $0x78] sm:$0xff]   ;;  %v537_v44 = vld [vmem:[%s11806_s14 + $0x10] sm:$0xff]  ;;  %v11301_v55 = vld [vmem:[%s14446_s2] sm:$0xff]   ;;  %s11595_s10 = sshll.u32 %s11662_s9, 4  ;;  %s11596_s10 = int_to_ptr.vmem [resolvable:$false] %s11595_s10 }
  0x30   : > { %9573 = vmatpush3.bf16.msra.mxu0 %v11289_v5  ;;  %vm582_vm1 = vcmp.ge.f32.partialorder %v566_v30, 0.0  ;;  %vm583_vm2 = vcmp.ge.f32.partialorder %v567_v31, 0.0  ;;  %v599_v40 = vmul.f32 %v11831_v27, %v566_v30  ;;  %v600_v41 = vmul.f32 %v11831_v27, %v567_v31  ;;  %v538_v45 = vld [vmem:[%s11806_s14 + $0x18] sm:$0xff]  ;;  %v652_v48 = vld [vmem:[%s11806_s14 + $0x90] sm:$0xff]  ;;  %v11302_v58 = vld [vmem:[%s14446_s2] sm:$0xff]   ;;  %s11597_s11 = scalar_lea.vmem %s11596_s10, 8192 }
  0x31   : > { %9861 = vmatpush3.bf16.msra.mxu1 %v11290_v6  ;;  %9574 = vmatprep.subr.bf16.mxu0 %v11291_v9  ;;  %v11846_v35 = vstv %s8676_s30  ;;  %vm568_vm3 = vcmp.ge.f32.partialorder %v552_v32, 0.0  ;;  %vm569_vm4 = vcmp.ge.f32.partialorder %v553_v36, 0.0  ;;  %v585_v42 = vmul.f32 %v11831_v27, %v552_v32  ;;  %v653_v52 = vld [vmem:[%s11806_s14 + $0x98] sm:$0xff]  ;;  %v11303_v1 = vld [vmem:[%s14446_s2 + $0x8] sm:$0xff]   ;;  %v539_v8 = vld [vmem:[%s11806_s14 + $0x20] sm:$0xff]  ;;  %s8991_s30 = sshll.u32 %s11711_s19, 12 }
  0x32   : > { %9862 = vmatprep.subr.bf16.mxu1 %v11292_v10  ;;  %v586_v43 = vmul.f32 %v11831_v27, %v553_v36  ;;  %v615_v46 = vsel %vm582_vm1, %v566_v30, %v599_v40  ;;  %v616_v47 = vsel %vm583_vm2, %v567_v31, %v600_v41  ;;  %vm682_vm5 = vcmp.ge.f32.partialorder %v666_v37, 0.0  ;;  %v654_v18 = vld [vmem:[%s11806_s14 + $0xa0] sm:$0xff]  ;;  %v655_v31 = vld [vmem:[%s11806_s14 + $0xa8] sm:$0xff]  ;;  %v11313_v23 = vld [vmem:[%s14446_s2 + $0x30] sm:$0xff]   ;;  %s14394_s8 = scalar_lea.hbm %s14448_s4, %s8991_s30 }
  0x33   : > { %v632_v49 = vadd.f32 %v11846_v35, %v615_v46  ;;  %v633_v50 = vadd.f32 %v11846_v35, %v616_v47  ;;  %v601_v51 = vsel %vm568_vm3, %v552_v32, %v585_v42  ;;  %vm683_vm6 = vcmp.ge.f32.partialorder %v667_v38, 0.0  ;;  %v541_v32 = vld [vmem:[%s11806_s14 + $0x30] sm:$0xff]  ;;  %v11307_v46 = vld [vmem:[%s14446_s2 + $0x18] sm:$0xff]  }
  0x34   : > { %9575 = vmatpush3.bf16.msra.mxu0 %v11291_v9  ;;  %v602_v53 = vsel %vm569_vm4, %v553_v36, %v586_v43  ;;  %v618_v54 = vadd.f32 %v11846_v35, %v601_v51  ;;  %v698_v56 = vmul.f32 %v666_v37, %v11831_v27  ;;  %v699_v57 = vmul.f32 %v667_v38, %v11831_v27  ;;  %v540_v9 = vld [vmem:[%s11806_s14 + $0x28] sm:$0xff]  ;;  %v11306_v43 = vld [vmem:[%s14446_s2 + $0x10] sm:$0xff]  }
  0x35   : > { %9863 = vmatpush3.bf16.msra.mxu1 %v11292_v10  ;;  %9576 = vmatprep.subr.bf16.mxu0 %v11293_v12  ;;  %648 = vst [vmem:[#allocation2 + $0x88] sm:$0xff] %v632_v49  ;;  %649 = vst [vmem:[#allocation2 + $0x90] sm:$0xff] %v633_v50  ;;  %v2806_v59 = vpack.c.bf16 %v633_v50, %v632_v49  ;;  %v619_v60 = vadd.f32 %v11846_v35, %v602_v53  ;;  %v11304_v10 = vld [vmem:[%s14446_s2 + $0x8] sm:$0xff]   ;;  %v267_v36 = vand.u32 15, %v11837_v29  ;;  %v656_v49 = vld [vmem:[%s11806_s14 + $0xb0] sm:$0xff] }
  0x36   : > { %9864 = vmatprep.subr.bf16.mxu1 %v11294_v13  ;;  %v554_v61 = vadd.f32 %v11829_v26, %v537_v44  ;;  %v555_v62 = vadd.f32 %v11829_v26, %v538_v45  ;;  %634 = vst [vmem:[#allocation2 + $0x18] sm:$0xff] %v618_v54  ;;  %v714_v63 = vsel %vm682_vm5, %v666_v37, %v698_v56  ;;  %v657_v50 = vld [vmem:[%s11806_s14 + $0xb8] sm:$0xff] }
  0x37   : > { %v715_v0 = vsel %vm683_vm6, %v667_v38, %v699_v57  ;;  %v668_v3 = vadd.f32 %v652_v48, %v11829_v26  ;;  %v669_v4 = vadd.f32 %v653_v52, %v11829_v26  ;;  %9872 = vmatprep.mubr.bf16.mxu1 %v2806_v59  ;;  %635 = vst [vmem:[#allocation2 + $0x20] sm:$0xff] %v619_v60 }
  0x38   : > { %9577 = vmatpush3.bf16.msra.mxu0 %v11293_v12  ;;  %v835_v5 = vpack.c.bf16 %v619_v60, %v618_v54  ;;  %v730_v6 = vadd.f32 %v714_v63, %v11846_v35  ;;  %v731_v7 = vadd.f32 %v715_v0, %v11846_v35  ;;  %vm570_vm7 = vcmp.ge.f32.partialorder %v554_v61, 0.0  ;;  %v543_v54 = vld [vmem:[%s11806_s14 + $0x40] sm:$0xff]  ;;  %v11308_v60 = vld [vmem:[%s14446_s2 + $0x18] sm:$0xff]  }
  0x39   : > { %9865 = vmatpush3.bf16.msra.mxu1 %v11294_v13  ;;  %9578 = vmatprep.subr.bf16.mxu0 %v11295_v15  ;;  %vm571_vm8 = vcmp.ge.f32.partialorder %v555_v62, 0.0  ;;  %v587_v12 = vmul.f32 %v11831_v27, %v554_v61  ;;  %v588_v13 = vmul.f32 %v11831_v27, %v555_v62  ;;  %vm684_vm9 = vcmp.ge.f32.partialorder %v668_v3, 0.0 }
  0x3a   : > { %9866 = vmatprep.subr.bf16.mxu1 %v11296_v16  ;;  %746 = vst [vmem:[#allocation2 + $0x98] sm:$0xff] %v730_v6  ;;  %747 = vst [vmem:[#allocation2 + $0xa0] sm:$0xff] %v731_v7  ;;  %v2807_v14 = vpack.c.bf16 %v731_v7, %v730_v6  ;;  %vm685_vm10 = vcmp.ge.f32.partialorder %v669_v4, 0.0  ;;  %v557_v22 = vadd.f32 %v11829_v26, %v540_v9  ;;  %v11309_v7 = vld [vmem:[%s14446_s2 + $0x20] sm:$0xff]  }
  0x3b   : > { %v603_v19 = vsel %vm570_vm7, %v554_v61, %v587_v12  ;;  %v604_v20 = vsel %vm571_vm8, %v555_v62, %v588_v13  ;;  %v670_v44 = vadd.f32 %v654_v18, %v11829_v26  ;;  %v671_v45 = vadd.f32 %v655_v31, %v11829_v26  ;;  %v658_v12 = vld [vmem:[%s11806_s14 + $0xc0] sm:$0xff] }
  0x3c   : > { %9579 = vmatpush3.bf16.msra.mxu0 %v11295_v15  ;;  %v700_v15 = vmul.f32 %v668_v3, %v11831_v27  ;;  %v620_v24 = vadd.f32 %v11846_v35, %v603_v19  ;;  %v621_v25 = vadd.f32 %v11846_v35, %v604_v20  ;;  %vm573_vm12 = vcmp.ge.f32.partialorder %v557_v22, 0.0 }
  0x3d   : > { %9867 = vmatpush3.bf16.msra.mxu1 %v11296_v16  ;;  %9580 = vmatprep.subr.bf16.mxu0 %v11297_v17  ;;  %v701_v16 = vmul.f32 %v669_v4, %v11831_v27  ;;  %v590_v42 = vmul.f32 %v11831_v27, %v557_v22  ;;  %v558_v47 = vadd.f32 %v11829_v26, %v541_v32  ;;  %vm686_vm13 = vcmp.ge.f32.partialorder %v670_v44, 0.0 }
  0x3e   : > { %9868 = vmatprep.subr.bf16.mxu1 %v11298_v21  ;;  %v716_v30 = vsel %vm684_vm9, %v668_v3, %v700_v15  ;;  %636 = vst [vmem:[#allocation2 + $0x28] sm:$0xff] %v620_v24  ;;  %637 = vst [vmem:[#allocation2 + $0x30] sm:$0xff] %v621_v25  ;;  %vm687_vm14 = vcmp.ge.f32.partialorder %v671_v45, 0.0  ;;  %v703_v59 = vmul.f32 %v671_v45, %v11831_v27  ;;  %vm11992_vm8 = vcmp.gt.s32.totalorder %v253_v33, 0 }
  0x3f   : > { %v717_v37 = vsel %vm685_vm10, %v669_v4, %v701_v16  ;;  %v732_v38 = vadd.f32 %v716_v30, %v11846_v35  ;;  %v606_v53 = vsel %vm573_vm12, %v557_v22, %v590_v42  ;;  %vm574_vm15 = vcmp.ge.f32.partialorder %v558_v47, 0.0  ;;  %v659_v16 = vld [vmem:[%s11806_s14 + $0xc8] sm:$0xff]  ;;  %v545_v30 = vld [vmem:[%s11806_s14 + $0x50] sm:$0xff] }
  0x40   : > { %9581 = vmatpush3.bf16.msra.mxu0 %v11297_v17  ;;  %v11305_v17 = vld [vmem:[%s14446_s2 + $0x10] sm:$0xff]   ;;  %v733_v40 = vadd.f32 %v717_v37, %v11846_v35  ;;  %v623_v57 = vadd.f32 %v11846_v35, %v606_v53  ;;  %v591_v62 = vmul.f32 %v11831_v27, %v558_v47  ;;  %v672_v0 = vadd.f32 %v656_v49, %v11829_v26  ;;  %v11311_v37 = vld [vmem:[%s14446_s2 + $0x28] sm:$0xff]  }
  0x41   : > { %9869 = vmatpush3.bf16.msra.mxu1 %v11298_v21  ;;  %9582 = vmatprep.subr.bf16.mxu0 %v11299_v34  ;;  %v556_v21 = vadd.f32 %v11829_v26, %v539_v8  ;;  %748 = vst [vmem:[#allocation2 + $0xa8] sm:$0xff] %v732_v38  ;;  %v719_v3 = vsel %vm687_vm14, %v671_v45, %v703_v59  ;;  %v11312_v42 = vld [vmem:[%s14446_s2 + $0x28] sm:$0xff]   ;;  %vm11998_vm9 = vcmp.gt.s32.totalorder %v267_v36, 0  ;;  %v12009_v33 = vadd.s32 64, %v11794_v11 }
  0x42   : > { %9870 = vmatprep.subr.bf16.mxu1 %v11300_v39  ;;  %749 = vst [vmem:[#allocation2 + $0xb0] sm:$0xff] %v733_v40  ;;  %v2808_v51 = vpack.c.bf16 %v733_v40, %v732_v38  ;;  %639 = vst [vmem:[#allocation2 + $0x40] sm:$0xff] %v623_v57  ;;  %v673_v4 = vadd.f32 %v657_v50, %v11829_v26  ;;  %v560_v6 = vadd.f32 %v11829_v26, %v543_v54 }
  0x43   : > { %vm572_vm11 = vcmp.ge.f32.partialorder %v556_v21, 0.0  ;;  %v589_v41 = vmul.f32 %v11831_v27, %v556_v21  ;;  %v735_v9 = vadd.f32 %v719_v3, %v11846_v35  ;;  %vm688_vm1 = vcmp.ge.f32.partialorder %v672_v0, 0.0 }
  0x44   : > { %9583 = vmatpush3.bf16.msra.mxu0 %v11299_v34  ;;  %v542_v34 = vld [vmem:[%s11806_s14 + $0x38] sm:$0xff]  ;;  %vm689_vm2 = vcmp.ge.f32.partialorder %v673_v4, 0.0  ;;  %v704_v15 = vmul.f32 %v672_v0, %v11831_v27  ;;  %v705_v19 = vmul.f32 %v673_v4, %v11831_v27  ;;  %vm576_vm3 = vcmp.ge.f32.partialorder %v560_v6, 0.0 }
  0x45   : > { %9871 = vmatpush3.bf16.msra.mxu1 %v11300_v39  ;;  %9600 = vmatprep.subr.bf16.mxu0 %v11301_v55  ;;  %v836_v39 = vpack.c.bf16 %v621_v25, %v620_v24  ;;  %v559_v48 = vadd.f32 %v11829_v26, %v542_v34  ;;  %v605_v52 = vsel %vm572_vm11, %v556_v21, %v589_v41  ;;  %v11310_v21 = vld [vmem:[%s14446_s2 + $0x20] sm:$0xff]  }
  0x46   : > { %9888 = vmatprep.subr.bf16.mxu1 %v11302_v58  ;;  %v622_v56 = vadd.f32 %v11846_v35, %v605_v52  ;;  %751 = vst [vmem:[#allocation2 + $0xc0] sm:$0xff] %v735_v9  ;;  %v720_v22 = vsel %vm688_vm1, %v672_v0, %v704_v15  ;;  %v593_v24 = vmul.f32 %v11831_v27, %v560_v6  ;;  %v11314_v0 = vld [vmem:[%s14446_s2 + $0x30] sm:$0xff]   ;;  %v663_v15 = vld [vmem:[%s11806_s14 + $0xe8] sm:$0xff] }
  0x47   : > { %9585 = vmatmul.mubr.bf16.vlgmr.msra.gmra.mrb[0].mxu0 %v835_v5  ;;  %vm575_vm0 = vcmp.ge.f32.partialorder %v559_v48, 0.0  ;;  %v592_v63 = vmul.f32 %v11831_v27, %v559_v48  ;;  %v544_v5 = vld [vmem:[%s11806_s14 + $0x48] sm:$0xff]  ;;  %v674_v25 = vadd.f32 %v658_v12, %v11829_v26  ;;  %v721_v32 = vsel %vm689_vm2, %v673_v4, %v705_v19  ;;  %v11315_v12 = vld [vmem:[%s14446_s2 + $0x38] sm:$0xff]  }
  0x48   : > { %9601 = vmatpush3.bf16.msra.mxu0 %v11301_v55  ;;  %9873 = vmatmul.mubr.bf16.vlgmr.msra.gmra.mrb[0].mxu1 %v2807_v14  ;;  %v11930_v55 = vadd.s32 48, %v11794_v11  ;;  %638 = vst [vmem:[#allocation2 + $0x38] sm:$0xff] %v622_v56  ;;  %v837_v61 = vpack.c.bf16 %v623_v57, %v622_v56  ;;  %v561_v20 = vadd.f32 %v11829_v26, %v544_v5  ;;  %v547_v56 = vld [vmem:[%s11806_s14 + $0x60] sm:$0xff] }
  0x49   : > { %9602 = vmatprep.subr.bf16.mxu0 %v11303_v1  ;;  %9889 = vmatpush3.bf16.msra.mxu1 %v11302_v58  ;;  %v702_v58 = vmul.f32 %v670_v44, %v11831_v27  ;;  %v608_v13 = vsel %vm575_vm0, %v559_v48, %v592_v63  ;;  %v736_v34 = vadd.f32 %v720_v22, %v11846_v35  ;;  %vm690_vm5 = vcmp.ge.f32.partialorder %v674_v25, 0.0 }
  0x4a   : > { %9890 = vmatprep.subr.bf16.mxu1 %v11304_v10  ;;  %9588 = vmatprep.mubr.bf16.mxu0 %v836_v39  ;;  %v625_v18 = vadd.f32 %v11846_v35, %v608_v13  ;;  %vm577_vm4 = vcmp.ge.f32.partialorder %v561_v20, 0.0  ;;  %v737_v38 = vadd.f32 %v721_v32, %v11846_v35  ;;  %v594_v39 = vmul.f32 %v11831_v27, %v561_v20 }
  0x4b   : > { %9876 = vmatprep.mubr.bf16.mxu1 %v2808_v51  ;;  %v609_v40 = vsel %vm576_vm3, %v560_v6, %v593_v24  ;;  %v675_v41 = vadd.f32 %v659_v16, %v11829_v26  ;;  %752 = vst [vmem:[#allocation2 + $0xc8] sm:$0xff] %v736_v34  ;;  %v706_v45 = vmul.f32 %v674_v25, %v11831_v27  ;;  %v661_v51 = vld [vmem:[%s11806_s14 + $0xd8] sm:$0xff]  ;;  %v662_v6 = vld [vmem:[%s11806_s14 + $0xe0] sm:$0xff] }
  0x4c   : > { %9603 = vmatpush3.bf16.msra.mxu0 %v11303_v1  ;;  %v718_v1 = vsel %vm686_vm13, %v670_v44, %v702_v58  ;;  %641 = vst [vmem:[#allocation2 + $0x50] sm:$0xff] %v625_v18  ;;  %v626_v44 = vadd.f32 %v11846_v35, %v609_v40  ;;  %753 = vst [vmem:[#allocation2 + $0xd0] sm:$0xff] %v737_v38  ;;  %v2810_v48 = vpack.c.bf16 %v737_v38, %v736_v34  ;;  %v762_v24 = vld [vmem:[#allocation2 + $0x7] sm:$0xff]  ;;  %v763_v40 = vld [vmem:[#allocation2 + $0xf] sm:$0xff] }
  0x4d   : > { %9604 = vmatprep.subr.bf16.mxu0 %v11305_v17  ;;  %9891 = vmatpush3.bf16.msra.mxu1 %v11304_v10  ;;  %v734_v8 = vadd.f32 %v718_v1, %v11846_v35  ;;  %v607_v10 = vsel %vm574_vm15, %v558_v47, %v591_v62  ;;  %v660_v47 = vld [vmem:[%s11806_s14 + $0xd0] sm:$0xff]  ;;  %v610_v49 = vsel %vm577_vm4, %v561_v20, %v594_v39  ;;  %vm691_vm6 = vcmp.ge.f32.partialorder %v675_v41, 0.0  ;;  %v548_v62 = vld [vmem:[%s11806_s14 + $0x68] sm:$0xff]  ;;  %v12042_v34 = vld [vmem:[%s14446_s2 + $0x80] sm:$0xff]  }
  0x4e   : > { %9892 = vmatprep.subr.bf16.mxu1 %v11306_v43  ;;  %v624_v14 = vadd.f32 %v11846_v35, %v607_v10  ;;  %v707_v50 = vmul.f32 %v675_v41, %v11831_v27  ;;  %v627_v52 = vadd.f32 %v11846_v35, %v610_v49  ;;  %642 = vst [vmem:[#allocation2 + $0x58] sm:$0xff] %v626_v44  ;;  %v12066_v49 = vsel %vm11998_vm9, 1.0, %v11660_v2 }
  0x4f   : > { %9589 = vmatmul.mubr.bf16.gmra.mrb[4].mxu0 %v837_v61  ;;  %750 = vst [vmem:[#allocation2 + $0xb8] sm:$0xff] %v734_v8  ;;  %v722_v53 = vsel %vm690_vm5, %v674_v25, %v706_v45  ;;  %v676_v3 = vadd.f32 %v660_v47, %v11829_v26  ;;  %v677_v4 = vadd.f32 %v661_v51, %v11829_v26  ;;  %v12059_v47 = vsel %vm11992_vm8, 1.0, %v11660_v2 }
  0x50   : > { %9605 = vmatpush3.bf16.msra.mxu0 %v11305_v17  ;;  %v2809_v17 = vpack.c.bf16 %v735_v9, %v734_v8  ;;  %640 = vst [vmem:[#allocation2 + $0x48] sm:$0xff] %v624_v14  ;;  %v838_v31 = vpack.c.bf16 %v625_v18, %v624_v14  ;;  %v723_v59 = vsel %vm691_vm6, %v675_v41, %v707_v50  ;;  %643 = vst [vmem:[#allocation2 + $0x60] sm:$0xff] %v627_v52  ;;  %v11316_v18 = vld [vmem:[%s14446_s2 + $0x38] sm:$0xff]  }
  0x51   : > { %9606 = vmatprep.subr.bf16.mxu0 %v11307_v46  ;;  %9893 = vmatpush3.bf16.msra.mxu1 %v11306_v43  ;;  %v546_v43 = vld [vmem:[%s11806_s14 + $0x58] sm:$0xff]  ;;  %v839_v29 = vpack.c.bf16 %v627_v52, %v626_v44  ;;  %v739_v36 = vadd.f32 %v723_v59, %v11846_v35  ;;  %v564_v5 = vadd.f32 %v11829_v26, %v547_v56  ;;  %vm692_vm11 = vcmp.ge.f32.partialorder %v676_v3, 0.0  ;;  %v12053_v44 = vld [vmem:[%s14446_s2 + $0x80] sm:$0xff]  }
  0x52   : > { %9894 = vmatprep.subr.bf16.mxu1 %v11308_v60  ;;  %9877 = vmatmul.mubr.bf16.gmra.mrb[4].mxu1 %v2809_v17  ;;  %v563_v54 = vadd.f32 %v11829_v26, %v546_v43  ;;  %v565_v10 = vadd.f32 %v11829_v26, %v548_v62  ;;  %vm693_vm12 = vcmp.ge.f32.partialorder %v677_v4, 0.0  ;;  %v708_v14 = vmul.f32 %v676_v3, %v11831_v27 }
  0x53   : > { %9592 = vmatprep.mubr.bf16.mxu0 %v838_v31  ;;  %9880 = vmatprep.mubr.bf16.mxu1 %v2810_v48  ;;  %755 = vst [vmem:[#allocation2 + $0xe0] sm:$0xff] %v739_v36  ;;  %v709_v16 = vmul.f32 %v677_v4, %v11831_v27  ;;  %vm580_vm13 = vcmp.ge.f32.partialorder %v564_v5, 0.0  ;;  %v597_v17 = vmul.f32 %v11831_v27, %v564_v5  ;;  %14542 = vst [vmem:[#allocation10_spill] sm:$0xff] %v12059_v47  ;;  %v12061_v48 = vld [vmem:[#allocation2 + $0x17] sm:$0xff] }
  0x54   : > { %9607 = vmatpush3.bf16.msra.mxu0 %v11307_v46  ;;  %v562_v46 = vadd.f32 %v11829_v26, %v545_v30  ;;  %vm579_vm10 = vcmp.ge.f32.partialorder %v563_v54, 0.0  ;;  %v596_v63 = vmul.f32 %v11831_v27, %v563_v54  ;;  %vm581_vm14 = vcmp.ge.f32.partialorder %v565_v10, 0.0  ;;  %14543 = vst [vmem:[#allocation11_spill] sm:$0xff] %v12066_v49 }
  0x55   : > { %9608 = vmatprep.subr.bf16.mxu0 %v11309_v7  ;;  %9895 = vmatpush3.bf16.msra.mxu1 %v11308_v60  ;;  %v738_v60 = vadd.f32 %v722_v53, %v11846_v35  ;;  %v724_v20 = vsel %vm692_vm11, %v676_v3, %v708_v14  ;;  %v678_v22 = vadd.f32 %v662_v6, %v11829_v26  ;;  %v12071_v53 = vld [vmem:[#allocation2 + $0x27] sm:$0xff]  ;;  %v295_v59 = vand.u32 15, %v12009_v33 }
  0x56   : > { %9896 = vmatprep.subr.bf16.mxu1 %v11310_v21  ;;  %vm578_vm7 = vcmp.ge.f32.partialorder %v562_v46, 0.0  ;;  %v595_v61 = vmul.f32 %v11831_v27, %v562_v46  ;;  %v612_v8 = vsel %vm579_vm10, %v563_v54, %v596_v63  ;;  %v725_v25 = vsel %vm693_vm12, %v677_v4, %v709_v16  ;;  %v12087_v33 = vld [vmem:[#allocation2 + $0xa7] sm:$0xff]  ;;  %v12097_v4 = vld [vmem:[#allocation2 + $0x9f] sm:$0xff] }
  0x57   : > { %754 = vst [vmem:[#allocation2 + $0xd8] sm:$0xff] %v738_v60  ;;  %9593 = vmatmul.mubr.bf16.gmra.mrb[8].mxu0 %v839_v29  ;;  %v629_v13 = vadd.f32 %v11846_v35, %v612_v8  ;;  %v740_v30 = vadd.f32 %v724_v20, %v11846_v35  ;;  %v613_v31 = vsel %vm580_vm13, %v564_v5, %v597_v17  ;;  %vm694_vm15 = vcmp.ge.f32.partialorder %v678_v22, 0.0  ;;  %v11319_v14 = vld [vmem:[%s14446_s2 + $0x88] sm:$0xff]  }
  0x58   : > { %9609 = vmatpush3.bf16.msra.mxu0 %v11309_v7  ;;  %v611_v1 = vsel %vm578_vm7, %v562_v46, %v595_v61  ;;  %v2811_v7 = vpack.c.bf16 %v739_v36, %v738_v60  ;;  %v679_v32 = vadd.f32 %v663_v15, %v11829_v26  ;;  %v630_v39 = vadd.f32 %v11846_v35, %v613_v31  ;;  %v12079_v61 = vld [vmem:[#allocation2 + $0x97] sm:$0xff]  ;;  %v12089_v36 = vld [vmem:[#allocation2 + $0x2f] sm:$0xff]  ;;  %v12120_v17 = vld [vmem:[#allocation2 + $0x47] sm:$0xff] }
  0x59   : > { %9610 = vmatprep.subr.bf16.mxu0 %v11311_v37  ;;  %9897 = vmatpush3.bf16.msra.mxu1 %v11310_v21  ;;  %v628_v9 = vadd.f32 %v11846_v35, %v611_v1  ;;  %645 = vst [vmem:[#allocation2 + $0x70] sm:$0xff] %v629_v13  ;;  %v598_v21 = vmul.f32 %v11831_v27, %v565_v10  ;;  %756 = vst [vmem:[#allocation2 + $0xe8] sm:$0xff] %v740_v30  ;;  %v281_v54 = vand.u32 15, %v11930_v55  ;;  %v12094_v1 = vld [vmem:[#allocation2 + $0x8f] sm:$0xff] }
  0x5a   : > { %9898 = vmatprep.subr.bf16.mxu1 %v11312_v42  ;;  %9881 = vmatmul.mubr.bf16.gmra.mrb[8].mxu1 %v2811_v7  ;;  %vm695_vm0 = vcmp.ge.f32.partialorder %v679_v32, 0.0  ;;  %v711_v43 = vmul.f32 %v679_v32, %v11831_v27  ;;  %646 = vst [vmem:[#allocation2 + $0x78] sm:$0xff] %v630_v39  ;;  %v778_v46 = vmul.f32 %v11834_v28, %v762_v24  ;;  %v229_v62 = vadd.s32 80, %v11794_v11  ;;  %v11320_v20 = vld [vmem:[%s14446_s2 + $0x88] sm:$0xff]   ;;  %v12131_v24 = vld [vmem:[#allocation2 + $0xb7] sm:$0xff] }
  0x5b   : > { %644 = vst [vmem:[#allocation2 + $0x68] sm:$0xff] %v628_v9  ;;  %v840_v19 = vpack.c.bf16 %v629_v13, %v628_v9  ;;  %v614_v38 = vsel %vm581_vm14, %v565_v10, %v598_v21  ;;  %v780_v60 = vmul.f32 %v12059_v47, %v12061_v48  ;;  %v782_v29 = vmul.f32 %v12066_v49, %v12071_v53  ;;  %v12104_v9 = vld [vmem:[#allocation2 + $0xaf] sm:$0xff] }
  0x5c   : > { %9611 = vmatpush3.bf16.msra.mxu0 %v11311_v37  ;;  %v741_v37 = vadd.f32 %v725_v25, %v11846_v35  ;;  %v631_v41 = vadd.f32 %v11846_v35, %v614_v38  ;;  %v727_v52 = vsel %vm695_vm0, %v679_v32, %v711_v43  ;;  %v794_v58 = vpack.c.bf16 %v763_v40, %v778_v46  ;;  %v11321_v32 = vld [vmem:[%s14446_s2 + $0x90] sm:$0xff]   ;;  %v12146_v38 = vld [vmem:[#allocation2 + $0xbf] sm:$0xff] }
  0x5d   : > { %9899 = vmatpush3.bf16.msra.mxu1 %v11312_v42  ;;  %9612 = vmatprep.subr.bf16.mxu0 %v11313_v23  ;;  %v710_v42 = vmul.f32 %v678_v22, %v11831_v27  ;;  %v743_v57 = vadd.f32 %v727_v52, %v11846_v35  ;;  %vm433_vm1 = vcmp.gt.s32.totalorder %v281_v54, 0  ;;  %v2752_v63 = vmul.f32 %v12059_v47, %v12079_v61  ;;  %v12153_v40 = vld [vmem:[#allocation2 + $0x4f] sm:$0xff]  ;;  %v12176_v52 = vld [vmem:[#allocation2 + $0x57] sm:$0xff]  ;;  %v12277_v25 = vld [vmem:[#allocation2 + $0xa1] sm:$0xff] }
  0x5e   : > { %9900 = vmatprep.subr.bf16.mxu1 %v11314_v0  ;;  %9596 = vmatprep.mubr.bf16.mxu0 %v840_v19  ;;  %757 = vst [vmem:[#allocation2 + $0xf0] sm:$0xff] %v741_v37  ;;  %v2812_v45 = vpack.c.bf16 %v741_v37, %v740_v30  ;;  %647 = vst [vmem:[#allocation2 + $0x80] sm:$0xff] %v631_v41  ;;  %v841_v50 = vpack.c.bf16 %v631_v41, %v630_v39  ;;  %vm435_vm2 = vcmp.gt.s32.totalorder %v295_v59, 0  ;;  %v12138_v30 = vld [vmem:[#allocation2 + $0xc7] sm:$0xff]  ;;  %v11322_v39 = vld [vmem:[%s14446_s2 + $0x90] sm:$0xff]  }
  0x5f   : > { %v726_v51 = vsel %vm694_vm15, %v678_v22, %v710_v42  ;;  %759 = vst [vmem:[#allocation2 + $0x100] sm:$0xff] %v743_v57  ;;  %14544 = vst [vmem:[#allocation12_spill] sm:$0xff] %v12094_v1  ;;  %v2754_v5 = vmul.f32 %v12066_v49, %v12087_v33  ;;  %v309_v6 = vand.u32 15, %v229_v62  ;;  %v796_v8 = vpack.c.bf16 %v12089_v36, %v782_v29  ;;  %v12127_v22 = vld [vmem:[#allocation2 + $0x3f] sm:$0xff] }
  0x60   : > { %9613 = vmatpush3.bf16.msra.mxu0 %v11313_v23  ;;  %9884 = vmatprep.mubr.bf16.mxu1 %v2812_v45  ;;  %v742_v56 = vadd.f32 %v726_v51, %v11846_v35  ;;  %v12083_v23 = vld [vmem:[#allocation2 + $0x1f] sm:$0xff]  ;;  %v12107_v10 = vsel %vm433_vm1, 1.0, %v11660_v2  ;;  %v12117_v15 = vsel %vm435_vm2, 1.0, %v11660_v2  ;;  %v2767_v16 = vpack.c.bf16 %v12097_v4, %v2752_v63  ;;  %14547 = vst [vmem:[#allocation15_spill] sm:$0xff] %v12120_v17 }
  0x61   : > { %9614 = vmatprep.subr.bf16.mxu0 %v11315_v12  ;;  %9901 = vmatpush3.bf16.msra.mxu1 %v11314_v0  ;;  %v231_v0 = vadd.s32 96, %v11794_v11  ;;  %v795_v3 = vpack.c.bf16 %v12083_v23, %v780_v60  ;;  %14545 = vst [vmem:[#allocation13_spill] sm:$0xff] %v12107_v10  ;;  %14546 = vst [vmem:[#allocation14_spill] sm:$0xff] %v12117_v15  ;;  %v2768_v21 = vpack.c.bf16 %v12104_v9, %v2754_v5  ;;  %v11323_v45 = vld [vmem:[%s14446_s2 + $0x98] sm:$0xff]  }
  0x62   : > { %9902 = vmatprep.subr.bf16.mxu1 %v11316_v18  ;;  %9597 = vmatmul.mubr.bf16.gmra.mrb[12].mxu0 %v841_v50  ;;  %758 = vst [vmem:[#allocation2 + $0xf8] sm:$0xff] %v742_v56  ;;  %v2813_v55 = vpack.c.bf16 %v743_v57, %v742_v56  ;;  %vm12133_vm3 = vcmp.gt.s32.totalorder %v309_v6, 0  ;;  %14550 = vst [vmem:[#allocation16_spill] sm:$0xff] %v12138_v30  ;;  %v233_v31 = vadd.s32 112, %v11794_v11  ;;  %v220_v42 = vadd.s32 8, %v11794_v11  ;;  %v12167_v50 = vld [vmem:[#allocation2 + $0x8] sm:$0xff] }
  0x63   : > { %9616 = vmatprep.mubr.bf16.mxu0 %v794_v58  ;;  %v786_v37 = vmul.f32 %v12117_v15, %v12120_v17  ;;  %14551 = vst [vmem:[#allocation17_spill] sm:$0xff] %v12146_v38  ;;  %14552 = vst [vmem:[#allocation18_spill] sm:$0xff] %v12153_v40  ;;  %v2758_v46 = vmul.f32 %v12117_v15, %v12138_v30  ;;  %v12172_v51 = vsel %vm12133_vm3, 1.0, %v12167_v50  ;;  %v222_v56 = vadd.s32 24, %v11794_v11  ;;  %v12185_v59 = vld [vmem:[#allocation2 + $0x67] sm:$0xff]  ;;  %v11324_v5 = vld [vmem:[%s14446_s2 + $0x98] sm:$0xff]  }
  0x64   : > { %9615 = vmatpush3.bf16.msra.mxu0 %v11315_v12  ;;  %9885 = vmatmul.mubr.bf16.gmra.mrb[12].mxu1 %v2813_v55  ;;  %v12109_v12 = vld [vmem:[#allocation2 + $0x37] sm:$0xff]  ;;  %14555 = vst [vmem:[#allocation19_spill] sm:$0xff] %v12172_v51  ;;  %14557 = vst [vmem:[#allocation21_spill] sm:$0xff] %v12176_v52  ;;  %v337_v54 = vand.u32 15, %v233_v31  ;;  %v246_v62 = vand.u32 15, %v220_v42  ;;  %v224_v55 = vadd.s32 40, %v11794_v11  ;;  %v788_v63 = vmul.f32 %v12172_v51, %v12176_v52 }
  0x65   : > { %9632 = vmatprep.subr.bf16.mxu0 %v12042_v34  ;;  %9903 = vmatpush3.bf16.msra.mxu1 %v11316_v18  ;;  %v12101_v7 = vld [vmem:[#allocation2 + $0x87] sm:$0xff]  ;;  %v323_v18 = vand.u32 15, %v231_v0  ;;  %v784_v2 = vmul.f32 %v12107_v10, %v12109_v12  ;;  %v798_v57 = vpack.c.bf16 %v12153_v40, %v786_v37  ;;  %14558 = vst [vmem:[#allocation22_spill] sm:$0xff] %v12185_v59  ;;  %v12192_v0 = vld [vmem:[#allocation2 + $0xd7] sm:$0xff]  ;;  %v12199_v6 = vld [vmem:[#allocation2 + $0x5f] sm:$0xff] }
  0x66   : > { %9920 = vmatprep.subr.bf16.mxu1 %v12053_v44  ;;  %v2750_v13 = vmul.f32 %v11834_v28, %v12101_v7  ;;  %14559 = vst [vmem:[#allocation23_spill] sm:$0xff] %v12192_v0  ;;  %14561 = vst [vmem:[#allocation25_spill] sm:$0xff] %v12199_v6  ;;  %vm12201_vm5 = vcmp.gt.s32.totalorder %v337_v54, 0  ;;  %vm12221_vm6 = vcmp.lt.s32.totalorder %v246_v62, 15  ;;  %v274_v31 = vand.u32 15, %v224_v55  ;;  %v11327_v37 = vld [vmem:[%s14446_s2 + $0xa8] sm:$0xff]  }
  0x67   : > { %vm12155_vm4 = vcmp.gt.s32.totalorder %v323_v18, 0  ;;  %v797_v43 = vpack.c.bf16 %v12127_v22, %v784_v2  ;;  %v12210_v18 = vld [vmem:[#allocation2 + $0x6f] sm:$0xff]  ;;  %v12234_v41 = vsel %vm12201_vm5, 1.0, %v12167_v50  ;;  %v12236_v42 = vld [vmem:[#allocation2 + $0x77] sm:$0xff]  ;;  %v230_v54 = vadd.s32 88, %v11794_v11 }
  0x68   : > { %v2766_v19 = vpack.c.bf16 %v12094_v1, %v2750_v13  ;;  %v12183_v58 = vsel %vm12155_vm4, 1.0, %v12167_v50  ;;  %v260_v13 = vand.u32 15, %v222_v56  ;;  %14565 = vst [vmem:[#allocation27_spill] sm:$0xff] %v12210_v18  ;;  %14569 = vst [vmem:[#allocation29_spill] sm:$0xff] %v12234_v41  ;;  %vm12257_vm8 = vcmp.lt.s32.totalorder %v274_v31, 15  ;;  %v3125_v40 = vld [vmem:[#allocation2 + $0xb1] sm:$0xff] }
  0x69   : > { %14570 = vst [vmem:[#allocation30_spill] sm:$0xff] %v12236_v42  ;;  %v12418_v1 = vld [vmem:[#allocation2 + $0xc9] sm:$0xff] }
  0x6a   : > { %9617 = vmatmul.mubr.bf16.vlgmr.msra.gmra.mrb[0].mxu0 %v795_v3  ;;  %9904 = vmatprep.mubr.bf16.mxu1 %v2766_v19  ;;  %v12194_v3 = vld [vmem:[#allocation2 + $0xe7] sm:$0xff]  ;;  %v790_v19 = vmul.f32 %v12183_v58, %v12185_v59  ;;  %vm12241_vm7 = vcmp.lt.s32.totalorder %v260_v13, 15  ;;  %v792_v13 = vmul.f32 %v12234_v41, %v12236_v42  ;;  %v664_v59 = vld [vmem:[%s11806_s14 + $0xf0] sm:$0xff] }
  0x6b   : > { %9633 = vmatpush3.bf16.msra.mxu0 %v12042_v34  ;;  %9620 = vmatprep.mubr.bf16.mxu0 %v796_v8  ;;  %v2756_v34 = vmul.f32 %v12107_v10, %v12131_v24  ;;  %14560 = vst [vmem:[#allocation24_spill] sm:$0xff] %v12194_v3  ;;  %v2762_v2 = vmul.f32 %v12183_v58, %v12194_v3  ;;  %v12261_v8 = vld [vmem:[#allocation2 + $0x7f] sm:$0xff]  ;;  %v12282_v3 = vld [vmem:[#allocation2 + $0x89] sm:$0xff] }
  0x6c   : > { %9634 = vmatprep.subr.bf16.mxu0 %v11319_v14  ;;  %9905 = vmatmul.mubr.bf16.vlgmr.msra.gmra.mrb[0].mxu1 %v2767_v16  ;;  %v12208_v16 = vld [vmem:[#allocation2 + $0xdf] sm:$0xff]  ;;  %v800_v56 = vpack.c.bf16 %v12210_v18, %v790_v19  ;;  %14577 = vst [vmem:[#allocation33_spill] sm:$0xff] %v12261_v8  ;;  %v11329_v19 = vld [vmem:[%s14446_s2 + $0xb0] sm:$0xff]  }
  0x6d   : > { %9921 = vmatpush3.bf16.msra.mxu1 %v12053_v44  ;;  %9908 = vmatprep.mubr.bf16.mxu1 %v2768_v21  ;;  %v12174_v44 = vld [vmem:[#allocation2 + $0xcf] sm:$0xff]  ;;  %v2769_v60 = vpack.c.bf16 %v12146_v38, %v2756_v34  ;;  %14564 = vst [vmem:[#allocation26_spill] sm:$0xff] %v12208_v16  ;;  %v11326_v21 = vld [vmem:[%s14446_s2 + $0xa0] sm:$0xff]  }
  0x6e   : > { %9922 = vmatprep.subr.bf16.mxu1 %v11320_v20  ;;  %14556 = vst [vmem:[#allocation20_spill] sm:$0xff] %v12174_v44  ;;  %v2770_v29 = vpack.c.bf16 %v12174_v44, %v2758_v46  ;;  %v12229_v34 = vld [vmem:[#allocation2 + $0xef] sm:$0xff]  ;;  %v226_v46 = vadd.s32 56, %v11794_v11  ;;  %v680_v44 = vadd.f32 %v664_v59, %v11829_v26  ;;  %v12479_v10 = vld [vmem:[#allocation2 + $0x81] sm:$0xff] }
  0x6f   : > { %9635 = vmatpush3.bf16.msra.mxu0 %v11319_v14  ;;  %v11325_v14 = vld [vmem:[%s14446_s2 + $0xa0] sm:$0xff]   ;;  %14568 = vst [vmem:[#allocation28_spill] sm:$0xff] %v12229_v34  ;;  %v2772_v55 = vpack.c.bf16 %v12229_v34, %v2762_v2  ;;  %v12275_v2 = vsel %vm12241_vm7, 1.0, %v12167_v50  ;;  %v1148_v34 = vld [vmem:[#allocation2 + $0x9] sm:$0xff] }
  0x70   : > { %9636 = vmatprep.subr.bf16.mxu0 %v11321_v32  ;;  %14578 = vst [vmem:[#allocation34_spill] sm:$0xff] %v12275_v2  ;;  %v288_v31 = vand.u32 15, %v226_v46  ;;  %v12290_v46 = vld [vmem:[#allocation2 + $0x19] sm:$0xff]  ;;  %vm696_vm10 = vcmp.ge.f32.partialorder %v680_v44, 0.0  ;;  %v11337_v38 = vld [vmem:[%s14446_s2 + $0xd0] sm:$0xff]  }
  0x71   : > { %9923 = vmatpush3.bf16.msra.mxu1 %v11320_v20  ;;  %v2760_v20 = vmul.f32 %v12172_v51, %v12192_v0  ;;  %v12322_v0 = vld [vmem:[#allocation2 + $0x29] sm:$0xff] }
  0x72   : > { %9621 = vmatmul.mubr.bf16.gmra.mrb[4].mxu0 %v797_v43  ;;  %9924 = vmatprep.subr.bf16.mxu1 %v11322_v39  ;;  %v1149_v43 = vld [vmem:[#allocation2 + $0x11] sm:$0xff]  ;;  %vm12324_vm9 = vcmp.lt.s32.totalorder %v288_v31, 15 }
  0x73   : > { %9637 = vmatpush3.bf16.msra.mxu0 %v11321_v32  ;;  %9624 = vmatprep.mubr.bf16.mxu0 %v798_v57  ;;  %v799_v32 = vpack.c.bf16 %v12199_v6, %v788_v63  ;;  %v12249_v57 = vsel %vm12221_vm6, 1.0, %v12167_v50  ;;  %v2771_v62 = vpack.c.bf16 %v12208_v16, %v2760_v20  ;;  %v12302_v16 = vld [vmem:[%s14446_s2 + $0xb0] sm:$0xff]   ;;  %v12320_v6 = vmul.f32 %v12275_v2, %v12277_v25 }
  0x74   : > { %9638 = vmatprep.subr.bf16.mxu0 %v11323_v45  ;;  %9909 = vmatmul.mubr.bf16.gmra.mrb[4].mxu1 %v2769_v60  ;;  %14574 = vst [vmem:[#allocation32_spill] sm:$0xff] %v12249_v57  ;;  %v228_v60 = vadd.s32 72, %v11794_v11  ;;  %v1165_v18 = vmul.f32 %v12249_v57, %v1149_v43  ;;  %v232_v43 = vadd.s32 104, %v11794_v11 }
  0x75   : > { %9925 = vmatpush3.bf16.msra.mxu1 %v11322_v39  ;;  %9912 = vmatprep.mubr.bf16.mxu1 %v2770_v29  ;;  %v12239_v39 = vld [vmem:[#allocation2 + $0xf7] sm:$0xff] }
  0x76   : > { %9926 = vmatprep.subr.bf16.mxu1 %v11324_v5  ;;  %14571 = vst [vmem:[#allocation31_spill] sm:$0xff] %v12239_v39  ;;  %v3121_v29 = vld [vmem:[#allocation2 + $0x91] sm:$0xff]  ;;  %v12270_v20 = vmul.f32 %v12234_v41, %v12239_v39  ;;  %v302_v51 = vand.u32 15, %v228_v60  ;;  %v801_v60 = vpack.c.bf16 %v12261_v8, %v792_v13  ;;  %v712_v13 = vmul.f32 %v680_v44, %v11831_v27 }
  0x77   : > { %9639 = vmatpush3.bf16.msra.mxu0 %v11323_v45  ;;  %v11328_v45 = vld [vmem:[%s14446_s2 + $0xa8] sm:$0xff]   ;;  %v12284_v39 = vld [vmem:[#allocation2 + $0x31] sm:$0xff]  ;;  %v12288_v42 = vmul.f32 %v12249_v57, %v3121_v29  ;;  %v12307_v29 = vld [vmem:[#allocation2 + $0x99] sm:$0xff]  ;;  %v330_v8 = vand.u32 15, %v232_v43 }
  0x78   : > { %9640 = vmatprep.subr.bf16.mxu0 %v11325_v14  ;;  %vm12335_vm11 = vcmp.lt.s32.totalorder %v302_v51, 15  ;;  %v728_v30 = vsel %vm696_vm10, %v680_v44, %v712_v13  ;;  %v12356_v51 = vld [vmem:[%s14446_s2 + $0xc0] sm:$0xff]  }
  0x79   : > { %9927 = vmatpush3.bf16.msra.mxu1 %v11324_v5  ;;  %v1151_v5 = vld [vmem:[#allocation2 + $0x21] sm:$0xff]  ;;  %v12373_v43 = vadd.f32 %v728_v30, %v11846_v35  ;;  %v12381_v59 = vsel %vm12335_vm11, 1.0, %v12167_v50  ;;  %v12390_v30 = vld [vmem:[#allocation2 + $0xa9] sm:$0xff]  ;;  %vm12398_vm13 = vcmp.lt.s32.totalorder %v330_v8, 15  ;;  %v12461_v13 = vld [vmem:[#allocation2 + $0xd9] sm:$0xff] }
  0x7a   : > { %9625 = vmatmul.mubr.bf16.gmra.mrb[8].mxu0 %v799_v32  ;;  %9928 = vmatprep.subr.bf16.mxu1 %v11326_v21  ;;  %v12279_v32 = vld [vmem:[#allocation2 + $0xff] sm:$0xff]  ;;  %v12466_v52 = vsel %vm12398_vm13, 1.0, %v12167_v50 }
  0x7b   : > { %9641 = vmatpush3.bf16.msra.mxu0 %v11325_v14  ;;  %14579 = vst [vmem:[#allocation35_spill] sm:$0xff] %v12279_v32  ;;  %9628 = vmatprep.mubr.bf16.mxu0 %v800_v56  ;;  %v12295_v14 = vsel %vm12257_vm8, 1.0, %v12167_v50  ;;  %v12305_v56 = vmul.f32 %v12275_v2, %v1151_v5  ;;  %v2773_v63 = vpack.c.bf16 %v12279_v32, %v12270_v20  ;;  %v1155_v44 = vld [vmem:[#allocation2 + $0x41] sm:$0xff]  ;;  %760 = vst [vmem:[#allocation2 + $0x108] sm:$0xff] %v12373_v43 }
  0x7c   : > { %9642 = vmatprep.subr.bf16.mxu0 %v11327_v37  ;;  %14580 = vst [vmem:[#allocation36_spill] sm:$0xff] %v12295_v14  ;;  %9913 = vmatmul.mubr.bf16.gmra.mrb[8].mxu1 %v2771_v62  ;;  %v12316_v62 = vld [vmem:[%s14446_s2 + $0xb8] sm:$0xff]   ;;  %v1180_v20 = vpack.c.bf16 %v1165_v18, %v1148_v34  ;;  %v3152_v32 = vpack.c.bf16 %v12288_v42, %v12282_v3  ;;  %v11334_v8 = vld [vmem:[%s14446_s2 + $0xc0] sm:$0xff]  }
  0x7d   : > { %9929 = vmatpush3.bf16.msra.mxu1 %v11326_v21  ;;  %9916 = vmatprep.mubr.bf16.mxu1 %v2772_v55  ;;  %v12330_v21 = vmul.f32 %v12295_v14, %v12284_v39  ;;  %v316_v55 = vand.u32 15, %v230_v54  ;;  %v12348_v18 = vmul.f32 %v12234_v41, %v12101_v7  ;;  %v12351_v3 = vmul.f32 %v12249_v57, %v1151_v5  ;;  %v12368_v5 = vld [vmem:[#allocation2 + $0xc1] sm:$0xff]  ;;  %v12396_v54 = vld [vmem:[#allocation2 + $0xd1] sm:$0xff] }
  0x7e   : > { %9930 = vmatprep.subr.bf16.mxu1 %v11328_v45  ;;  %v12361_v42 = vmul.f32 %v12295_v14, %v3125_v40  ;;  %v12366_v7 = vsel %vm12324_vm9, 1.0, %v12167_v50  ;;  %v12411_v34 = vmul.f32 %v12275_v2, %v12284_v39  ;;  %v12420_v41 = vld [vmem:[#allocation2 + $0x61] sm:$0xff]  ;;  %v12432_v39 = vmul.f32 %v12295_v14, %v12368_v5 }
  0x7f   : > { %9643 = vmatpush3.bf16.msra.mxu0 %v11327_v37  ;;  %v12342_v37 = vld [vmem:[%s14446_s2 + $0xb8] sm:$0xff]   ;;  %14585 = vst [vmem:[#allocation37_spill] sm:$0xff] %v12348_v18  ;;  %14586 = vst [vmem:[#allocation38_spill] sm:$0xff] %v12351_v3  ;;  %vm12383_vm12 = vcmp.lt.s32.totalorder %v316_v55, 15  ;;  %v12416_v18 = vld [vmem:[#allocation2 + $0x49] sm:$0xff]  ;;  %v12487_v15 = vmul.f32 %v12381_v59, %v12420_v41  ;;  %v12506_v17 = vmul.f32 %v12466_v52, %v12479_v10 }
  0x80   : > { %9644 = vmatprep.subr.bf16.mxu0 %v11329_v19  ;;  %14592 = vst [vmem:[#allocation40_spill] sm:$0xff] %v12411_v34  ;;  %v12422_v55 = vld [vmem:[#allocation2 + $0xe1] sm:$0xff]  ;;  %14595 = vst [vmem:[#allocation43_spill] sm:$0xff] %v12432_v39  ;;  %v12494_v39 = vld [vmem:[#allocation2 + $0xe9] sm:$0xff] }
  0x81   : > { %9931 = vmatpush3.bf16.msra.mxu1 %v11328_v45  ;;  %v12370_v45 = vld [vmem:[#allocation2 + $0x51] sm:$0xff]  ;;  %v11335_v3 = vld [vmem:[%s14446_s2 + $0xc8] sm:$0xff]   ;;  %v12491_v34 = vmul.f32 %v12381_v59, %v12422_v55  ;;  %14600 = vst [vmem:[#allocation48_spill] sm:$0xff] %v12506_v17 }
  0x82   : > { %9629 = vmatmul.mubr.bf16.gmra.mrb[12].mxu0 %v801_v60  ;;  %9932 = vmatprep.subr.bf16.mxu1 %v12302_v16  ;;  %v12394_v60 = vld [vmem:[#allocation2 + $0xb9] sm:$0xff] }
  0x83   : > { %9645 = vmatpush3.bf16.msra.mxu0 %v11329_v19  ;;  %9648 = vmatprep.mubr.bf16.mxu0 %v1180_v20  ;;  %v12392_v19 = vld [vmem:[#allocation2 + $0x39] sm:$0xff]  ;;  %v12407_v20 = vmul.f32 %v12249_v57, %v12277_v25  ;;  %v12425_v25 = vmul.f32 %v12275_v2, %v3125_v40  ;;  %v12428_v57 = vmul.f32 %v12295_v14, %v1155_v44  ;;  %v12445_v40 = vsel %vm12383_vm12, 1.0, %v12167_v50  ;;  %v12447_v2 = vld [vmem:[#allocation2 + $0x71] sm:$0xff] }
  0x84   : > { %9646 = vmatprep.subr.bf16.mxu0 %v12316_v62  ;;  %9917 = vmatmul.mubr.bf16.gmra.mrb[12].mxu1 %v2773_v63  ;;  %v12436_v63 = vmul.f32 %v12366_v7, %v12370_v45  ;;  %v12468_v14 = vld [vmem:[#allocation2 + $0xf1] sm:$0xff]  ;;  %14598 = vst [vmem:[#allocation46_spill] sm:$0xff] %v12491_v34  ;;  %v1173_v34 = vmul.f32 %v12381_v59, %v12370_v45 }
  0x85   : > { %14591 = vst [vmem:[#allocation39_spill] sm:$0xff] %v12407_v20  ;;  %14593 = vst [vmem:[#allocation41_spill] sm:$0xff] %v12425_v25  ;;  %9933 = vmatpush3.bf16.msra.mxu1 %v12302_v16  ;;  %9936 = vmatprep.mubr.bf16.mxu1 %v3152_v32  ;;  %v12455_v16 = vmul.f32 %v12366_v7, %v12396_v54  ;;  %v12459_v32 = vld [vmem:[#allocation2 + $0x59] sm:$0xff]  ;;  %v12477_v20 = vld [vmem:[#allocation2 + $0x69] sm:$0xff]  ;;  %v12498_v25 = vmul.f32 %v12445_v40, %v12447_v2 }
  0x86   : > { %14594 = vst [vmem:[#allocation42_spill] sm:$0xff] %v12428_v57  ;;  %14596 = vst [vmem:[#allocation44_spill] sm:$0xff] %v12436_v63  ;;  %9934 = vmatprep.subr.bf16.mxu1 %v12342_v37  ;;  %v12502_v31 = vmul.f32 %v12445_v40, %v12468_v14  ;;  %v12514_v63 = vld [vmem:[#allocation2 + $0x79] sm:$0xff]  ;;  %v14603_v57 = vpack.c.bf16 %v12320_v6, %v12307_v29  ;;  %v3145_v45 = vmul.f32 %v12381_v59, %v12396_v54 }
  0x87   : > { %14597 = vst [vmem:[#allocation45_spill] sm:$0xff] %v12455_v16  ;;  %9647 = vmatpush3.bf16.msra.mxu0 %v12316_v62  ;;  %v1171_v62 = vmul.f32 %v12366_v7, %v1155_v44  ;;  %v14601_v16 = vpack.c.bf16 %v12305_v56, %v12290_v46  ;;  %v3154_v44 = vpack.c.bf16 %v12361_v42, %v12390_v30  ;;  %v11336_v56 = vld [vmem:[%s14446_s2 + $0xc8] sm:$0xff]   ;;  %v234_v42 = vadd.s32 120, %v11794_v11  ;;  %v665_v17 = vld [vmem:[%s11806_s14 + $0xf8] sm:$0xff]  ;;  %v11338_v11 = vld [vmem:[%s14446_s2 + $0xd0] sm:$0xff]  }
  0x88   : > { %9664 = vmatprep.subr.bf16.mxu0 %v12356_v51  ;;  %14599 = vst [vmem:[#allocation47_spill] sm:$0xff] %v12502_v31  ;;  %v12551_v31 = vld [vmem:[#allocation2 + $0xf9] sm:$0xff]  ;;  %v681_v6 = vadd.f32 %v665_v17, %v11829_v26  ;;  %v3156_v26 = vpack.c.bf16 %v3145_v45, %v12418_v1  ;;  %v1175_v17 = vmul.f32 %v12445_v40, %v12420_v41 }
  0x89   : > { %9935 = vmatpush3.bf16.msra.mxu1 %v12342_v37  ;;  %v12524_v37 = vld [vmem:[#allocation2 + $0x101] sm:$0xff] }
  0x8a   : > { %9649 = vmatmul.mubr.bf16.vlgmr.msra.gmra.mrb[0].mxu0 %v14601_v16  ;;  %9952 = vmatprep.subr.bf16.mxu1 %v11334_v8  ;;  %v12543_v16 = vmul.f32 %v12466_v52, %v12524_v37  ;;  %vm697_vm14 = vcmp.ge.f32.partialorder %v681_v6, 0.0  ;;  %v1185_v41 = vpack.c.bf16 %v1175_v17, %v12459_v32 }
  0x8b   : > { %9665 = vmatpush3.bf16.msra.mxu0 %v12356_v51  ;;  %v14602_v51 = vpack.c.bf16 %v12330_v21, %v12322_v0  ;;  %v1183_v21 = vpack.c.bf16 %v1171_v62, %v12392_v19  ;;  %v344_v62 = vand.u32 15, %v234_v42 }
  0x8c   : > { %9666 = vmatprep.subr.bf16.mxu0 %v11335_v3  ;;  %9937 = vmatmul.mubr.bf16.vlgmr.msra.gmra.mrb[0].mxu1 %v14603_v57  ;;  %v3793_v57 = vpack.c.bf16 %v12543_v16, %v12551_v31  ;;  %v2003_v16 = vld [vmem:[#allocation2 + $0x3f] sm:$0xff] }
  0x8d   : > { %9652 = vmatprep.mubr.bf16.mxu0 %v14602_v51  ;;  %v3143_v51 = vmul.f32 %v12366_v7, %v12368_v5  ;;  %9953 = vmatpush3.bf16.msra.mxu1 %v11334_v8  ;;  %v11339_v5 = vld [vmem:[%s14446_s2 + $0xd8] sm:$0xff]   ;;  %v1184_v8 = vpack.c.bf16 %v1173_v34, %v12416_v18  ;;  %vm490_vm15 = vcmp.lt.s32.totalorder %v344_v62, 15 }
  0x8e   : > { %9940 = vmatprep.mubr.bf16.mxu1 %v3154_v44  ;;  %9954 = vmatprep.subr.bf16.mxu1 %v11336_v56  ;;  %v713_v44 = vmul.f32 %v681_v6, %v11831_v27  ;;  %v11340_v34 = vld [vmem:[%s14446_s2 + $0xd8] sm:$0xff]   ;;  %v11341_v27 = vld [vmem:[%s14446_s2 + $0xe0] sm:$0xff]  }
  0x8f   : > { %9667 = vmatpush3.bf16.msra.mxu0 %v11335_v3  ;;  %v3155_v54 = vpack.c.bf16 %v3143_v51, %v12394_v60  ;;  %v11343_v51 = vld [vmem:[%s14446_s2 + $0xe8] sm:$0xff]  }
  0x90   : > { %9668 = vmatprep.subr.bf16.mxu0 %v11337_v38  ;;  %v729_v3 = vsel %vm697_vm14, %v681_v6, %v713_v44  ;;  %v3353_v44 = vmul.f32 %v11834_v28, %v12079_v61 }
  0x91   : > { %9955 = vmatpush3.bf16.msra.mxu1 %v11336_v56  ;;  %v12575_v42 = vadd.f32 %v729_v3, %v11846_v35  ;;  %v1177_v56 = vmul.f32 %v12466_v52, %v12447_v2  ;;  %v11342_v2 = vld [vmem:[%s14446_s2 + $0xe0] sm:$0xff]  }
  0x92   : > { %9653 = vmatmul.mubr.bf16.gmra.mrb[4].mxu0 %v1183_v21  ;;  %9956 = vmatprep.subr.bf16.mxu1 %v11338_v11  ;;  %v3149_v21 = vmul.f32 %v12466_v52, %v12468_v14 }
  0x93   : > { %9669 = vmatpush3.bf16.msra.mxu0 %v11337_v38  ;;  %9656 = vmatprep.mubr.bf16.mxu0 %v1184_v8  ;;  %v3147_v38 = vmul.f32 %v12445_v40, %v12422_v55  ;;  %761 = vst [vmem:[#allocation2 + $0x110] sm:$0xff] %v12575_v42  ;;  %v3577_v35 = vpack.c.bf16 %v12575_v42, %v12373_v43  ;;  %v12594_v55 = vsel %vm490_vm15, 1.0, %v12167_v50  ;;  %v11344_v50 = vld [vmem:[%s14446_s2 + $0xe8] sm:$0xff]   ;;  %v14634_v42 = vld [vmem:[#allocation42_spill] sm:$0xff] }
  0x94   : > { %9670 = vmatprep.subr.bf16.mxu0 %v11339_v5  ;;  %9941 = vmatmul.mubr.bf16.gmra.mrb[4].mxu1 %v3155_v54  ;;  %v3158_v14 = vpack.c.bf16 %v3149_v21, %v12494_v39  ;;  %v1179_v6 = vmul.f32 %v12594_v55, %v12479_v10  ;;  %v1381_v8 = vmul.f32 %v11834_v28, %v12061_v48  ;;  %v11346_v54 = vld [vmem:[%s14446_s2 + $0xf0] sm:$0xff]   ;;  %v11347_v48 = vld [vmem:[%s14446_s2 + $0xf8] sm:$0xff]  }
  0x95   : > { %9957 = vmatpush3.bf16.msra.mxu1 %v11338_v11  ;;  %9944 = vmatprep.mubr.bf16.mxu1 %v3156_v26  ;;  %v1186_v11 = vpack.c.bf16 %v1177_v56, %v12477_v20  ;;  %v3157_v45 = vpack.c.bf16 %v3147_v38, %v12461_v13  ;;  %v3151_v62 = vmul.f32 %v12594_v55, %v12524_v37  ;;  %v12620_v26 = vld [vmem:[#allocation2 + $0x107] sm:$0xff] }
  0x96   : > { %9958 = vmatprep.subr.bf16.mxu1 %v11340_v34  ;;  %v1187_v10 = vpack.c.bf16 %v1179_v6, %v12514_v63  ;;  %v1397_v37 = vpack.c.bf16 %v12083_v23, %v1381_v8  ;;  %v12628_v17 = vmul.f32 %v12183_v58, %v12620_v26  ;;  %v11348_v23 = vld [vmem:[%s14446_s2 + $0xf8] sm:$0xff]   ;;  %v11349_v38 = vld [vmem:[%s14446_s2 + $0x100] sm:$0xff]   ;;  %v3357_v21 = vmul.f32 %v12066_v49, %v12131_v24  ;;  %v14605_v24 = vld [vmem:[#allocation15_spill] sm:$0xff] }
  0x97   : > { %9671 = vmatpush3.bf16.msra.mxu0 %v11339_v5  ;;  %v11345_v5 = vld [vmem:[%s14446_s2 + $0xf0] sm:$0xff]   ;;  %v3159_v61 = vpack.c.bf16 %v3151_v62, %v12551_v31  ;;  %v11352_v6 = vld [vmem:[%s14446_s2 + $0x108] sm:$0xff]   ;;  %v11381_v56 = vld [vmem:[%s14446_s2 + $0x180] sm:$0xff]  }
  0x98   : > { %9672 = vmatprep.subr.bf16.mxu0 %v11341_v27  ;;  %v14609_v8 = vld [vmem:[#allocation16_spill] sm:$0xff]  ;;  %v11396_v31 = vld [vmem:[%s14446_s2 + $0x1b8] sm:$0xff]  }
  0x99   : > { %9959 = vmatpush3.bf16.msra.mxu1 %v11340_v34  ;;  %v3369_v34 = vpack.c.bf16 %v12097_v4, %v3353_v44  ;;  %v1385_v4 = vmul.f32 %v12066_v49, %v12109_v12  ;;  %v11351_v12 = vld [vmem:[%s14446_s2 + $0x108] sm:$0xff]  }
  0x9a   : > { %9657 = vmatmul.mubr.bf16.gmra.mrb[8].mxu0 %v1185_v41  ;;  %9960 = vmatprep.subr.bf16.mxu1 %v11342_v2  ;;  %v12631_v3 = vld [vmem:[#allocation2 + $0x10f] sm:$0xff] }
  0x9b   : > { %9673 = vmatpush3.bf16.msra.mxu0 %v11341_v27  ;;  %9660 = vmatprep.mubr.bf16.mxu0 %v1186_v11  ;;  %v1383_v27 = vmul.f32 %v12059_v47, %v12071_v53  ;;  %v3355_v53 = vmul.f32 %v12059_v47, %v12087_v33  ;;  %v1399_v33 = vpack.c.bf16 %v12127_v22, %v1385_v4  ;;  %v11353_v22 = vld [vmem:[%s14446_s2 + $0x110] sm:$0xff]   ;;  %v14614_v4 = vld [vmem:[#allocation26_spill] sm:$0xff] }
  0x9c   : > { %9674 = vmatprep.subr.bf16.mxu0 %v11343_v51  ;;  %9945 = vmatmul.mubr.bf16.gmra.mrb[8].mxu1 %v3157_v45  ;;  %v14606_v45 = vld [vmem:[#allocation13_spill] sm:$0xff] }
  0x9d   : > { %9961 = vmatpush3.bf16.msra.mxu1 %v11342_v2  ;;  %9948 = vmatprep.mubr.bf16.mxu1 %v3158_v14  ;;  %v1398_v41 = vpack.c.bf16 %v12089_v36, %v1383_v27  ;;  %v11350_v2 = vld [vmem:[%s14446_s2 + $0x100] sm:$0xff]   ;;  %v14604_v36 = vld [vmem:[#allocation17_spill] sm:$0xff]  ;;  %v1387_v14 = vmul.f32 %v14606_v45, %v14605_v24  ;;  %v3359_v62 = vmul.f32 %v14606_v45, %v14609_v8  ;;  %v11359_v8 = vld [vmem:[%s14446_s2 + $0x128] sm:$0xff]  }
  0x9e   : > { %9962 = vmatprep.subr.bf16.mxu1 %v11344_v50  ;;  %v3371_v11 = vpack.c.bf16 %v14604_v36, %v3357_v21  ;;  %v14616_v21 = vld [vmem:[#allocation19_spill] sm:$0xff] }
  0x9f   : > { %9675 = vmatpush3.bf16.msra.mxu0 %v11343_v51  ;;  %v3370_v51 = vpack.c.bf16 %v12104_v9, %v3355_v53  ;;  %v14607_v9 = vld [vmem:[#allocation21_spill] sm:$0xff] }
  0xa0   : > { %9676 = vmatprep.subr.bf16.mxu0 %v11345_v5 }
  0xa1   : > { %9963 = vmatpush3.bf16.msra.mxu1 %v11344_v50  ;;  %v14608_v50 = vld [vmem:[#allocation14_spill] sm:$0xff] }
  0xa2   : > { %9661 = vmatmul.mubr.bf16.gmra.mrb[12].mxu0 %v1187_v10  ;;  %9964 = vmatprep.subr.bf16.mxu1 %v11346_v54  ;;  %v14610_v10 = vld [vmem:[#allocation18_spill] sm:$0xff] }
  0xa3   : > { %9677 = vmatpush3.bf16.msra.mxu0 %v11345_v5  ;;  %9680 = vmatprep.mubr.bf16.mxu0 %v1397_v37  ;;  %v1389_v5 = vmul.f32 %v14608_v50, %v14607_v9  ;;  %v1400_v44 = vpack.c.bf16 %v14610_v10, %v1387_v14  ;;  %v11354_v37 = vld [vmem:[%s14446_s2 + $0x110] sm:$0xff]   ;;  %v14619_v14 = vld [vmem:[#allocation27_spill] sm:$0xff] }
  0xa4   : > { %9678 = vmatprep.subr.bf16.mxu0 %v11347_v48  ;;  %9949 = vmatmul.mubr.bf16.gmra.mrb[12].mxu1 %v3159_v61  ;;  %v11355_v61 = vld [vmem:[%s14446_s2 + $0x118] sm:$0xff]  }
  0xa5   : > { %9965 = vmatpush3.bf16.msra.mxu1 %v11346_v54  ;;  %9968 = vmatprep.mubr.bf16.mxu1 %v3369_v34  ;;  %v14611_v54 = vld [vmem:[#allocation23_spill] sm:$0xff]  ;;  %v14612_v34 = vld [vmem:[#allocation25_spill] sm:$0xff] }
  0xa6   : > { %9966 = vmatprep.subr.bf16.mxu1 %v11348_v23  ;;  %v1401_v27 = vpack.c.bf16 %v14612_v34, %v1389_v5  ;;  %v11358_v5 = vld [vmem:[%s14446_s2 + $0x120] sm:$0xff]   ;;  %v11361_v34 = vld [vmem:[%s14446_s2 + $0x130] sm:$0xff]  }
  0xa7   : > { %9679 = vmatpush3.bf16.msra.mxu0 %v11347_v48  ;;  %v3361_v48 = vmul.f32 %v14608_v50, %v14611_v54 }
  0xa8   : > { %9696 = vmatprep.subr.bf16.mxu0 %v11349_v38 }
  0xa9   : > { %9967 = vmatpush3.bf16.msra.mxu1 %v11348_v23  ;;  %v14613_v23 = vld [vmem:[#allocation20_spill] sm:$0xff]  ;;  %v3373_v53 = vpack.c.bf16 %v14614_v4, %v3361_v48  ;;  %v14623_v48 = vld [vmem:[#allocation35_spill] sm:$0xff]  ;;  %v1583_v4 = vld [vmem:[#allocation2 + $0x20] sm:$0xff] }
  0xaa   : > { %9681 = vmatmul.mubr.bf16.vlgmr.msra.gmra.mrb[0].mxu0 %v1398_v41  ;;  %9984 = vmatprep.subr.bf16.mxu1 %v11350_v2  ;;  %v14615_v41 = vld [vmem:[#allocation22_spill] sm:$0xff] }
  0xab   : > { %9697 = vmatpush3.bf16.msra.mxu0 %v11349_v38  ;;  %9684 = vmatprep.mubr.bf16.mxu0 %v1399_v33  ;;  %v3372_v38 = vpack.c.bf16 %v14613_v23, %v3359_v62  ;;  %v11357_v33 = vld [vmem:[%s14446_s2 + $0x120] sm:$0xff]   ;;  %v14621_v62 = vld [vmem:[#allocation33_spill] sm:$0xff] }
  0xac   : > { %9698 = vmatprep.subr.bf16.mxu0 %v11351_v12  ;;  %9969 = vmatmul.mubr.bf16.vlgmr.msra.gmra.mrb[0].mxu1 %v3370_v51  ;;  %v14617_v51 = vld [vmem:[#allocation30_spill] sm:$0xff] }
  0xad   : > { %9985 = vmatpush3.bf16.msra.mxu1 %v11350_v2  ;;  %9972 = vmatprep.mubr.bf16.mxu1 %v3371_v11  ;;  %v1391_v2 = vmul.f32 %v14616_v21, %v14615_v41  ;;  %v1393_v36 = vmul.f32 %v12183_v58, %v14617_v51  ;;  %v14618_v11 = vld [vmem:[#allocation24_spill] sm:$0xff]  ;;  %v3554_v41 = vld [vmem:[#allocation2 + $0x98] sm:$0xff] }
  0xae   : > { %9986 = vmatprep.subr.bf16.mxu1 %v11352_v6  ;;  %v3363_v24 = vmul.f32 %v14616_v21, %v14618_v11  ;;  %v14625_v51 = vld [vmem:[#allocation12_spill] sm:$0xff] }
  0xaf   : > { %9699 = vmatpush3.bf16.msra.mxu0 %v11351_v12  ;;  %v11356_v12 = vld [vmem:[%s14446_s2 + $0x118] sm:$0xff]   ;;  %v1403_v10 = vpack.c.bf16 %v14621_v62, %v1393_v36 }
  0xb0   : > { %9700 = vmatprep.subr.bf16.mxu0 %v11353_v22  ;;  %v14626_v36 = vld [vmem:[#allocation37_spill] sm:$0xff] }
  0xb1   : > { %9987 = vmatpush3.bf16.msra.mxu1 %v11352_v6  ;;  %v1402_v6 = vpack.c.bf16 %v14619_v14, %v1391_v2  ;;  %v3555_v2 = vld [vmem:[#allocation2 + $0xa0] sm:$0xff]  ;;  %v14627_v11 = vpack.c.bf16 %v14625_v51, %v14626_v36  ;;  %v1586_v62 = vld [vmem:[#allocation2 + $0x38] sm:$0xff] }
  0xb2   : > { %9685 = vmatmul.mubr.bf16.gmra.mrb[4].mxu0 %v1400_v44  ;;  %9988 = vmatprep.subr.bf16.mxu1 %v11354_v37  ;;  %v14622_v44 = vld [vmem:[#allocation28_spill] sm:$0xff]  ;;  %v3570_v14 = vpack.c.bf16 %v3555_v2, %v3554_v41  ;;  %v1590_v51 = vld [vmem:[#allocation2 + $0x58] sm:$0xff]  ;;  %v1591_v36 = vld [vmem:[#allocation2 + $0x60] sm:$0xff] }
  0xb3   : > { %9701 = vmatpush3.bf16.msra.mxu0 %v11353_v22  ;;  %9688 = vmatprep.mubr.bf16.mxu0 %v1401_v27  ;;  %v14620_v22 = vld [vmem:[#allocation31_spill] sm:$0xff]  ;;  %v3374_v54 = vpack.c.bf16 %v14622_v44, %v3363_v24  ;;  %v14624_v27 = vld [vmem:[#allocation29_spill] sm:$0xff]  ;;  %v1589_v41 = vld [vmem:[#allocation2 + $0x50] sm:$0xff] }
  0xb4   : > { %9702 = vmatprep.subr.bf16.mxu0 %v11355_v61  ;;  %9973 = vmatmul.mubr.bf16.gmra.mrb[4].mxu1 %v3372_v38  ;;  %v3365_v9 = vmul.f32 %v12183_v58, %v14620_v22  ;;  %v3367_v23 = vmul.f32 %v14624_v27, %v12620_v26  ;;  %v1582_v38 = vld [vmem:[#allocation2 + $0x18] sm:$0xff]  ;;  %v1585_v22 = vld [vmem:[#allocation2 + $0x30] sm:$0xff] }
  0xb5   : > { %9989 = vmatpush3.bf16.msra.mxu1 %v11354_v37  ;;  %9976 = vmatprep.mubr.bf16.mxu1 %v3373_v53  ;;  %v11362_v53 = vld [vmem:[%s14446_s2 + $0x130] sm:$0xff]   ;;  %v11364_v24 = vld [vmem:[%s14446_s2 + $0x138] sm:$0xff]  }
  0xb6   : > { %9990 = vmatprep.subr.bf16.mxu1 %v11356_v12  ;;  %v3375_v37 = vpack.c.bf16 %v14623_v48, %v3365_v9  ;;  %v3376_v26 = vpack.c.bf16 %v12631_v3, %v3367_v23  ;;  %v11365_v9 = vld [vmem:[%s14446_s2 + $0x140] sm:$0xff]   ;;  %v3558_v48 = vld [vmem:[#allocation2 + $0xb8] sm:$0xff]  ;;  %v11369_v2 = vld [vmem:[%s14446_s2 + $0x150] sm:$0xff]  }
  0xb7   : > { %9703 = vmatpush3.bf16.msra.mxu0 %v11355_v61  ;;  %v11360_v61 = vld [vmem:[%s14446_s2 + $0x128] sm:$0xff]  }
  0xb8   : > { %9704 = vmatprep.subr.bf16.mxu0 %v11357_v33 }
  0xb9   : > { %9991 = vmatpush3.bf16.msra.mxu1 %v11356_v12  ;;  %v11363_v12 = vld [vmem:[%s14446_s2 + $0x138] sm:$0xff]  }
  0xba   : > { %9689 = vmatmul.mubr.bf16.gmra.mrb[8].mxu0 %v1402_v6  ;;  %9992 = vmatprep.subr.bf16.mxu1 %v11358_v5  ;;  %v1584_v6 = vld [vmem:[#allocation2 + $0x28] sm:$0xff] }
  0xbb   : > { %9705 = vmatpush3.bf16.msra.mxu0 %v11357_v33  ;;  %9692 = vmatprep.mubr.bf16.mxu0 %v1403_v10  ;;  %v1598_v33 = vpack.c.bf16 %v1583_v4, %v1582_v38  ;;  %v1587_v10 = vld [vmem:[#allocation2 + $0x40] sm:$0xff]  ;;  %v12732_v44 = vpack.c.bf16 %v1585_v22, %v1584_v6  ;;  %v11368_v38 = vld [vmem:[%s14446_s2 + $0x148] sm:$0xff]   ;;  %v11371_v6 = vld [vmem:[%s14446_s2 + $0x158] sm:$0xff]   ;;  %v12764_v22 = vpack.c.bf16 %v1591_v36, %v1590_v51 }
  0xbc   : > { %9706 = vmatprep.subr.bf16.mxu0 %v11359_v8  ;;  %9977 = vmatmul.mubr.bf16.gmra.mrb[8].mxu1 %v3374_v54  ;;  %v11366_v54 = vld [vmem:[%s14446_s2 + $0x140] sm:$0xff]  }
  0xbd   : > { %9993 = vmatpush3.bf16.msra.mxu1 %v11358_v5  ;;  %9980 = vmatprep.mubr.bf16.mxu1 %v3375_v37  ;;  %v3556_v5 = vld [vmem:[#allocation2 + $0xa8] sm:$0xff]  ;;  %v3559_v37 = vld [vmem:[#allocation2 + $0xc0] sm:$0xff] }
  0xbe   : > { %9994 = vmatprep.subr.bf16.mxu1 %v11360_v61  ;;  %v12748_v4 = vpack.c.bf16 %v3559_v37, %v3558_v48  ;;  %v3564_v48 = vld [vmem:[#allocation2 + $0xe8] sm:$0xff]  ;;  %v3565_v37 = vld [vmem:[#allocation2 + $0xf0] sm:$0xff] }
  0xbf   : > { %9707 = vmatpush3.bf16.msra.mxu0 %v11359_v8  ;;  %v3557_v8 = vld [vmem:[#allocation2 + $0xb0] sm:$0xff]  ;;  %v12790_v36 = vpack.c.bf16 %v3565_v37, %v3564_v48 }
  0xc0   : > { %9708 = vmatprep.subr.bf16.mxu0 %v11361_v34  ;;  %v12742_v23 = vpack.c.bf16 %v3557_v8, %v3556_v5  ;;  %v11372_v5 = vld [vmem:[%s14446_s2 + $0x158] sm:$0xff]  }
  0xc1   : > { %9995 = vmatpush3.bf16.msra.mxu1 %v11360_v61  ;;  %v11367_v61 = vld [vmem:[%s14446_s2 + $0x148] sm:$0xff]   ;;  %v12804_v48 = vld [vmem:[#allocation2 + $0x111] sm:$0xff] }
  0xc2   : > { %9693 = vmatmul.mubr.bf16.gmra.mrb[12].mxu0 %v14627_v11  ;;  %9996 = vmatprep.subr.bf16.mxu1 %v11362_v53 }
  0xc3   : > { %9709 = vmatpush3.bf16.msra.mxu0 %v11361_v34  ;;  %9712 = vmatprep.mubr.bf16.mxu0 %v1598_v33  ;;  %v12740_v34 = vpack.c.bf16 %v1587_v10, %v1586_v62  ;;  %v3561_v33 = vld [vmem:[#allocation2 + $0xd0] sm:$0xff]  ;;  %v1592_v62 = vld [vmem:[#allocation2 + $0x68] sm:$0xff] }
  0xc4   : > { %9710 = vmatprep.subr.bf16.mxu0 %v11363_v12  ;;  %9981 = vmatmul.mubr.bf16.gmra.mrb[12].mxu1 %v3376_v26  ;;  %v11370_v26 = vld [vmem:[%s14446_s2 + $0x150] sm:$0xff]  }
  0xc5   : > { %9997 = vmatpush3.bf16.msra.mxu1 %v11362_v53  ;;  %10000 = vmatprep.mubr.bf16.mxu1 %v3570_v14  ;;  %v1588_v53 = vld [vmem:[#allocation2 + $0x48] sm:$0xff]  ;;  %v3563_v14 = vld [vmem:[#allocation2 + $0xe0] sm:$0xff]  ;;  %v1593_v10 = vld [vmem:[#allocation2 + $0x70] sm:$0xff] }
  0xc6   : > { %9998 = vmatprep.subr.bf16.mxu1 %v11364_v24  ;;  %v12759_v11 = vpack.c.bf16 %v1589_v41, %v1588_v53  ;;  %v1595_v53 = vld [vmem:[#allocation2 + $0x80] sm:$0xff]  ;;  %v12783_v41 = vpack.c.bf16 %v1593_v10, %v1592_v62  ;;  %v11377_v62 = vld [vmem:[%s14446_s2 + $0x170] sm:$0xff]  }
  0xc7   : > { %9711 = vmatpush3.bf16.msra.mxu0 %v11363_v12  ;;  %v3560_v12 = vld [vmem:[#allocation2 + $0xc8] sm:$0xff]  ;;  %v12801_v10 = vld [vmem:[#allocation2 + $0x91] sm:$0xff] }
  0xc8   : > { %9728 = vmatprep.subr.bf16.mxu0 %v11365_v9  ;;  %v12811_v37 = vmul.f32 %v12466_v52, %v12801_v10 }
  0xc9   : > { %9999 = vmatpush3.bf16.msra.mxu1 %v11364_v24  ;;  %v3562_v24 = vld [vmem:[#allocation2 + $0xd8] sm:$0xff] }
  0xca   : > { %9713 = vmatmul.mubr.bf16.vlgmr.msra.gmra.mrb[0].mxu0 %v12732_v44  ;;  %10016 = vmatprep.subr.bf16.mxu1 %v11366_v54  ;;  %v12772_v8 = vpack.c.bf16 %v3563_v14, %v3562_v24  ;;  %v1596_v24 = vld [vmem:[#allocation2 + $0x88] sm:$0xff]  ;;  %v1597_v14 = vld [vmem:[#allocation2 + $0x90] sm:$0xff] }
  0xcb   : > { %9729 = vmatpush3.bf16.msra.mxu0 %v11365_v9  ;;  %9716 = vmatprep.mubr.bf16.mxu0 %v12740_v34  ;;  %v12766_v9 = vpack.c.bf16 %v3561_v33, %v3560_v12  ;;  %v3567_v12 = vld [vmem:[#allocation2 + $0x100] sm:$0xff]  ;;  %v11375_v33 = vld [vmem:[%s14446_s2 + $0x168] sm:$0xff]  }
  0xcc   : > { %9730 = vmatprep.subr.bf16.mxu0 %v11367_v61  ;;  %10001 = vmatmul.mubr.bf16.vlgmr.msra.gmra.mrb[0].mxu1 %v12742_v23 }
  0xcd   : > { %10017 = vmatpush3.bf16.msra.mxu1 %v11366_v54  ;;  %10004 = vmatprep.mubr.bf16.mxu1 %v12748_v4  ;;  %v11373_v54 = vld [vmem:[%s14446_s2 + $0x160] sm:$0xff]  }
  0xce   : > { %10018 = vmatprep.subr.bf16.mxu1 %v11368_v38 }
  0xcf   : > { %9731 = vmatpush3.bf16.msra.mxu0 %v11367_v61  ;;  %v1594_v61 = vld [vmem:[#allocation2 + $0x78] sm:$0xff] }
  0xd0   : > { %9732 = vmatprep.subr.bf16.mxu0 %v11369_v2  ;;  %v12788_v51 = vpack.c.bf16 %v1595_v53, %v1594_v61  ;;  %v12815_v61 = vmul.f32 %v12466_v52, %v12804_v48  ;;  %v12820_v53 = vld [vmem:[#allocation2 + $0x109] sm:$0xff] }
  0xd1   : > { %10019 = vmatpush3.bf16.msra.mxu1 %v11368_v38  ;;  %v11374_v38 = vld [vmem:[%s14446_s2 + $0x160] sm:$0xff]  }
  0xd2   : > { %9717 = vmatmul.mubr.bf16.gmra.mrb[4].mxu0 %v12759_v11  ;;  %10020 = vmatprep.subr.bf16.mxu1 %v11370_v26 }
  0xd3   : > { %9733 = vmatpush3.bf16.msra.mxu0 %v11369_v2  ;;  %9720 = vmatprep.mubr.bf16.mxu0 %v12764_v22  ;;  %v3566_v2 = vld [vmem:[#allocation2 + $0xf8] sm:$0xff] }
  0xd4   : > { %9734 = vmatprep.subr.bf16.mxu0 %v11371_v6  ;;  %10005 = vmatmul.mubr.bf16.gmra.mrb[4].mxu1 %v12766_v9 }
  0xd5   : > { %10021 = vmatpush3.bf16.msra.mxu1 %v11370_v26  ;;  %10008 = vmatprep.mubr.bf16.mxu1 %v12772_v8  ;;  %v11376_v26 = vld [vmem:[%s14446_s2 + $0x168] sm:$0xff]  }
  0xd6   : > { %10022 = vmatprep.subr.bf16.mxu1 %v11372_v5 }
  0xd7   : > { %9735 = vmatpush3.bf16.msra.mxu0 %v11371_v6  ;;  %v12796_v6 = vpack.c.bf16 %v3567_v12, %v3566_v2  ;;  %v11378_v2 = vld [vmem:[%s14446_s2 + $0x170] sm:$0xff]  }
  0xd8   : > { %9736 = vmatprep.subr.bf16.mxu0 %v11373_v54 }
  0xd9   : > { %10023 = vmatpush3.bf16.msra.mxu1 %v11372_v5  ;;  %v12807_v5 = vld [vmem:[#allocation2 + $0x89] sm:$0xff] }
  0xda   : > { %9721 = vmatmul.mubr.bf16.gmra.mrb[8].mxu0 %v12783_v41  ;;  %10024 = vmatprep.subr.bf16.mxu1 %v11374_v38  ;;  %v2456_v12 = vpack.c.bf16 %v12811_v37, %v12807_v5  ;;  %v11433_v37 = vld [vmem:[%s14447_s3 + $0x60] sm:$0xff]  }
  0xdb   : > { %9737 = vmatpush3.bf16.msra.mxu0 %v11373_v54  ;;  %9724 = vmatprep.mubr.bf16.mxu0 %v12788_v51  ;;  %v12818_v54 = vpack.c.bf16 %v1597_v14, %v1596_v24  ;;  %v14628_v24 = vld [vmem:[#allocation38_spill] sm:$0xff] }
  0xdc   : > { %9738 = vmatprep.subr.bf16.mxu0 %v11375_v33  ;;  %10009 = vmatmul.mubr.bf16.gmra.mrb[8].mxu1 %v12790_v36  ;;  %v14629_v14 = vpack.c.bf16 %v14628_v24, %v12290_v46  ;;  %v11382_v46 = vld [vmem:[%s14446_s2 + $0x180] sm:$0xff]   ;;  %v11383_v24 = vld [vmem:[%s14446_s2 + $0x188] sm:$0xff]  }
  0xdd   : > { %10025 = vmatpush3.bf16.msra.mxu1 %v11374_v38  ;;  %10012 = vmatprep.mubr.bf16.mxu1 %v12796_v6  ;;  %v11379_v38 = vld [vmem:[%s14446_s2 + $0x178] sm:$0xff]  }
  0xde   : > { %10026 = vmatprep.subr.bf16.mxu1 %v11376_v26 }
  0xdf   : > { %9739 = vmatpush3.bf16.msra.mxu0 %v11375_v33  ;;  %v11380_v33 = vld [vmem:[%s14446_s2 + $0x178] sm:$0xff]  }
  0xe0   : > { %9740 = vmatprep.subr.bf16.mxu0 %v11377_v62 }
  0xe1   : > { %10027 = vmatpush3.bf16.msra.mxu1 %v11376_v26  ;;  %v14630_v26 = vld [vmem:[#allocation39_spill] sm:$0xff] }
  0xe2   : > { %9725 = vmatmul.mubr.bf16.gmra.mrb[12].mxu0 %v12818_v54  ;;  %10028 = vmatprep.subr.bf16.mxu1 %v11378_v2 }
  0xe3   : > { %9741 = vmatpush3.bf16.msra.mxu0 %v11377_v62  ;;  %9744 = vmatprep.mubr.bf16.mxu0 %v14629_v14  ;;  %v14631_v62 = vpack.c.bf16 %v14630_v26, %v12307_v29  ;;  %v14632_v14 = vld [vmem:[#allocation40_spill] sm:$0xff]  ;;  %v11384_v29 = vld [vmem:[%s14446_s2 + $0x188] sm:$0xff]   ;;  %v11387_v26 = vld [vmem:[%s14446_s2 + $0x198] sm:$0xff]  }
  0xe4   : > { %9742 = vmatprep.subr.bf16.mxu0 %v11379_v38  ;;  %10013 = vmatmul.mubr.bf16.gmra.mrb[12].mxu1 %v3577_v35  ;;  %v14633_v43 = vpack.c.bf16 %v14632_v14, %v12322_v0  ;;  %v14635_v35 = vpack.c.bf16 %v14634_v42, %v12392_v19  ;;  %v14638_v0 = vld [vmem:[#allocation43_spill] sm:$0xff]  ;;  %v11386_v19 = vld [vmem:[%s14446_s2 + $0x190] sm:$0xff]   ;;  %v14643_v14 = vld [vmem:[#allocation45_spill] sm:$0xff] }
  0xe5   : > { %10029 = vmatpush3.bf16.msra.mxu1 %v11378_v2  ;;  %10032 = vmatprep.mubr.bf16.mxu1 %v14631_v62  ;;  %v11385_v2 = vld [vmem:[%s14446_s2 + $0x190] sm:$0xff]  }
  0xe6   : > { %10030 = vmatprep.subr.bf16.mxu1 %v11380_v33  ;;  %v14640_v62 = vld [vmem:[#allocation44_spill] sm:$0xff] }
  0xe7   : > { %9743 = vmatpush3.bf16.msra.mxu0 %v11379_v38  ;;  %v14636_v38 = vld [vmem:[#allocation41_spill] sm:$0xff] }
  0xe8   : > { %9760 = vmatprep.subr.bf16.mxu0 %v11381_v56 }
  0xe9   : > { %10031 = vmatpush3.bf16.msra.mxu1 %v11380_v33  ;;  %v14637_v33 = vpack.c.bf16 %v14636_v38, %v12390_v30  ;;  %v14641_v30 = vpack.c.bf16 %v14640_v62, %v12416_v18  ;;  %v11390_v18 = vld [vmem:[%s14446_s2 + $0x1a0] sm:$0xff]   ;;  %v11393_v38 = vld [vmem:[%s14446_s2 + $0x1b0] sm:$0xff]  }
  0xea   : > { %9745 = vmatmul.mubr.bf16.vlgmr.msra.gmra.mrb[0].mxu0 %v14633_v43  ;;  %10048 = vmatprep.subr.bf16.mxu1 %v11382_v46  ;;  %v14644_v43 = vpack.c.bf16 %v14643_v14, %v12418_v1  ;;  %v11392_v1 = vld [vmem:[%s14446_s2 + $0x1a8] sm:$0xff]  }
  0xeb   : > { %9761 = vmatpush3.bf16.msra.mxu0 %v11381_v56  ;;  %9748 = vmatprep.mubr.bf16.mxu0 %v14635_v35  ;;  %v14639_v56 = vpack.c.bf16 %v14638_v0, %v12394_v60  ;;  %v11388_v60 = vld [vmem:[%s14446_s2 + $0x198] sm:$0xff]   ;;  %v3972_v35 = vld [vmem:[#allocation2 + $0xa7] sm:$0xff]  ;;  %v14648_v0 = vld [vmem:[#allocation48_spill] sm:$0xff] }
  0xec   : > { %9762 = vmatprep.subr.bf16.mxu0 %v11383_v24  ;;  %10033 = vmatmul.mubr.bf16.vlgmr.msra.gmra.mrb[0].mxu1 %v14637_v33  ;;  %v2001_v33 = vld [vmem:[#allocation2 + $0x2f] sm:$0xff] }
  0xed   : > { %10049 = vmatpush3.bf16.msra.mxu1 %v11382_v46  ;;  %10036 = vmatprep.mubr.bf16.mxu1 %v14639_v56  ;;  %v14642_v46 = vpack.c.bf16 %v12487_v15, %v12459_v32  ;;  %v11391_v15 = vld [vmem:[%s14446_s2 + $0x1a8] sm:$0xff]   ;;  %v14649_v56 = vpack.c.bf16 %v14648_v0, %v12514_v63 }
  0xee   : > { %10050 = vmatprep.subr.bf16.mxu1 %v11384_v29  ;;  %v2000_v32 = vld [vmem:[#allocation2 + $0x27] sm:$0xff]  ;;  %v3973_v62 = vld [vmem:[#allocation2 + $0xaf] sm:$0xff] }
  0xef   : > { %9763 = vmatpush3.bf16.msra.mxu0 %v11383_v24  ;;  %v11389_v24 = vld [vmem:[%s14446_s2 + $0x1a0] sm:$0xff]  }
  0xf0   : > { %9764 = vmatprep.subr.bf16.mxu0 %v11385_v2 }
  0xf1   : > { %10051 = vmatpush3.bf16.msra.mxu1 %v11384_v29  ;;  %v14645_v29 = vld [vmem:[#allocation46_spill] sm:$0xff] }
  0xf2   : > { %9749 = vmatmul.mubr.bf16.gmra.mrb[4].mxu0 %v14641_v30  ;;  %10052 = vmatprep.subr.bf16.mxu1 %v11386_v19  ;;  %v14646_v42 = vpack.c.bf16 %v14645_v29, %v12461_v13  ;;  %v1814_v13 = vmul.f32 %v12594_v55, %v12801_v10  ;;  %v11394_v10 = vld [vmem:[%s14446_s2 + $0x1b0] sm:$0xff]   ;;  %v11397_v29 = vld [vmem:[%s14446_s2 + $0x1c0] sm:$0xff]  }
  0xf3   : > { %9765 = vmatpush3.bf16.msra.mxu0 %v11385_v2  ;;  %9752 = vmatprep.mubr.bf16.mxu0 %v14642_v46  ;;  %v14647_v2 = vpack.c.bf16 %v12498_v25, %v12477_v20  ;;  %v3786_v25 = vmul.f32 %v12594_v55, %v12804_v48  ;;  %v2002_v30 = vld [vmem:[#allocation2 + $0x37] sm:$0xff]  ;;  %v2004_v48 = vld [vmem:[#allocation2 + $0x47] sm:$0xff] }
  0xf4   : > { %9766 = vmatprep.subr.bf16.mxu0 %v11387_v26  ;;  %10037 = vmatmul.mubr.bf16.gmra.mrb[4].mxu1 %v14644_v43  ;;  %v1822_v63 = vpack.c.bf16 %v1814_v13, %v12807_v5  ;;  %v2006_v13 = vld [vmem:[#allocation2 + $0x57] sm:$0xff] }
  0xf5   : > { %10053 = vmatpush3.bf16.msra.mxu1 %v11386_v19  ;;  %10040 = vmatprep.mubr.bf16.mxu1 %v14646_v42  ;;  %v2016_v19 = vmul.f32 %v11834_v28, %v2000_v32  ;;  %v3794_v14 = vpack.c.bf16 %v3786_v25, %v12820_v53  ;;  %v2005_v42 = vld [vmem:[#allocation2 + $0x4f] sm:$0xff]  ;;  %v2020_v32 = vmul.f32 %v12066_v49, %v2004_v48  ;;  %v3979_v48 = vld [vmem:[#allocation2 + $0xdf] sm:$0xff] }
  0xf6   : > { %10054 = vmatprep.subr.bf16.mxu1 %v11388_v60  ;;  %v11400_v25 = vld [vmem:[%s14446_s2 + $0x1c8] sm:$0xff]   ;;  %v11432_v5 = vld [vmem:[%s14447_s3 + $0x58] sm:$0xff]  }
  0xf7   : > { %9767 = vmatpush3.bf16.msra.mxu0 %v11387_v26  ;;  %v14650_v26 = vld [vmem:[#allocation47_spill] sm:$0xff]  ;;  %v2032_v46 = vpack.c.bf16 %v2001_v33, %v2016_v19  ;;  %v2034_v19 = vpack.c.bf16 %v2005_v42, %v2020_v32 }
  0xf8   : > { %9768 = vmatprep.subr.bf16.mxu0 %v11389_v24  ;;  %v14651_v20 = vpack.c.bf16 %v14650_v26, %v12494_v39  ;;  %v11395_v39 = vld [vmem:[%s14446_s2 + $0x1b8] sm:$0xff]  }
  0xf9   : > { %10055 = vmatpush3.bf16.msra.mxu1 %v11388_v60  ;;  %v3988_v60 = vmul.f32 %v11834_v28, %v3972_v35  ;;  %v3978_v26 = vld [vmem:[#allocation2 + $0xd7] sm:$0xff] }
  0xfa   : > { %9753 = vmatmul.mubr.bf16.gmra.mrb[8].mxu0 %v14647_v2  ;;  %10056 = vmatprep.subr.bf16.mxu1 %v11390_v18  ;;  %v3977_v2 = vld [vmem:[#allocation2 + $0xcf] sm:$0xff] }
  0xfb   : > { %9769 = vmatpush3.bf16.msra.mxu0 %v11389_v24  ;;  %9756 = vmatprep.mubr.bf16.mxu0 %v14649_v56  ;;  %v3974_v24 = vld [vmem:[#allocation2 + $0xb7] sm:$0xff]  ;;  %v4004_v43 = vpack.c.bf16 %v3973_v62, %v3988_v60  ;;  %v2008_v56 = vld [vmem:[#allocation2 + $0x67] sm:$0xff]  ;;  %v2009_v60 = vld [vmem:[#allocation2 + $0x6f] sm:$0xff] }
  0xfc   : > { %9770 = vmatprep.subr.bf16.mxu0 %v11391_v15  ;;  %10041 = vmatmul.mubr.bf16.gmra.mrb[8].mxu1 %v14651_v20  ;;  %v3990_v35 = vmul.f32 %v12059_v47, %v3974_v24  ;;  %v3980_v62 = vld [vmem:[#allocation2 + $0xe7] sm:$0xff]  ;;  %v3994_v24 = vmul.f32 %v14606_v45, %v3978_v26 }
  0xfd   : > { %10057 = vmatpush3.bf16.msra.mxu1 %v11390_v18  ;;  %10044 = vmatprep.mubr.bf16.mxu1 %v3793_v57  ;;  %v3976_v57 = vld [vmem:[#allocation2 + $0xc7] sm:$0xff]  ;;  %v2018_v18 = vmul.f32 %v12059_v47, %v2002_v30 }
  0xfe   : > { %10058 = vmatprep.subr.bf16.mxu1 %v11392_v1  ;;  %v3992_v0 = vmul.f32 %v12066_v49, %v3976_v57  ;;  %v4007_v32 = vpack.c.bf16 %v3979_v48, %v3994_v24  ;;  %v11406_v26 = vld [vmem:[%s14446_s2 + $0x1e0] sm:$0xff]  }
  0xff   : > { %9771 = vmatpush3.bf16.msra.mxu0 %v11391_v15  ;;  %v3975_v15 = vld [vmem:[#allocation2 + $0xbf] sm:$0xff]  ;;  %v2033_v33 = vpack.c.bf16 %v2003_v16, %v2018_v18  ;;  %v2010_v16 = vld [vmem:[#allocation2 + $0x77] sm:$0xff]  ;;  %v3996_v18 = vmul.f32 %v14608_v50, %v3980_v62 }
 0x100   : > { %9772 = vmatprep.subr.bf16.mxu0 %v11393_v38  ;;  %v4005_v20 = vpack.c.bf16 %v3975_v15, %v3990_v35  ;;  %v4006_v30 = vpack.c.bf16 %v3977_v2, %v3992_v0  ;;  %v3982_v15 = vld [vmem:[#allocation2 + $0xf7] sm:$0xff]  ;;  %v3983_v0 = vld [vmem:[#allocation2 + $0xff] sm:$0xff] }
 0x101   : > { %10059 = vmatpush3.bf16.msra.mxu1 %v11392_v1  ;;  %v11398_v1 = vld [vmem:[%s14446_s2 + $0x1c0] sm:$0xff]   ;;  %v11404_v35 = vld [vmem:[%s14446_s2 + $0x1d8] sm:$0xff]  }
 0x102   : > { %9757 = vmatmul.mubr.bf16.gmra.mrb[12].mxu0 %v1822_v63  ;;  %10060 = vmatprep.subr.bf16.mxu1 %v11394_v10  ;;  %v2022_v63 = vmul.f32 %v14606_v45, %v2006_v13  ;;  %v2026_v13 = vmul.f32 %v14616_v21, %v2010_v16  ;;  %v3987_v24 = vld [vmem:[#allocation2 + $0x11f] sm:$0xff]  ;;  %v14652_v16 = vpack.c.bf16 %v12631_v3, %v12628_v17 }
 0x103   : > { %9773 = vmatpush3.bf16.msra.mxu0 %v11393_v38  ;;  %9776 = vmatprep.mubr.bf16.mxu0 %v2032_v46  ;;  %v11399_v38 = vld [vmem:[%s14446_s2 + $0x1c8] sm:$0xff]   ;;  %v2024_v46 = vmul.f32 %v14608_v50, %v2008_v56  ;;  %v11413_v17 = vld [vmem:[%s14446_s2 + $0x200] sm:$0xff]  }
 0x104   : > { %9774 = vmatprep.subr.bf16.mxu0 %v11395_v39  ;;  %10045 = vmatmul.mubr.bf16.gmra.mrb[12].mxu1 %v3794_v14  ;;  %v11402_v14 = vld [vmem:[%s14446_s2 + $0x1d0] sm:$0xff]   ;;  %v11414_v3 = vld [vmem:[%s14446_s2 + $0x200] sm:$0xff]  }
 0x105   : > { %10061 = vmatpush3.bf16.msra.mxu1 %v11394_v10  ;;  %10064 = vmatprep.mubr.bf16.mxu1 %v4004_v43  ;;  %v2007_v10 = vld [vmem:[#allocation2 + $0x5f] sm:$0xff]  ;;  %v2036_v42 = vpack.c.bf16 %v2009_v60, %v2024_v46  ;;  %v11409_v46 = vld [vmem:[%s14446_s2 + $0x1f0] sm:$0xff]  }
 0x106   : > { %10062 = vmatprep.subr.bf16.mxu1 %v11396_v31  ;;  %v2035_v57 = vpack.c.bf16 %v2007_v10, %v2022_v63  ;;  %v11403_v43 = vld [vmem:[%s14446_s2 + $0x1d8] sm:$0xff]   ;;  %v11407_v10 = vld [vmem:[%s14446_s2 + $0x1e8] sm:$0xff]  }
 0x107   : > { %9775 = vmatpush3.bf16.msra.mxu0 %v11395_v39  ;;  %v11401_v39 = vld [vmem:[%s14446_s2 + $0x1d0] sm:$0xff]   ;;  %v2015_v60 = vld [vmem:[#allocation2 + $0x9f] sm:$0xff] }
 0x108   : > { %9792 = vmatprep.subr.bf16.mxu0 %v11397_v29 }
 0x109   : > { %10063 = vmatpush3.bf16.msra.mxu1 %v11396_v31  ;;  %v3981_v31 = vld [vmem:[#allocation2 + $0xef] sm:$0xff] }
 0x10a   : > { %9777 = vmatmul.mubr.bf16.vlgmr.msra.gmra.mrb[0].mxu0 %v2033_v33  ;;  %10080 = vmatprep.subr.bf16.mxu1 %v11398_v1  ;;  %v4008_v2 = vpack.c.bf16 %v3981_v31, %v3996_v18  ;;  %v11405_v33 = vld [vmem:[%s14446_s2 + $0x1e0] sm:$0xff]   ;;  %v11410_v31 = vld [vmem:[%s14446_s2 + $0x1f0] sm:$0xff]  }
 0x10b   : > { %9793 = vmatpush3.bf16.msra.mxu0 %v11397_v29  ;;  %9780 = vmatprep.mubr.bf16.mxu0 %v2034_v19  ;;  %v2012_v29 = vld [vmem:[#allocation2 + $0x87] sm:$0xff]  ;;  %v3998_v19 = vmul.f32 %v14616_v21, %v3982_v15 }
 0x10c   : > { %9794 = vmatprep.subr.bf16.mxu0 %v11399_v38  ;;  %10065 = vmatmul.mubr.bf16.vlgmr.msra.gmra.mrb[0].mxu1 %v4005_v20  ;;  %v2028_v56 = vmul.f32 %v12183_v58, %v2012_v29  ;;  %v2014_v20 = vld [vmem:[#allocation2 + $0x97] sm:$0xff]  ;;  %v11416_v15 = vld [vmem:[%s14446_s2 + $0x208] sm:$0xff]  }
 0x10d   : > { %10081 = vmatpush3.bf16.msra.mxu1 %v11398_v1  ;;  %10068 = vmatprep.mubr.bf16.mxu1 %v4006_v30  ;;  %v2011_v1 = vld [vmem:[#allocation2 + $0x7f] sm:$0xff]  ;;  %v3986_v30 = vld [vmem:[#allocation2 + $0x117] sm:$0xff]  ;;  %v4009_v63 = vpack.c.bf16 %v3983_v0, %v3998_v19  ;;  %v2030_v48 = vmul.f32 %v14624_v27, %v2014_v20 }
 0x10e   : > { %10082 = vmatprep.subr.bf16.mxu1 %v11400_v25  ;;  %v11412_v29 = vld [vmem:[%s14446_s2 + $0x1f8] sm:$0xff]   ;;  %v14653_v0 = vld [vmem:[#allocation32_spill] sm:$0xff] }
 0x10f   : > { %9795 = vmatpush3.bf16.msra.mxu0 %v11399_v38  ;;  %v2013_v38 = vld [vmem:[#allocation2 + $0x8f] sm:$0xff] }
 0x110   : > { %9796 = vmatprep.subr.bf16.mxu0 %v11401_v39  ;;  %v2038_v62 = vpack.c.bf16 %v2013_v38, %v2028_v56  ;;  %v2418_v38 = vld [vmem:[#allocation2 + $0x29] sm:$0xff] }
 0x111   : > { %10083 = vmatpush3.bf16.msra.mxu1 %v11400_v25  ;;  %v2037_v25 = vpack.c.bf16 %v2011_v1, %v2026_v13  ;;  %v2419_v1 = vld [vmem:[#allocation2 + $0x31] sm:$0xff] }
 0x112   : > { %9781 = vmatmul.mubr.bf16.gmra.mrb[4].mxu0 %v2035_v57  ;;  %10084 = vmatprep.subr.bf16.mxu1 %v11402_v14  ;;  %v2039_v57 = vpack.c.bf16 %v2015_v60, %v2030_v48  ;;  %v4391_v13 = vld [vmem:[#allocation2 + $0xb1] sm:$0xff]  ;;  %v2435_v56 = vmul.f32 %v14653_v0, %v2419_v1  ;;  %v2420_v60 = vld [vmem:[#allocation2 + $0x39] sm:$0xff]  ;;  %v2426_v1 = vld [vmem:[#allocation2 + $0x69] sm:$0xff] }
 0x113   : > { %9797 = vmatpush3.bf16.msra.mxu0 %v11401_v39  ;;  %9784 = vmatprep.mubr.bf16.mxu0 %v2036_v42  ;;  %v11408_v39 = vld [vmem:[%s14446_s2 + $0x1e8] sm:$0xff]   ;;  %v11426_v19 = vld [vmem:[%s14446_s2 + $0x230] sm:$0xff]  }
 0x114   : > { %9798 = vmatprep.subr.bf16.mxu0 %v11403_v43  ;;  %10069 = vmatmul.mubr.bf16.gmra.mrb[4].mxu1 %v4007_v32  ;;  %v11415_v42 = vld [vmem:[%s14446_s2 + $0x208] sm:$0xff]   ;;  %v4395_v48 = vld [vmem:[#allocation2 + $0xd1] sm:$0xff] }
 0x115   : > { %10085 = vmatpush3.bf16.msra.mxu1 %v11402_v14  ;;  %10072 = vmatprep.mubr.bf16.mxu1 %v4008_v2  ;;  %v4002_v14 = vmul.f32 %v14624_v27, %v3986_v30  ;;  %v4201_v32 = vld [vmem:[#allocation2 + $0x108] sm:$0xff]  ;;  %v2232_v2 = vld [vmem:[#allocation2 + $0xa0] sm:$0xff] }
 0x116   : > { %10086 = vmatprep.subr.bf16.mxu1 %v11404_v35  ;;  %v11574_v30 = vld [vmem:[#allocation2 + $0x8] sm:$0xff] }
 0x117   : > { %9799 = vmatpush3.bf16.msra.mxu0 %v11403_v43  ;;  %v11411_v43 = vld [vmem:[%s14446_s2 + $0x1f8] sm:$0xff]   ;;  %v4011_v18 = vpack.c.bf16 %v3987_v24, %v4002_v14  ;;  %v14654_v24 = vld [vmem:[#allocation34_spill] sm:$0xff] }
 0x118   : > { %9800 = vmatprep.subr.bf16.mxu0 %v11405_v33 }
 0x119   : > { %10087 = vmatpush3.bf16.msra.mxu1 %v11404_v35  ;;  %v4202_v35 = vld [vmem:[#allocation2 + $0x110] sm:$0xff] }
 0x11a   : > { %9785 = vmatmul.mubr.bf16.gmra.mrb[8].mxu0 %v2037_v25  ;;  %10088 = vmatprep.subr.bf16.mxu1 %v11406_v26  ;;  %v11427_v25 = vld [vmem:[%s14446_s2 + $0x238] sm:$0xff]  }
 0x11b   : > { %9801 = vmatpush3.bf16.msra.mxu0 %v11405_v33  ;;  %9788 = vmatprep.mubr.bf16.mxu0 %v2038_v62  ;;  %v4211_v33 = vpack.c.bf16 %v4202_v35, %v4201_v32  ;;  %v4393_v62 = vld [vmem:[#allocation2 + $0xc1] sm:$0xff]  ;;  %v4399_v32 = vld [vmem:[#allocation2 + $0xf1] sm:$0xff] }
 0x11c   : > { %9802 = vmatprep.subr.bf16.mxu0 %v11407_v10  ;;  %10073 = vmatmul.mubr.bf16.gmra.mrb[8].mxu1 %v4009_v63  ;;  %v13061_v63 = vpack.c.bf16 %v11574_v30, %v11574_v30  ;;  %v2433_v30 = vld [vmem:[#allocation2 + $0xa1] sm:$0xff] }
 0x11d   : > { %10089 = vmatpush3.bf16.msra.mxu1 %v11406_v26  ;;  %10076 = vmatprep.mubr.bf16.mxu1 %v14652_v16  ;;  %v2421_v26 = vld [vmem:[#allocation2 + $0x41] sm:$0xff] }
 0x11e   : > { %10090 = vmatprep.subr.bf16.mxu1 %v11408_v39  ;;  %v2437_v14 = vmul.f32 %v14654_v24, %v2421_v26  ;;  %v11429_v16 = vld [vmem:[%s14447_s3 + $0x40] sm:$0xff]  }
 0x11f   : > { %9803 = vmatpush3.bf16.msra.mxu0 %v11407_v10  ;;  %v4407_v10 = vmul.f32 %v14653_v0, %v4391_v13 }
 0x120   : > { %9804 = vmatprep.subr.bf16.mxu0 %v11409_v46 }
 0x121   : > { %10091 = vmatpush3.bf16.msra.mxu1 %v11408_v39  ;;  %v11428_v39 = vld [vmem:[%s14446_s2 + $0x238] sm:$0xff]  }
 0x122   : > { %9789 = vmatmul.mubr.bf16.gmra.mrb[12].mxu0 %v2039_v57  ;;  %10092 = vmatprep.subr.bf16.mxu1 %v11410_v31  ;;  %v14655_v57 = vld [vmem:[#allocation36_spill] sm:$0xff] }
 0x123   : > { %9805 = vmatpush3.bf16.msra.mxu0 %v11409_v46  ;;  %9808 = vmatprep.mubr.bf16.mxu0 %v12732_v44  ;;  %v11417_v44 = vld [vmem:[%s14446_s2 + $0x210] sm:$0xff]  }
 0x124   : > { %9806 = vmatprep.subr.bf16.mxu0 %v11411_v43  ;;  %10077 = vmatmul.mubr.bf16.gmra.mrb[12].mxu1 %v4011_v18  ;;  %v4392_v18 = vld [vmem:[#allocation2 + $0xb9] sm:$0xff] }
 0x125   : > { %10093 = vmatpush3.bf16.msra.mxu1 %v11410_v31  ;;  %10096 = vmatprep.mubr.bf16.mxu1 %v12742_v23  ;;  %v11418_v23 = vld [vmem:[%s14446_s2 + $0x210] sm:$0xff]  }
 0x126   : > { %10094 = vmatprep.subr.bf16.mxu1 %v11412_v29  ;;  %v2422_v31 = vld [vmem:[#allocation2 + $0x49] sm:$0xff] }
 0x127   : > { %9807 = vmatpush3.bf16.msra.mxu0 %v11411_v43 }
 0x128   : > { %9824 = vmatprep.subr.bf16.mxu0 %v11413_v17 }
 0x129   : > { %10095 = vmatpush3.bf16.msra.mxu1 %v11412_v29  ;;  %v4409_v29 = vmul.f32 %v14654_v24, %v4393_v62  ;;  %v4400_v62 = vld [vmem:[#allocation2 + $0xf9] sm:$0xff] }
 0x12a   : > { %9809 = vmatmul.mubr.bf16.vlgmr.msra.gmra.mrb[0].mxu0 %v12740_v34  ;;  %10112 = vmatprep.subr.bf16.mxu1 %v11414_v3  ;;  %v11419_v34 = vld [vmem:[%s14446_s2 + $0x218] sm:$0xff]  }
 0x12b   : > { %9825 = vmatpush3.bf16.msra.mxu0 %v11413_v17  ;;  %9812 = vmatprep.mubr.bf16.mxu0 %v12759_v11  ;;  %v11420_v11 = vld [vmem:[%s14446_s2 + $0x218] sm:$0xff]   ;;  %v4394_v17 = vld [vmem:[#allocation2 + $0xc9] sm:$0xff] }
 0x12c   : > { %9826 = vmatprep.subr.bf16.mxu0 %v11415_v42  ;;  %10097 = vmatmul.mubr.bf16.vlgmr.msra.gmra.mrb[0].mxu1 %v12748_v4  ;;  %v11421_v4 = vld [vmem:[%s14446_s2 + $0x220] sm:$0xff]  }
 0x12d   : > { %10113 = vmatpush3.bf16.msra.mxu1 %v11414_v3  ;;  %10100 = vmatprep.mubr.bf16.mxu1 %v12766_v9  ;;  %v11422_v9 = vld [vmem:[%s14446_s2 + $0x220] sm:$0xff]  }
 0x12e   : > { %10114 = vmatprep.subr.bf16.mxu1 %v11416_v15  ;;  %v2425_v3 = vld [vmem:[#allocation2 + $0x61] sm:$0xff] }
 0x12f   : > { %9827 = vmatpush3.bf16.msra.mxu0 %v11415_v42  ;;  %v2451_v42 = vpack.c.bf16 %v2437_v14, %v2420_v60  ;;  %v2449_v60 = vmul.f32 %v12594_v55, %v2433_v30 }
 0x130   : > { %9828 = vmatprep.subr.bf16.mxu0 %v11417_v44 }
 0x131   : > { %10115 = vmatpush3.bf16.msra.mxu1 %v11416_v15  ;;  %v4411_v15 = vmul.f32 %v14655_v57, %v4395_v48  ;;  %v4405_v48 = vld [vmem:[#allocation2 + $0x121] sm:$0xff] }
 0x132   : > { %9813 = vmatmul.mubr.bf16.gmra.mrb[4].mxu0 %v12764_v22  ;;  %10116 = vmatprep.subr.bf16.mxu1 %v11418_v23  ;;  %v11423_v22 = vld [vmem:[%s14446_s2 + $0x228] sm:$0xff]   ;;  %v4421_v14 = vmul.f32 %v12594_v55, %v4405_v48 }
 0x133   : > { %9829 = vmatpush3.bf16.msra.mxu0 %v11417_v44  ;;  %9816 = vmatprep.mubr.bf16.mxu0 %v12783_v41  ;;  %v2231_v41 = vld [vmem:[#allocation2 + $0x98] sm:$0xff]  ;;  %v4424_v35 = vpack.c.bf16 %v4411_v15, %v4394_v17  ;;  %v13119_v17 = vld [vmem:[%s14447_s3] sm:$0xff]  }
 0x134   : > { %9830 = vmatprep.subr.bf16.mxu0 %v11419_v34  ;;  %10101 = vmatmul.mubr.bf16.gmra.mrb[4].mxu1 %v12772_v8  ;;  %v11424_v8 = vld [vmem:[%s14446_s2 + $0x228] sm:$0xff]   ;;  %v2240_v20 = vpack.c.bf16 %v2232_v2, %v2231_v41  ;;  %v2427_v44 = vld [vmem:[#allocation2 + $0x71] sm:$0xff]  ;;  %v4396_v2 = vld [vmem:[#allocation2 + $0xd9] sm:$0xff] }
 0x135   : > { %10117 = vmatpush3.bf16.msra.mxu1 %v11418_v23  ;;  %10104 = vmatprep.mubr.bf16.mxu1 %v12790_v36  ;;  %v11425_v36 = vld [vmem:[%s14446_s2 + $0x230] sm:$0xff]   ;;  %v11430_v23 = vld [vmem:[%s14447_s3 + $0x48] sm:$0xff]   ;;  %v2443_v41 = vmul.f32 %v12381_v59, %v2427_v44  ;;  %v11444_v15 = vld [vmem:[%s14447_s3 + $0x60] sm:$0xff]  }
 0x136   : > { %10118 = vmatprep.subr.bf16.mxu1 %v11420_v11  ;;  %v11446_v44 = vld [vmem:[%s14447_s3 + $0x68] sm:$0xff]  }
 0x137   : > { %9831 = vmatpush3.bf16.msra.mxu0 %v11419_v34 }
 0x138   : > { %9832 = vmatprep.subr.bf16.mxu0 %v11421_v4 }
 0x139   : > { %10119 = vmatpush3.bf16.msra.mxu1 %v11420_v11  ;;  %v4397_v11 = vld [vmem:[#allocation2 + $0xe1] sm:$0xff] }
 0x13a   : > { %9817 = vmatmul.mubr.bf16.gmra.mrb[8].mxu0 %v12788_v51  ;;  %10120 = vmatprep.subr.bf16.mxu1 %v11422_v9  ;;  %v4390_v51 = vld [vmem:[#allocation2 + $0xa9] sm:$0xff]  ;;  %v4413_v13 = vmul.f32 %v12366_v7, %v4397_v11  ;;  %v13143_v11 = vld [vmem:[%s14447_s3] sm:$0xff]  }
 0x13b   : > { %9833 = vmatpush3.bf16.msra.mxu0 %v11421_v4  ;;  %9820 = vmatprep.mubr.bf16.mxu0 %v12818_v54  ;;  %v2423_v54 = vld [vmem:[#allocation2 + $0x51] sm:$0xff]  ;;  %v4422_v46 = vpack.c.bf16 %v4407_v10, %v4390_v51  ;;  %v4423_v4 = vpack.c.bf16 %v4409_v29, %v4392_v18  ;;  %v2428_v10 = vld [vmem:[#allocation2 + $0x79] sm:$0xff]  ;;  %v11438_v29 = vld [vmem:[%s14447_s3 + $0x48] sm:$0xff]  }
 0x13c   : > { %9834 = vmatprep.subr.bf16.mxu0 %v11423_v22  ;;  %10105 = vmatmul.mubr.bf16.gmra.mrb[8].mxu1 %v12796_v6  ;;  %v2450_v6 = vpack.c.bf16 %v2435_v56, %v2418_v38  ;;  %v2439_v43 = vmul.f32 %v14655_v57, %v2423_v54  ;;  %v4415_v56 = vmul.f32 %v12381_v59, %v4399_v32  ;;  %v13148_v32 = vstv %s8678_s28 }
 0x13d   : > { %10121 = vmatpush3.bf16.msra.mxu1 %v11422_v9  ;;  %10108 = vmatprep.mubr.bf16.mxu1 %v4211_v33  ;;  %v2424_v9 = vld [vmem:[#allocation2 + $0x59] sm:$0xff]  ;;  %v4398_v33 = vld [vmem:[#allocation2 + $0xe9] sm:$0xff]  ;;  %v4425_v51 = vpack.c.bf16 %v4413_v13, %v4396_v2  ;;  %v13153_v2 = vstv %s8679_s29 }
 0x13e   : > { %10122 = vmatprep.subr.bf16.mxu1 %v11424_v8  ;;  %v2452_v34 = vpack.c.bf16 %v2439_v43, %v2422_v31  ;;  %v4426_v26 = vpack.c.bf16 %v4415_v56, %v4398_v33  ;;  %v14656_v31 = vpack.c.bf16 %v12815_v61, %v12820_v53  ;;  %v4404_v43 = vld [vmem:[#allocation2 + $0x119] sm:$0xff]  ;;  %v11434_v61 = vld [vmem:[%s14447_s3 + $0x68] sm:$0xff]   ;;  %v11435_v53 = vld [vmem:[%s14447_s3 + $0x70] sm:$0xff]  }
 0x13f   : > { %9835 = vmatpush3.bf16.msra.mxu0 %v11423_v22  ;;  %v2441_v22 = vmul.f32 %v12366_v7, %v2425_v3  ;;  %v4429_v18 = vpack.c.bf16 %v4421_v14, %v4404_v43  ;;  %v11440_v3 = vld [vmem:[%s14447_s3 + $0x50] sm:$0xff]  }
 0x140   : > { %9836 = vmatprep.subr.bf16.mxu0 %v11425_v36 }
 0x141   : > { %10123 = vmatpush3.bf16.msra.mxu1 %v11424_v8  ;;  %v11431_v8 = vld [vmem:[%s14447_s3 + $0x50] sm:$0xff]   ;;  %v2453_v38 = vpack.c.bf16 %v2441_v22, %v2424_v9 }
 0x142   : > { %9821 = vmatmul.mubr.bf16.gmra.mrb[12].mxu0 %v2240_v20  ;;  %10124 = vmatprep.subr.bf16.mxu1 %v11426_v19 }
 0x143   : > { %9837 = vmatpush3.bf16.msra.mxu0 %v11425_v36  ;;  %9840 = vmatprep.mubr.bf16.mxu0 %v2450_v6  ;;  %v2429_v36 = vld [vmem:[#allocation2 + $0x81] sm:$0xff] }
 0x144   : > { %9838 = vmatprep.subr.bf16.mxu0 %v11427_v25  ;;  %10109 = vmatmul.mubr.bf16.gmra.mrb[12].mxu1 %v13061_v63  ;;  %v2445_v20 = vmul.f32 %v12445_v40, %v2429_v36 }
 0x145   : > { %10125 = vmatpush3.bf16.msra.mxu1 %v11426_v19  ;;  %10128 = vmatprep.mubr.bf16.mxu1 %v4422_v46  ;;  %v2454_v19 = vpack.c.bf16 %v2443_v41, %v2426_v1  ;;  %v2432_v46 = vld [vmem:[#allocation2 + $0x99] sm:$0xff] }
 0x146   : > { %10126 = vmatprep.subr.bf16.mxu1 %v11428_v39  ;;  %v2455_v6 = vpack.c.bf16 %v2445_v20, %v2428_v10 }
 0x147   : > { %9839 = vmatpush3.bf16.msra.mxu0 %v11427_v25  ;;  %v4401_v25 = vld [vmem:[#allocation2 + $0x101] sm:$0xff] }
 0x148   : > { %10144 = vmatprep.subr.bf16.mxu0 %v11429_v16  ;;  %v4417_v54 = vmul.f32 %v12445_v40, %v4401_v25 }
 0x149   : > { %10127 = vmatpush3.bf16.msra.mxu1 %v11428_v39 }
 0x14a   : > { %9841 = vmatmul.mubr.bf16.vlgmr.msra.gmra.mrb[0].mxu0 %v2451_v42  ;;  %v4427_v39 = vpack.c.bf16 %v4417_v54, %v4400_v62  ;;  %v11442_v42 = vld [vmem:[%s14447_s3 + $0x58] sm:$0xff]  }
 0x14b   : > { %9844 = vmatprep.mubr.bf16.mxu0 %v2452_v34  ;;  %10145 = vmatpush3.bf16.msra.mxu0 %v11429_v16  ;;  %v2457_v16 = vpack.c.bf16 %v2449_v60, %v2432_v46  ;;  %v11450_v34 = vld [vmem:[%s14447_s3 + $0x78] sm:$0xff]  }
 0x14c   : > { %10146 = vmatprep.subr.bf16.mxu0 %v11430_v23  ;;  %10129 = vmatmul.mubr.bf16.vlgmr.msra.gmra.mrb[0].mxu1 %v4423_v4  ;;  %v13146_v4 = vstv %s8677_s27  ;;  %s202_s27 = sand.u32 1, %s11649_s16  }
 0x14d   : > { %10132 = vmatprep.mubr.bf16.mxu1 %v4424_v35  ;;  %s8672_s28 = sshll.u32 %s202_s27, 8  ;;  %s14403_s19 = scalar_lea.sflag [#allocation5], %s202_s27 }
 0x14e   : > { %s14302_s29 = scalar_lea.vmem [#allocation7], %s8672_s28 }
 0x14f   : > { %10147 = vmatpush3.bf16.msra.mxu0 %v11430_v23  ;;  %v11448_v23 = vld [vmem:[%s14447_s3 + $0x70] sm:$0xff]   ;;  %s8592_s5 = sshll.u32 %s14302_s29, 4  ;;  %s14396_s5 = int_to_ptr.vmem [resolvable:$true] %s8592_s5 }
 0x150   : > { %10148 = vmatprep.subr.bf16.mxu0 %v11431_v8  ;;  %p11598_p13 = scmp.lt.s32.totalorder %s14396_s5, %s11596_s10 }
 0x152   : > { %9845 = vmatmul.mubr.bf16.gmra.mrb[4].mxu0 %v2453_v38 }
 0x153   : > { %9848 = vmatprep.mubr.bf16.mxu0 %v2454_v19  ;;  %10149 = vmatpush3.bf16.msra.mxu0 %v11431_v8 }
 0x154   : > { %10133 = vmatmul.mubr.bf16.gmra.mrb[4].mxu1 %v4425_v51  ;;  %10150 = vmatprep.subr.bf16.mxu0 %v11432_v5 }
 0x155   : > { %10136 = vmatprep.mubr.bf16.mxu1 %v4426_v26 }
 0x157   : > { %10151 = vmatpush3.bf16.msra.mxu0 %v11432_v5 }
 0x158   : > { %10152 = vmatprep.subr.bf16.mxu0 %v11433_v37 }
 0x15a   : > { %9849 = vmatmul.mubr.bf16.gmra.mrb[8].mxu0 %v2455_v6 }
 0x15b   : > { %9852 = vmatprep.mubr.bf16.mxu0 %v2456_v12  ;;  %10153 = vmatpush3.bf16.msra.mxu0 %v11433_v37  ;;  %v11436_v12 = vld [vmem:[%s14447_s3 + $0x40] sm:$0xff]  }
 0x15c   : > { %10137 = vmatmul.mubr.bf16.gmra.mrb[8].mxu1 %v4427_v39  ;;  %10154 = vmatprep.subr.bf16.mxu0 %v11434_v61 }
 0x15d   : > { %10140 = vmatprep.mubr.bf16.mxu1 %v14656_v31  ;;  %10432 = vmatprep.subr.bf16.mxu1 %v11436_v12 }
 0x15e   : > { %10433 = vmatpush3.bf16.msra.mxu1 %v11436_v12 }
 0x15f   : > { %10155 = vmatpush3.bf16.msra.mxu0 %v11434_v61  ;;  %10434 = vmatprep.subr.bf16.mxu1 %v11438_v29 }
 0x160   : > { %10156 = vmatprep.subr.bf16.mxu0 %v11435_v53 }
 0x162   : > { %9853 = vmatmul.mubr.bf16.gmra.mrb[12].mxu0 %v2457_v16  ;;  %10435 = vmatpush3.bf16.msra.mxu1 %v11438_v29 }
 0x163   : > { %10160 = vmatprep.mubr.bf16.mxu0 %v13061_v63  ;;  %10157 = vmatpush3.bf16.msra.mxu0 %v11435_v53  ;;  %v11437_v63 = vld [vmem:[%s14447_s3 + $0x78] sm:$0xff]  }
 0x164   : > { %10141 = vmatmul.mubr.bf16.gmra.mrb[12].mxu1 %v4429_v18  ;;  %10158 = vmatprep.subr.bf16.mxu0 %v11437_v63 }
 0x165   : > { %10436 = vmatprep.subr.bf16.mxu1 %v11440_v3 }
 0x166   : > { %10437 = vmatpush3.bf16.msra.mxu1 %v11440_v3 }
 0x167   : > { %10159 = vmatpush3.bf16.msra.mxu0 %v11437_v63  ;;  %10438 = vmatprep.subr.bf16.mxu1 %v11442_v42 }
 0x168   : > { %10176 = vmatprep.subr.bf16.mxu0 %v13119_v17 }
 0x16a   : > { %10439 = vmatpush3.bf16.msra.mxu1 %v11442_v42 }
 0x16b   : > { %10440 = vmatprep.subr.bf16.mxu1 %v11444_v15 }
 0x16e   : > { %10441 = vmatpush3.bf16.msra.mxu1 %v11444_v15 }
 0x16f   : > { %10442 = vmatprep.subr.bf16.mxu1 %v11446_v44 }
 0x172   : > { %10443 = vmatpush3.bf16.msra.mxu1 %v11446_v44 }
 0x173   : > { %10444 = vmatprep.subr.bf16.mxu1 %v11448_v23 }
 0x176   : > { %10445 = vmatpush3.bf16.msra.mxu1 %v11448_v23 }
 0x177   : > { %10446 = vmatprep.subr.bf16.mxu1 %v11450_v34 }
 0x17a   : > { %10447 = vmatpush3.bf16.msra.mxu1 %v11450_v34 }
 0x17b   : > { %10464 = vmatprep.subr.bf16.mxu1 %v13143_v11 }
 0x21d   : > { %v9842_v9 = vpop.f32.mrb[0].mxu0 }
 0x21e   : > { %v2638_v35 = vadd.f32 %v9842_v9, %v13146_v4  ;;  %v2556_v22 = vpop.f32.mrb[1].mxu0 }
 0x21f   : > { %v2636_v1 = vadd.f32 %v13146_v4, %v2556_v22  ;;  %v9843_v8 = vpop.f32.mrb[2].mxu0  ;;  %v10130_v13 = vpop.f32.mrb[0].mxu1 }
 0x220   : > { %vm2654_vm0 = vcmp.ge.f32.partialorder %v2638_v35, 0.0  ;;  %v2671_v41 = vmul.f32 %v13148_v32, %v2638_v35  ;;  %v2639_v33 = vadd.f32 %v9843_v8, %v13146_v4  ;;  %v2559_v36 = vpop.f32.mrb[3].mxu0  ;;  %v4609_v38 = vadd.f32 %v10130_v13, %v13146_v4  ;;  %v4528_v19 = vpop.f32.mrb[1].mxu1 }
 0x221   : > { %vm2652_vm1 = vcmp.ge.f32.partialorder %v2636_v1, 0.0  ;;  %v2669_v56 = vmul.f32 %v13148_v32, %v2636_v1  ;;  %v2637_v51 = vadd.f32 %v13146_v4, %v2559_v36  ;;  %v4607_v20 = vadd.f32 %v4528_v19, %v13146_v4  ;;  %v10131_v10 = vpop.f32.mrb[2].mxu1 }
 0x222   : > { %v2687_v26 = vsel %vm2654_vm0, %v2638_v35, %v2671_v41  ;;  %vm2655_vm2 = vcmp.ge.f32.partialorder %v2639_v33, 0.0  ;;  %v2672_v25 = vmul.f32 %v13148_v32, %v2639_v33  ;;  %vm4625_vm3 = vcmp.ge.f32.partialorder %v4609_v38, 0.0  ;;  %v4531_v30 = vpop.f32.mrb[3].mxu1 }
 0x223   : > { %v13162_v54 = vadd.f32 %v13153_v2, %v2687_v26  ;;  %v4641_v6 = vmul.f32 %v4609_v38, %v13148_v32  ;;  %v2685_v62 = vsel %vm2652_vm1, %v2636_v1, %v2669_v56  ;;  %vm4623_vm4 = vcmp.ge.f32.partialorder %v4607_v20, 0.0 }
 0x224   : > { %v13166_v39 = vadd.f32 %v13153_v2, %v2685_v62  ;;  %v4639_v60 = vmul.f32 %v4607_v20, %v13148_v32  ;;  %v2688_v48 = vsel %vm2655_vm2, %v2639_v33, %v2672_v25  ;;  %v4610_v31 = vadd.f32 %v10131_v10, %v13146_v4 }
 0x225   : > { %2720 = vst [vmem:[#allocation3 + $0x28] sm:$0xff] %v13162_v54  ;;  %v4657_v46 = vsel %vm4625_vm3, %v4609_v38, %v4641_v6  ;;  %v13171_v14 = vadd.f32 %v13153_v2, %v2688_v48  ;;  %vm2653_vm5 = vcmp.ge.f32.partialorder %v2637_v51, 0.0  ;;  %v9846_v16 = vpop.f32.mrb[4].mxu0  ;;  %v2670_v5 = vmul.f32 %v13148_v32, %v2637_v51 }
 0x226   : > { %v13175_v43 = vadd.f32 %v4657_v46, %v13153_v2  ;;  %2718 = vst [vmem:[#allocation3 + $0x18] sm:$0xff] %v13166_v39  ;;  %v4655_v18 = vsel %vm4623_vm4, %v4607_v20, %v4639_v60  ;;  %v4608_v37 = vadd.f32 %v4531_v30, %v13146_v4  ;;  %v2572_v61 = vpop.f32.mrb[5].mxu0  ;;  %vm4626_vm6 = vcmp.ge.f32.partialorder %v4610_v31, 0.0 }
 0x227   : > { %v13181_v53 = vadd.f32 %v4655_v18, %v13153_v2  ;;  %2721 = vst [vmem:[#allocation3 + $0x30] sm:$0xff] %v13171_v14  ;;  %v4642_v12 = vmul.f32 %v4610_v31, %v13148_v32  ;;  %v2642_v63 = vadd.f32 %v9846_v16, %v13146_v4  ;;  %v9847_v29 = vpop.f32.mrb[6].mxu0  ;;  %v2686_v3 = vsel %vm2653_vm5, %v2637_v51, %v2670_v5  ;;  %v10134_v15 = vpop.f32.mrb[4].mxu1 }
 0x228   : > { %4689 = vst [vmem:[#allocation3 + $0xa8] sm:$0xff] %v13175_v43  ;;  %vm4624_vm7 = vcmp.ge.f32.partialorder %v4608_v37, 0.0  ;;  %v4640_v42 = vmul.f32 %v4608_v37, %v13148_v32  ;;  %v2640_v44 = vadd.f32 %v13146_v4, %v2572_v61  ;;  %v2575_v23 = vpop.f32.mrb[7].mxu0  ;;  %v13191_v9 = vadd.f32 %v13153_v2, %v2686_v3  ;;  %v4544_v22 = vpop.f32.mrb[5].mxu1 }
 0x229   : > { %4687 = vst [vmem:[#allocation3 + $0x98] sm:$0xff] %v13181_v53  ;;  %v4658_v34 = vsel %vm4626_vm6, %v4610_v31, %v4642_v12  ;;  %vm2658_vm8 = vcmp.ge.f32.partialorder %v2642_v63, 0.0  ;;  %v2675_v35 = vmul.f32 %v13148_v32, %v2642_v63  ;;  %v4613_v41 = vadd.f32 %v10134_v15, %v13146_v4  ;;  %v10135_v13 = vpop.f32.mrb[6].mxu1 }
 0x22a   : > { %v13195_v1 = vadd.f32 %v4658_v34, %v13153_v2  ;;  %v4656_v8 = vsel %vm4624_vm7, %v4608_v37, %v4640_v42  ;;  %vm2656_vm9 = vcmp.ge.f32.partialorder %v2640_v44, 0.0  ;;  %2719 = vst [vmem:[#allocation3 + $0x20] sm:$0xff] %v13191_v9  ;;  %v2673_v38 = vmul.f32 %v13148_v32, %v2640_v44  ;;  %v4547_v19 = vpop.f32.mrb[7].mxu1 }
 0x22b   : > { %v13200_v33 = vadd.f32 %v4656_v8, %v13153_v2  ;;  %v2691_v36 = vsel %vm2658_vm8, %v2642_v63, %v2675_v35  ;;  %v4611_v56 = vadd.f32 %v4544_v22, %v13146_v4  ;;  %vm4629_vm10 = vcmp.ge.f32.partialorder %v4613_v41, 0.0 }
 0x22c   : > { %4690 = vst [vmem:[#allocation3 + $0xb0] sm:$0xff] %v13195_v1  ;;  %v13206_v51 = vadd.f32 %v13153_v2, %v2691_v36  ;;  %v4645_v26 = vmul.f32 %v4613_v41, %v13148_v32  ;;  %v2643_v20 = vadd.f32 %v9847_v29, %v13146_v4  ;;  %v2689_v25 = vsel %vm2656_vm9, %v2640_v44, %v2673_v38 }
 0x22d   : > { %4688 = vst [vmem:[#allocation3 + $0xa0] sm:$0xff] %v13200_v33  ;;  %vm4627_vm11 = vcmp.ge.f32.partialorder %v4611_v56, 0.0  ;;  %v4643_v10 = vmul.f32 %v4611_v56, %v13148_v32  ;;  %v4614_v6 = vadd.f32 %v10135_v13, %v13146_v4  ;;  %v9850_v62 = vpop.f32.mrb[8].mxu0  ;;  %v13215_v60 = vadd.f32 %v13153_v2, %v2689_v25 }
 0x22e   : > { %2724 = vst [vmem:[#allocation3 + $0x48] sm:$0xff] %v13206_v51  ;;  %v4661_v30 = vsel %vm4629_vm10, %v4613_v41, %v4645_v26  ;;  %vm2659_vm12 = vcmp.ge.f32.partialorder %v2643_v20, 0.0  ;;  %v2676_v48 = vmul.f32 %v13148_v32, %v2643_v20  ;;  %v2588_v46 = vpop.f32.mrb[9].mxu0  ;;  %v2641_v12 = vadd.f32 %v13146_v4, %v2575_v23 }
 0x22f   : > { %v13219_v31 = vadd.f32 %v4661_v30, %v13153_v2  ;;  %v4659_v16 = vsel %vm4627_vm11, %v4611_v56, %v4643_v10  ;;  %vm4630_vm13 = vcmp.ge.f32.partialorder %v4614_v6, 0.0  ;;  %v4646_v18 = vmul.f32 %v4614_v6, %v13148_v32  ;;  %v9851_v5 = vpop.f32.mrb[10].mxu0  ;;  %2722 = vst [vmem:[#allocation3 + $0x38] sm:$0xff] %v13215_v60  ;;  %v10138_v29 = vpop.f32.mrb[8].mxu1 }
 0x230   : > { %v13224_v37 = vadd.f32 %v4659_v16, %v13153_v2  ;;  %v2692_v61 = vsel %vm2659_vm12, %v2643_v20, %v2676_v48  ;;  %v4612_v63 = vadd.f32 %v4547_v19, %v13146_v4  ;;  %v2591_v3 = vpop.f32.mrb[11].mxu0  ;;  %v2646_v44 = vadd.f32 %v9850_v62, %v13146_v4  ;;  %v4560_v35 = vpop.f32.mrb[9].mxu1 }
 0x231   : > { %4693 = vst [vmem:[#allocation3 + $0xc8] sm:$0xff] %v13219_v31  ;;  %v13230_v42 = vadd.f32 %v13153_v2, %v2692_v61  ;;  %v4662_v15 = vsel %vm4630_vm13, %v4614_v6, %v4646_v18  ;;  %v4617_v34 = vadd.f32 %v10138_v29, %v13146_v4  ;;  %vm2657_vm14 = vcmp.ge.f32.partialorder %v2641_v12, 0.0  ;;  %v10139_v8 = vpop.f32.mrb[10].mxu1 }
 0x232   : > { %4691 = vst [vmem:[#allocation3 + $0xb8] sm:$0xff] %v13224_v37  ;;  %v13236_v22 = vadd.f32 %v4662_v15, %v13153_v2  ;;  %v2674_v23 = vmul.f32 %v13148_v32, %v2641_v12  ;;  %vm4628_vm15 = vcmp.ge.f32.partialorder %v4612_v63, 0.0  ;;  %v4644_v41 = vmul.f32 %v4612_v63, %v13148_v32  ;;  %v4563_v36 = vpop.f32.mrb[11].mxu1 }
 0x233   : > { %2725 = vst [vmem:[#allocation3 + $0x50] sm:$0xff] %v13230_v42  ;;  %vm2662_vm0 = vcmp.ge.f32.partialorder %v2646_v44, 0.0  ;;  %v2679_v13 = vmul.f32 %v13148_v32, %v2646_v44  ;;  %vm4633_vm1 = vcmp.ge.f32.partialorder %v4617_v34, 0.0  ;;  %v4649_v56 = vmul.f32 %v4617_v34, %v13148_v32 }
 0x234   : > { %4694 = vst [vmem:[#allocation3 + $0xd0] sm:$0xff] %v13236_v22  ;;  %v2690_v38 = vsel %vm2657_vm14, %v2641_v12, %v2674_v23  ;;  %v2644_v19 = vadd.f32 %v13146_v4, %v2588_v46  ;;  %v4615_v26 = vadd.f32 %v4560_v35, %v13146_v4  ;;  %v4660_v25 = vsel %vm4628_vm15, %v4612_v63, %v4644_v41 }
 0x235   : > { %v13247_v20 = vadd.f32 %v13153_v2, %v2690_v38  ;;  %v2695_v10 = vsel %vm2662_vm0, %v2646_v44, %v2679_v13  ;;  %v2647_v6 = vadd.f32 %v9851_v5, %v13146_v4  ;;  %v9854_v62 = vpop.f32.mrb[12].mxu0  ;;  %v13251_v30 = vadd.f32 %v4660_v25, %v13153_v2 }
 0x236   : > { %v13254_v48 = vadd.f32 %v13153_v2, %v2695_v10  ;;  %v4665_v16 = vsel %vm4633_vm1, %v4617_v34, %v4649_v56  ;;  %vm2660_vm2 = vcmp.ge.f32.partialorder %v2644_v19, 0.0  ;;  %v2604_v18 = vpop.f32.mrb[13].mxu0  ;;  %v2677_v61 = vmul.f32 %v13148_v32, %v2644_v19  ;;  %v11441_v56 = vld [vmem:[%s14447_s3 + $0x8] sm:$0xff]  }
 0x237   : > { %2723 = vst [vmem:[#allocation3 + $0x40] sm:$0xff] %v13247_v20  ;;  %v13258_v46 = vadd.f32 %v4665_v16, %v13153_v2  ;;  %vm4631_vm3 = vcmp.ge.f32.partialorder %v4615_v26, 0.0  ;;  %v4647_v5 = vmul.f32 %v4615_v26, %v13148_v32  ;;  %v9855_v12 = vpop.f32.mrb[14].mxu0  ;;  %4692 = vst [vmem:[#allocation3 + $0xc0] sm:$0xff] %v13251_v30  ;;  %vm2663_vm4 = vcmp.ge.f32.partialorder %v2647_v6, 0.0  ;;  %v10142_v44 = vpop.f32.mrb[12].mxu1 }
 0x238   : > { %2728 = vst [vmem:[#allocation3 + $0x68] sm:$0xff] %v13254_v48  ;;  %v2680_v63 = vmul.f32 %v13148_v32, %v2647_v6  ;;  %v4618_v29 = vadd.f32 %v10139_v8, %v13146_v4  ;;  %v2645_v15 = vadd.f32 %v13146_v4, %v2591_v3  ;;  %v2607_v34 = vpop.f32.mrb[15].mxu0  ;;  %v2693_v35 = vsel %vm2660_vm2, %v2644_v19, %v2677_v61  ;;  %v4576_v38 = vpop.f32.mrb[13].mxu1 }
 0x239   : > { %4697 = vst [vmem:[#allocation3 + $0xe8] sm:$0xff] %v13258_v46  ;;  %v4663_v23 = vsel %vm4631_vm3, %v4615_v26, %v4647_v5  ;;  %v4616_v41 = vadd.f32 %v4563_v36, %v13146_v4  ;;  %v4776_v13 = vpack.c.bf16 %v13191_v9, %v13166_v39  ;;  %v13276_v8 = vadd.f32 %v13153_v2, %v2693_v35  ;;  %v10143_v19 = vpop.f32.mrb[14].mxu1 }
 0x23a   : > { %v13279_v3 = vadd.f32 %v4663_v23, %v13153_v2  ;;  %v2696_v25 = vsel %vm2663_vm4, %v2647_v6, %v2680_v63  ;;  %vm4634_vm5 = vcmp.ge.f32.partialorder %v4618_v29, 0.0  ;;  %v4650_v36 = vmul.f32 %v4618_v29, %v13148_v32  ;;  %v4579_v9 = vpop.f32.mrb[15].mxu1  ;;  %v11443_v23 = vld [vmem:[%s14447_s3 + $0x10] sm:$0xff]  }
 0x23b   : > { %v13282_v26 = vadd.f32 %v13153_v2, %v2696_v25  ;;  %vm2661_vm6 = vcmp.ge.f32.partialorder %v2645_v15, 0.0  ;;  %v2678_v39 = vmul.f32 %v13148_v32, %v2645_v15  ;;  %10161 = vmatmul.mubr.bf16.vlgmr.msra.gmra.mrb[16].mxu0 %v4776_v13  ;;  %2726 = vst [vmem:[#allocation3 + $0x58] sm:$0xff] %v13276_v8  ;;  %vm4632_vm7 = vcmp.ge.f32.partialorder %v4616_v41, 0.0 }
 0x23c   : > { %4695 = vst [vmem:[#allocation3 + $0xd8] sm:$0xff] %v13279_v3  ;;  %v4648_v10 = vmul.f32 %v4616_v41, %v13148_v32  ;;  %v4777_v6 = vpack.c.bf16 %v13171_v14, %v13162_v54  ;;  %10177 = vmatpush3.bf16.msra.mxu0 %v13119_v17  ;;  %v2650_v16 = vadd.f32 %v9854_v62, %v13146_v4 }
 0x23d   : > { %2729 = vst [vmem:[#allocation3 + $0x70] sm:$0xff] %v13282_v26  ;;  %v4666_v61 = vsel %vm4634_vm5, %v4618_v29, %v4650_v36  ;;  %v2694_v5 = vsel %vm2661_vm6, %v2645_v15, %v2678_v39  ;;  %v4621_v63 = vadd.f32 %v10142_v44, %v13146_v4  ;;  %v2648_v35 = vadd.f32 %v13146_v4, %v2604_v18 }
 0x23e   : > { %10178 = vmatprep.subr.bf16.mxu0 %v11441_v56  ;;  %v13301_v54 = vadd.f32 %v4666_v61, %v13153_v2  ;;  %v13304_v17 = vadd.f32 %v13153_v2, %v2694_v5  ;;  %v4664_v14 = vsel %vm4632_vm7, %v4616_v41, %v4648_v10  ;;  %10164 = vmatprep.mubr.bf16.mxu0 %v4777_v6  ;;  %vm2666_vm8 = vcmp.ge.f32.partialorder %v2650_v16, 0.0  ;;  %v11445_v10 = vld [vmem:[%s14447_s3 + $0x18] sm:$0xff]  }
 0x23f   : > { %v13307_v62 = vadd.f32 %v4664_v14, %v13153_v2  ;;  %v2683_v29 = vmul.f32 %v13148_v32, %v2650_v16  ;;  %vm4637_vm9 = vcmp.ge.f32.partialorder %v4621_v63, 0.0  ;;  %v4653_v18 = vmul.f32 %v4621_v63, %v13148_v32 }
 0x240   : > { %4698 = vst [vmem:[#allocation3 + $0xf0] sm:$0xff] %v13301_v54  ;;  %2727 = vst [vmem:[#allocation3 + $0x60] sm:$0xff] %v13304_v17  ;;  %vm2664_vm10 = vcmp.ge.f32.partialorder %v2648_v35, 0.0  ;;  %v2681_v15 = vmul.f32 %v13148_v32, %v2648_v35  ;;  %v4619_v44 = vadd.f32 %v4576_v38, %v13146_v4  ;;  %v2651_v41 = vadd.f32 %v9855_v12, %v13146_v4 }
 0x241   : > { %10179 = vmatpush3.bf16.msra.mxu0 %v11441_v56  ;;  %4696 = vst [vmem:[#allocation3 + $0xe0] sm:$0xff] %v13307_v62  ;;  %v2699_v13 = vsel %vm2666_vm8, %v2650_v16, %v2683_v29  ;;  %v4669_v25 = vsel %vm4637_vm9, %v4621_v63, %v4653_v18  ;;  %v4622_v36 = vadd.f32 %v10143_v19, %v13146_v4  ;;  %v11447_v29 = vld [vmem:[%s14447_s3 + $0x20] sm:$0xff]  }
 0x242   : > { %v2649_v39 = vadd.f32 %v13146_v4, %v2607_v34  ;;  %10180 = vmatprep.subr.bf16.mxu0 %v11443_v23  ;;  %v2716_v6 = vadd.f32 %v13153_v2, %v2699_v13  ;;  %v4685_v38 = vadd.f32 %v4669_v25, %v13153_v2  ;;  %v2697_v61 = vsel %vm2664_vm10, %v2648_v35, %v2681_v15 }
 0x243   : > { %vm4635_vm11 = vcmp.ge.f32.partialorder %v4619_v44, 0.0  ;;  %v13325_v12 = vadd.f32 %v13153_v2, %v2697_v61  ;;  %v4651_v56 = vmul.f32 %v4619_v44, %v13148_v32  ;;  %vm2667_vm12 = vcmp.ge.f32.partialorder %v2651_v41, 0.0 }
 0x244   : > { %v2684_v19 = vmul.f32 %v13148_v32, %v2651_v41  ;;  %2732 = vst [vmem:[#allocation3 + $0x88] sm:$0xff] %v2716_v6  ;;  %4701 = vst [vmem:[#allocation3 + $0x108] sm:$0xff] %v4685_v38  ;;  %vm4638_vm13 = vcmp.ge.f32.partialorder %v4622_v36, 0.0  ;;  %v4654_v34 = vmul.f32 %v4622_v36, %v13148_v32  ;;  %vm2665_vm14 = vcmp.ge.f32.partialorder %v2649_v39, 0.0  ;;  %v13403_v38 = vld [vmem:[#allocation3 + $0x1f] sm:$0xff] }
 0x245   : > { %v2682_v16 = vmul.f32 %v13148_v32, %v2649_v39  ;;  %10181 = vmatpush3.bf16.msra.mxu0 %v11443_v23  ;;  %2730 = vst [vmem:[#allocation3 + $0x78] sm:$0xff] %v13325_v12  ;;  %v4667_v5 = vsel %vm4635_vm11, %v4619_v44, %v4651_v56  ;;  %v4620_v35 = vadd.f32 %v4579_v9, %v13146_v4 }
 0x246   : > { %v2700_v63 = vsel %vm2667_vm12, %v2651_v41, %v2684_v19  ;;  %v4778_v14 = vpack.c.bf16 %v13247_v20, %v13215_v60  ;;  %10182 = vmatprep.subr.bf16.mxu0 %v11445_v10  ;;  %v13339_v18 = vadd.f32 %v4667_v5, %v13153_v2  ;;  %v4670_v23 = vsel %vm4638_vm13, %v4622_v36, %v4654_v34  ;;  %v13411_v34 = vld [vmem:[#allocation3 + $0x2f] sm:$0xff]  ;;  %v6645_v5 = vld [vmem:[#allocation3 + $0xa7] sm:$0xff] }
 0x247   : > { %v2717_v15 = vadd.f32 %v13153_v2, %v2700_v63  ;;  %v2698_v13 = vsel %vm2665_vm14, %v2649_v39, %v2682_v16  ;;  %v4686_v44 = vadd.f32 %v4670_v23, %v13153_v2  ;;  %vm4636_vm15 = vcmp.ge.f32.partialorder %v4620_v35, 0.0  ;;  %14658 = vst [vmem:[#allocation15_spill] sm:$0xff] %v13411_v34  ;;  %v11457_v16 = vld [vmem:[%s14447_s3 + $0x88] sm:$0xff]   ;;  %v11459_v23 = vld [vmem:[%s14447_s3 + $0x90] sm:$0xff]  }
 0x248   : > { %v2715_v41 = vadd.f32 %v13153_v2, %v2698_v13  ;;  %v4652_v4 = vmul.f32 %v4620_v35, %v13148_v32  ;;  %10165 = vmatmul.mubr.bf16.gmra.mrb[20].mxu0 %v4778_v14  ;;  %4699 = vst [vmem:[#allocation3 + $0xf8] sm:$0xff] %v13339_v18  ;;  %v4779_v60 = vpack.c.bf16 %v13230_v42, %v13206_v51  ;;  %v11449_v32 = vld [vmem:[%s14447_s3 + $0x28] sm:$0xff]   ;;  %v11464_v14 = vld [vmem:[%s14447_s3 + $0x30] sm:$0xff]  }
 0x249   : > { %2733 = vst [vmem:[#allocation3 + $0x90] sm:$0xff] %v2717_v15  ;;  %10183 = vmatpush3.bf16.msra.mxu0 %v11445_v10  ;;  %v4780_v20 = vpack.c.bf16 %v13304_v17, %v13276_v8  ;;  %v4781_v9 = vpack.c.bf16 %v13282_v26, %v13254_v48  ;;  %v6713_v25 = vpack.c.bf16 %v2717_v15, %v2716_v6  ;;  %4702 = vst [vmem:[#allocation3 + $0x110] sm:$0xff] %v4686_v44  ;;  %v11454_v48 = vld [vmem:[%s14447_s3 + $0x8] sm:$0xff]   ;;  %v13399_v10 = vld [vmem:[#allocation3 + $0x27] sm:$0xff] }
 0x24a   : > { %2731 = vst [vmem:[#allocation3 + $0x80] sm:$0xff] %v2715_v41  ;;  %v4668_v36 = vsel %vm4636_vm15, %v4620_v35, %v4652_v4  ;;  %10184 = vmatprep.subr.bf16.mxu0 %v11447_v29  ;;  %v4782_v39 = vpack.c.bf16 %v2715_v41, %v13325_v12  ;;  %v6714_v51 = vpack.c.bf16 %v13200_v33, %v13181_v53  ;;  %v11456_v33 = vld [vmem:[%s14447_s3 + $0x10] sm:$0xff]   ;;  %14657 = vst [vmem:[#allocation17_spill] sm:$0xff] %v13399_v10  ;;  %v11462_v12 = vld [vmem:[%s14447_s3 + $0x28] sm:$0xff]  }
 0x24b   : > { %v6715_v42 = vpack.c.bf16 %v13195_v1, %v13175_v43  ;;  %v13361_v8 = vadd.f32 %v4668_v36, %v13153_v2  ;;  %10168 = vmatprep.mubr.bf16.mxu0 %v4779_v60  ;;  %10448 = vmatprep.mubr.bf16.mxu1 %v6713_v25  ;;  %v6716_v26 = vpack.c.bf16 %v13251_v30, %v13224_v37  ;;  %v11451_v43 = vld [vmem:[%s14447_s3 + $0x30] sm:$0xff]   ;;  %v11458_v30 = vld [vmem:[%s14447_s3 + $0x18] sm:$0xff]   ;;  %v13417_v35 = vld [vmem:[#allocation3 + $0x37] sm:$0xff] }
 0x24c   : > { %10449 = vmatmul.mubr.bf16.vlgmr.msra.gmra.mrb[16].mxu1 %v6714_v51  ;;  %v6717_v17 = vpack.c.bf16 %v13236_v22, %v13219_v31  ;;  %v6718_v53 = vpack.c.bf16 %v13307_v62, %v13279_v3  ;;  %v6719_v2 = vpack.c.bf16 %v13301_v54, %v13258_v46  ;;  %v4703_v1 = vld [vmem:[#allocation3 + $0x7] sm:$0xff]  ;;  %v11455_v3 = vld [vmem:[%s14447_s3 + $0x80] sm:$0xff]   ;;  %v4723_v61 = vmul.f32 %v12066_v49, %v13399_v10  ;;  %v13444_v25 = vld [vmem:[#allocation3 + $0x3f] sm:$0xff] }
 0x24d   : > { %4700 = vst [vmem:[#allocation3 + $0x100] sm:$0xff] %v13361_v8  ;;  %10185 = vmatpush3.bf16.msra.mxu0 %v11447_v29  ;;  %10452 = vmatprep.mubr.bf16.mxu1 %v6715_v42  ;;  %v6720_v31 = vpack.c.bf16 %v13361_v8, %v13339_v18  ;;  %v4719_v37 = vmul.f32 %v11834_v28, %v4703_v1  ;;  %v11453_v22 = vld [vmem:[%s14447_s3 + $0x38] sm:$0xff]   ;;  %v13394_v54 = vld [vmem:[#allocation3 + $0x17] sm:$0xff]  ;;  %14659 = vst [vmem:[#allocation21_spill] sm:$0xff] %v13417_v35 }
 0x24e   : > { %10186 = vmatprep.subr.bf16.mxu0 %v11449_v32  ;;  %10465 = vmatpush3.bf16.msra.mxu1 %v13143_v11  ;;  %v4704_v11 = vld [vmem:[#allocation3 + $0xf] sm:$0xff]  ;;  %v4721_v6 = vmul.f32 %v12059_v47, %v13394_v54  ;;  %v4737_v63 = vpack.c.bf16 %v13411_v34, %v4723_v61  ;;  %v13423_v15 = vld [vmem:[#allocation3 + $0x47] sm:$0xff]  ;;  %v13434_v41 = vmul.f32 %v12059_v47, %v6645_v5  ;;  %v13547_v51 = vld [vmem:[#allocation3 + $0x39] sm:$0xff] }
 0x24f   : > { %10466 = vmatprep.subr.bf16.mxu1 %v11454_v48  ;;  %v4735_v46 = vpack.c.bf16 %v4704_v11, %v4719_v37  ;;  %v11460_v62 = vld [vmem:[%s14447_s3 + $0x20] sm:$0xff]   ;;  %14660 = vst [vmem:[#allocation16_spill] sm:$0xff] %v13423_v15  ;;  %v13428_v13 = vld [vmem:[#allocation3 + $0xc7] sm:$0xff]  ;;  %v4725_v4 = vmul.f32 %v14606_v45, %v13417_v35  ;;  %14665 = vst [vmem:[#allocation26_spill] sm:$0xff] %v13444_v25  ;;  %v4727_v36 = vmul.f32 %v14608_v50, %v13423_v15 }
 0x250   : > { %10169 = vmatmul.mubr.bf16.gmra.mrb[24].mxu0 %v4780_v20  ;;  %v4736_v19 = vpack.c.bf16 %v13403_v38, %v4721_v6  ;;  %14662 = vst [vmem:[#allocation23_spill] sm:$0xff] %v13434_v41  ;;  %v13438_v60 = vld [vmem:[#allocation3 + $0x8f] sm:$0xff]  ;;  %v13501_v6 = vld [vmem:[#allocation3 + $0x5f] sm:$0xff] }
 0x251   : > { %10172 = vmatprep.mubr.bf16.mxu0 %v4781_v9  ;;  %10187 = vmatpush3.bf16.msra.mxu0 %v11449_v32  ;;  %v6641_v56 = vld [vmem:[#allocation3 + $0x87] sm:$0xff]  ;;  %14663 = vst [vmem:[#allocation25_spill] sm:$0xff] %v13438_v60  ;;  %v13440_v20 = vld [vmem:[#allocation3 + $0xaf] sm:$0xff]  ;;  %v4738_v8 = vpack.c.bf16 %v13444_v25, %v4725_v4  ;;  %14673 = vst [vmem:[#allocation28_spill] sm:$0xff] %v13501_v6 }
 0x252   : > { %10188 = vmatprep.subr.bf16.mxu0 %v11451_v43  ;;  %10467 = vmatpush3.bf16.msra.mxu1 %v11454_v48  ;;  %v6657_v29 = vmul.f32 %v11834_v28, %v6641_v56  ;;  %v13431_v44 = vmul.f32 %v14624_v27, %v6641_v56  ;;  %14664 = vst [vmem:[#allocation20_spill] sm:$0xff] %v13440_v20  ;;  %v13442_v9 = vld [vmem:[#allocation3 + $0xe7] sm:$0xff]  ;;  %v13456_v48 = vld [vmem:[#allocation3 + $0x57] sm:$0xff]  ;;  %v13479_v1 = vld [vmem:[#allocation3 + $0x4f] sm:$0xff] }
 0x253   : > { %10468 = vmatprep.subr.bf16.mxu1 %v11456_v33  ;;  %14666 = vst [vmem:[#allocation22_spill] sm:$0xff] %v13456_v48  ;;  %v13476_v18 = vmul.f32 %v14616_v21, %v13442_v9  ;;  %14671 = vst [vmem:[#allocation31_spill] sm:$0xff] %v13479_v1  ;;  %v13490_v11 = vmul.f32 %v14616_v21, %v13456_v48  ;;  %v13506_v61 = vld [vmem:[%s14447_s3 + $0xa0] sm:$0xff]   ;;  %v13509_v56 = vld [vmem:[#allocation3 + $0x41] sm:$0xff] }
 0x254   : > { %10453 = vmatmul.mubr.bf16.gmra.mrb[20].mxu1 %v6716_v26  ;;  %14661 = vst [vmem:[#allocation18_spill] sm:$0xff] %v13431_v44  ;;  %v6673_v32 = vpack.c.bf16 %v13438_v60, %v6657_v29  ;;  %v13461_v26 = vld [vmem:[#allocation3 + $0x97] sm:$0xff]  ;;  %v13521_v29 = vld [vmem:[#allocation3 + $0x61] sm:$0xff]  ;;  %v13557_v44 = vld [vmem:[#allocation3 + $0x6f] sm:$0xff] }
 0x255   : > { %10189 = vmatpush3.bf16.msra.mxu0 %v11451_v43  ;;  %10456 = vmatprep.mubr.bf16.mxu1 %v6717_v17  ;;  %14667 = vst [vmem:[#allocation19_spill] sm:$0xff] %v13461_v26  ;;  %v13465_v17 = vmul.f32 %v14606_v45, %v13428_v13  ;;  %v13472_v43 = vld [vmem:[#allocation3 + $0xcf] sm:$0xff]  ;;  %14670 = vst [vmem:[#allocation27_spill] sm:$0xff] %v13476_v18  ;;  %v13555_v18 = vmul.f32 %v14655_v57, %v13509_v56 }
 0x256   : > { %10190 = vmatprep.subr.bf16.mxu0 %v11453_v22  ;;  %10469 = vmatpush3.bf16.msra.mxu1 %v11456_v33  ;;  %14669 = vst [vmem:[#allocation24_spill] sm:$0xff] %v13472_v43  ;;  %v13481_v33 = vld [vmem:[#allocation3 + $0x67] sm:$0xff]  ;;  %v13549_v37 = vld [vmem:[#allocation3 + $0xb1] sm:$0xff]  ;;  %14679 = vst [vmem:[#allocation39_spill] sm:$0xff] %v13557_v44  ;;  %v13577_v41 = vmul.f32 %v12381_v59, %v13521_v29 }
 0x257   : > { %10470 = vmatprep.subr.bf16.mxu1 %v11458_v30  ;;  %14668 = vst [vmem:[#allocation30_spill] sm:$0xff] %v13465_v17  ;;  %14672 = vst [vmem:[#allocation33_spill] sm:$0xff] %v13481_v33  ;;  %v13565_v60 = vld [vmem:[#allocation3 + $0x91] sm:$0xff]  ;;  %v13567_v17 = vld [vmem:[#allocation3 + $0x81] sm:$0xff] }
 0x258   : > { %10173 = vmatmul.mubr.bf16.gmra.mrb[28].mxu0 %v4782_v39  ;;  %v11466_v39 = vld [vmem:[%s14447_s3 + $0x38] sm:$0xff]   ;;  %14678 = vst [vmem:[#allocation38_spill] sm:$0xff] %v13555_v18  ;;  %14681 = vst [vmem:[#allocation42_spill] sm:$0xff] %v13577_v41  ;;  %v13613_v48 = vld [vmem:[#allocation3 + $0xd1] sm:$0xff]  ;;  %v13619_v15 = vmul.f32 %v12466_v52, %v13567_v17  ;;  %v6665_v18 = vmul.f32 %v14608_v50, %v13428_v13 }
 0x259   : > { %10191 = vmatpush3.bf16.msra.mxu0 %v11453_v22  ;;  %10192 = vmatprep.mubr.bf16.mxu0 %v4735_v46  ;;  %v4739_v22 = vpack.c.bf16 %v13479_v1, %v4727_v36  ;;  %v11468_v46 = vld [vmem:[%s14447_s3 + $0x80] sm:$0xff]   ;;  %v13601_v1 = vld [vmem:[#allocation3 + $0x99] sm:$0xff]  ;;  %v13651_v50 = vld [vmem:[#allocation3 + $0x101] sm:$0xff] }
 0x25a   : > { %10208 = vmatprep.subr.bf16.mxu0 %v11455_v3  ;;  %10471 = vmatpush3.bf16.msra.mxu1 %v11458_v30  ;;  %v6659_v30 = vmul.f32 %v12059_v47, %v13461_v26  ;;  %v13534_v36 = vld [vmem:[#allocation3 + $0x71] sm:$0xff]  ;;  %14685 = vst [vmem:[#allocation45_spill] sm:$0xff] %v13619_v15  ;;  %v13632_v41 = vld [vmem:[#allocation3 + $0x89] sm:$0xff]  ;;  %14690 = vst [vmem:[#allocation34_spill] sm:$0xff] %v13651_v50  ;;  %v6677_v35 = vpack.c.bf16 %v13472_v43, %v6665_v18 }
 0x25b   : > { %10472 = vmatprep.subr.bf16.mxu1 %v11460_v62  ;;  %v13649_v13 = vld [vmem:[#allocation3 + $0xf1] sm:$0xff]  ;;  %v13669_v15 = vld [vmem:[#allocation3 + $0x7f] sm:$0xff]  ;;  %v5089_v34 = vld [vmem:[#allocation3 + $0x9] sm:$0xff] }
 0x25c   : > { %10457 = vmatmul.mubr.bf16.gmra.mrb[24].mxu1 %v6718_v53  ;;  %v11461_v53 = vld [vmem:[%s14447_s3 + $0x98] sm:$0xff]  }
 0x25d   : > { %10460 = vmatprep.mubr.bf16.mxu1 %v6719_v2  ;;  %v13470_v2 = vld [vmem:[#allocation3 + $0x21] sm:$0xff]  ;;  %v13746_v43 = vld [vmem:[#allocation3 + $0x10f] sm:$0xff] }
 0x25e   : > { %10473 = vmatpush3.bf16.msra.mxu1 %v11460_v62  ;;  %v13525_v4 = vmul.f32 %v14653_v0, %v13470_v2  ;;  %v13545_v62 = vld [vmem:[#allocation3 + $0xb7] sm:$0xff]  ;;  %v11469_v10 = vld [vmem:[%s14447_s3 + $0xb8] sm:$0xff]  }
 0x25f   : > { %10474 = vmatprep.subr.bf16.mxu1 %v11462_v12  ;;  %14677 = vst [vmem:[#allocation37_spill] sm:$0xff] %v13545_v62 }
 0x260   : > { %10193 = vmatmul.mubr.bf16.vlgmr.msra.gmra.mrb[16].mxu0 %v4736_v19  ;;  %v13513_v19 = vmul.f32 %v12183_v58, %v13481_v33  ;;  %14674 = vst [vmem:[#allocation35_spill] sm:$0xff] %v13525_v4 }
 0x261   : > { %10196 = vmatprep.mubr.bf16.mxu0 %v4737_v63  ;;  %10209 = vmatpush3.bf16.msra.mxu0 %v11455_v3  ;;  %v13497_v3 = vld [vmem:[#allocation3 + $0x31] sm:$0xff]  ;;  %v13517_v63 = vld [vmem:[#allocation3 + $0x29] sm:$0xff] }
 0x262   : > { %10210 = vmatprep.subr.bf16.mxu0 %v11457_v16  ;;  %10475 = vmatpush3.bf16.msra.mxu1 %v11462_v12  ;;  %v6661_v12 = vmul.f32 %v12066_v49, %v6645_v5  ;;  %v13527_v5 = vld [vmem:[#allocation3 + $0x9f] sm:$0xff]  ;;  %v4741_v33 = vpack.c.bf16 %v13557_v44, %v13513_v19  ;;  %v6663_v19 = vmul.f32 %v14606_v45, %v13545_v62  ;;  %v13599_v44 = vld [vmem:[#allocation3 + $0x69] sm:$0xff] }
 0x263   : > { %10476 = vmatprep.subr.bf16.mxu1 %v11464_v14  ;;  %14675 = vst [vmem:[#allocation29_spill] sm:$0xff] %v13527_v5  ;;  %v13611_v62 = vld [vmem:[#allocation3 + $0xa9] sm:$0xff]  ;;  %v13634_v45 = vld [vmem:[#allocation3 + $0x79] sm:$0xff] }
 0x264   : > { %10461 = vmatmul.mubr.bf16.gmra.mrb[28].mxu1 %v6720_v31  ;;  %v13483_v31 = vld [vmem:[#allocation3 + $0xef] sm:$0xff] }
 0x265   : > { %10211 = vmatpush3.bf16.msra.mxu0 %v11457_v16  ;;  %10480 = vmatprep.mubr.bf16.mxu1 %v6673_v32  ;;  %v13515_v16 = vld [vmem:[#allocation3 + $0x19] sm:$0xff]  ;;  %v13536_v32 = vld [vmem:[#allocation3 + $0xa1] sm:$0xff] }
 0x266   : > { %10212 = vmatprep.subr.bf16.mxu0 %v11459_v23  ;;  %10477 = vmatpush3.bf16.msra.mxu1 %v11464_v14  ;;  %v13519_v14 = vld [vmem:[#allocation3 + $0x51] sm:$0xff]  ;;  %v13623_v42 = vmul.f32 %v14653_v0, %v13536_v32 }
 0x267   : > { %10478 = vmatprep.subr.bf16.mxu1 %v11466_v39  ;;  %v13573_v4 = vmul.f32 %v12366_v7, %v13519_v14 }
 0x268   : > { %10197 = vmatmul.mubr.bf16.gmra.mrb[20].mxu0 %v4738_v8  ;;  %v13540_v8 = vmul.f32 %v14654_v24, %v13497_v3  ;;  %14686 = vst [vmem:[#allocation46_spill] sm:$0xff] %v13623_v42  ;;  %v11474_v42 = vld [vmem:[%s14447_s3 + $0x98] sm:$0xff]  }
 0x269   : > { %10200 = vmatprep.mubr.bf16.mxu0 %v4739_v22  ;;  %10213 = vmatpush3.bf16.msra.mxu0 %v11459_v23  ;;  %v13532_v23 = vld [vmem:[%s14447_s3 + $0x88] sm:$0xff]   ;;  %v4740_v22 = vpack.c.bf16 %v13501_v6, %v13490_v11  ;;  %14680 = vst [vmem:[#allocation40_spill] sm:$0xff] %v13573_v4  ;;  %v13585_v6 = vld [vmem:[#allocation3 + $0xc1] sm:$0xff]  ;;  %v13640_v4 = vmul.f32 %v14654_v24, %v13549_v37 }
 0x26a   : > { %10214 = vmatprep.subr.bf16.mxu0 %v11461_v53  ;;  %10479 = vmatpush3.bf16.msra.mxu1 %v11466_v39  ;;  %14676 = vst [vmem:[#allocation12_spill] sm:$0xff] %v13540_v8  ;;  %v6674_v39 = vpack.c.bf16 %v13527_v5, %v6659_v30  ;;  %v13562_v11 = vld [vmem:[%s14447_s3 + $0xa8] sm:$0xff]   ;;  %v6675_v30 = vpack.c.bf16 %v13440_v20, %v6661_v12  ;;  %v13581_v12 = vld [vmem:[#allocation3 + $0x49] sm:$0xff] }
 0x26b   : > { %10496 = vmatprep.subr.bf16.mxu1 %v11468_v46  ;;  %v13583_v20 = vld [vmem:[#allocation3 + $0x59] sm:$0xff]  ;;  %v13591_v8 = vmul.f32 %v12445_v40, %v13534_v36  ;;  %14688 = vst [vmem:[#allocation47_spill] sm:$0xff] %v13640_v4  ;;  %v13644_v26 = vmul.f32 %v14655_v57, %v13585_v6  ;;  %v13698_v4 = vmul.f32 %v12466_v52, %v13651_v50 }
 0x26c   : > { %v13607_v5 = vld [vmem:[#allocation3 + $0x77] sm:$0xff] }
 0x26d   : > { %10215 = vmatpush3.bf16.msra.mxu0 %v11461_v53  ;;  %10481 = vmatmul.mubr.bf16.vlgmr.msra.gmra.mrb[16].mxu1 %v6674_v39  ;;  %14682 = vst [vmem:[#allocation41_spill] sm:$0xff] %v13591_v8  ;;  %v5090_v53 = vld [vmem:[#allocation3 + $0x11] sm:$0xff]  ;;  %v11472_v39 = vld [vmem:[%s14447_s3 + $0x90] sm:$0xff]   ;;  %14683 = vst [vmem:[#allocation43_spill] sm:$0xff] %v13607_v5 }
 0x26e   : > { %10216 = vmatprep.subr.bf16.mxu0 %v13506_v61  ;;  %10484 = vmatprep.mubr.bf16.mxu1 %v6675_v30  ;;  %v13609_v30 = vld [vmem:[#allocation3 + $0xbf] sm:$0xff]  ;;  %14689 = vst [vmem:[#allocation32_spill] sm:$0xff] %v13644_v26  ;;  %v5106_v49 = vmul.f32 %v14653_v0, %v5090_v53  ;;  %v13686_v53 = vld [vmem:[#allocation3 + $0xd7] sm:$0xff]  ;;  %v13694_v26 = vmul.f32 %v12445_v40, %v13649_v13 }
 0x26f   : > { %10497 = vmatpush3.bf16.msra.mxu1 %v11468_v46  ;;  %14684 = vst [vmem:[#allocation44_spill] sm:$0xff] %v13609_v30  ;;  %v13627_v46 = vmul.f32 %v12594_v55, %v13565_v60  ;;  %v13636_v8 = vld [vmem:[#allocation3 + $0xe1] sm:$0xff]  ;;  %v13711_v50 = vld [vmem:[#allocation3 + $0xf9] sm:$0xff]  ;;  %v6667_v18 = vmul.f32 %v14616_v21, %v13686_v53 }
 0x270   : > { %10201 = vmatmul.mubr.bf16.gmra.mrb[24].mxu0 %v4740_v22  ;;  %10498 = vmatprep.subr.bf16.mxu1 %v13532_v23  ;;  %v13647_v22 = vld [vmem:[#allocation3 + $0xb9] sm:$0xff]  ;;  %v13683_v25 = vmul.f32 %v12381_v59, %v13636_v8 }
 0x271   : > { %14687 = vst [vmem:[#allocation48_spill] sm:$0xff] %v13627_v46  ;;  %10204 = vmatprep.mubr.bf16.mxu0 %v4741_v33  ;;  %10217 = vmatpush3.bf16.msra.mxu0 %v13506_v61  ;;  %v4733_v33 = vmul.f32 %v14624_v27, %v13607_v5  ;;  %v11467_v61 = vld [vmem:[%s14447_s3 + $0xb0] sm:$0xff]   ;;  %v6676_v46 = vpack.c.bf16 %v13609_v30, %v6663_v19  ;;  %v13701_v30 = vld [vmem:[#allocation3 + $0xe9] sm:$0xff] }
 0x272   : > { %10218 = vmatprep.subr.bf16.mxu0 %v13562_v11  ;;  %v13679_v5 = vmul.f32 %v12366_v7, %v13613_v48  ;;  %14691 = vst [vmem:[#allocation36_spill] sm:$0xff] %v13683_v25  ;;  %v13690_v19 = vld [vmem:[#allocation3 + $0xd9] sm:$0xff]  ;;  %v6669_v25 = vmul.f32 %v12183_v58, %v13442_v9 }
 0x273   : > { %10499 = vmatpush3.bf16.msra.mxu1 %v13532_v23  ;;  %v13688_v23 = vld [vmem:[#allocation3 + $0xc9] sm:$0xff]  ;;  %v4742_v47 = vpack.c.bf16 %v13669_v15, %v4733_v33  ;;  %v13719_v33 = vld [vmem:[#allocation3 + $0xdf] sm:$0xff] }
 0x274   : > { %10500 = vmatprep.subr.bf16.mxu1 %v11472_v39 }
 0x275   : > { %10219 = vmatpush3.bf16.msra.mxu0 %v13562_v11  ;;  %10485 = vmatmul.mubr.bf16.gmra.mrb[20].mxu1 %v6676_v46  ;;  %v5121_v46 = vpack.c.bf16 %v5106_v49, %v5089_v34  ;;  %v13726_v11 = vld [vmem:[#allocation3 + $0x107] sm:$0xff]  ;;  %v5108_v49 = vmul.f32 %v14654_v24, %v13470_v2  ;;  %v5110_v34 = vmul.f32 %v14655_v57, %v13497_v3  ;;  %v11478_v2 = vld [vmem:[%s14447_s3 + $0xa8] sm:$0xff]  }
 0x276   : > { %10220 = vmatprep.subr.bf16.mxu0 %v11467_v61  ;;  %10488 = vmatprep.mubr.bf16.mxu1 %v6677_v35  ;;  %v11476_v35 = vld [vmem:[%s14447_s3 + $0xa0] sm:$0xff]   ;;  %v13738_v9 = vmul.f32 %v12183_v58, %v13726_v11  ;;  %v11473_v3 = vld [vmem:[%s14447_s3 + $0xc8] sm:$0xff]  }
 0x277   : > { %10501 = vmatpush3.bf16.msra.mxu1 %v11472_v39  ;;  %v6678_v39 = vpack.c.bf16 %v13719_v33, %v6667_v18  ;;  %v5123_v18 = vpack.c.bf16 %v5110_v34, %v13517_v63  ;;  %v11475_v34 = vld [vmem:[%s14447_s3 + $0xd0] sm:$0xff]  }
 0x278   : > { %10205 = vmatmul.mubr.bf16.gmra.mrb[28].mxu0 %v4742_v47  ;;  %10502 = vmatprep.subr.bf16.mxu1 %v11474_v42  ;;  %v11471_v47 = vld [vmem:[%s14447_s3 + $0xc0] sm:$0xff]   ;;  %14692 = vst [vmem:[#allocation49_spill] sm:$0xff] %v13738_v9 }
 0x279   : > { %10221 = vmatpush3.bf16.msra.mxu0 %v11467_v61  ;;  %10224 = vmatprep.mubr.bf16.mxu0 %v5121_v46  ;;  %v6679_v61 = vpack.c.bf16 %v13483_v31, %v6669_v25  ;;  %v13744_v46 = vld [vmem:[#allocation3 + $0xf7] sm:$0xff] }
 0x27a   : > { %10222 = vmatprep.subr.bf16.mxu0 %v11469_v10  ;;  %v13764_v25 = vld [vmem:[#allocation3 + $0x111] sm:$0xff] }
 0x27b   : > { %10503 = vmatpush3.bf16.msra.mxu1 %v11474_v42  ;;  %v5122_v42 = vpack.c.bf16 %v5108_v49, %v13515_v16  ;;  %v11480_v49 = vld [vmem:[%s14447_s3 + $0xb0] sm:$0xff]  }
 0x27c   : > { %10504 = vmatprep.subr.bf16.mxu1 %v11476_v35 }
 0x27d   : > { %10223 = vmatpush3.bf16.msra.mxu0 %v11469_v10  ;;  %10489 = vmatmul.mubr.bf16.gmra.mrb[24].mxu1 %v6678_v39  ;;  %v6671_v10 = vmul.f32 %v14624_v27, %v13744_v46  ;;  %v13757_v39 = vld [vmem:[#allocation3 + $0xff] sm:$0xff] }
 0x27e   : > { %10240 = vmatprep.subr.bf16.mxu0 %v11471_v47  ;;  %10492 = vmatprep.mubr.bf16.mxu1 %v6679_v61  ;;  %v7044_v61 = vmul.f32 %v14653_v0, %v13565_v60 }
 0x27f   : > { %10505 = vmatpush3.bf16.msra.mxu1 %v11476_v35  ;;  %v5112_v35 = vmul.f32 %v12366_v7, %v13509_v56  ;;  %v6680_v9 = vpack.c.bf16 %v13757_v39, %v6671_v10  ;;  %v13780_v56 = vmul.f32 %v12466_v52, %v13764_v25 }
 0x280   : > { %10225 = vmatmul.mubr.bf16.vlgmr.msra.gmra.mrb[16].mxu0 %v5122_v42  ;;  %10506 = vmatprep.subr.bf16.mxu1 %v11478_v2  ;;  %v5114_v42 = vmul.f32 %v12381_v59, %v13519_v14  ;;  %v7059_v60 = vpack.c.bf16 %v7044_v61, %v13632_v41 }
 0x281   : > { %10228 = vmatprep.mubr.bf16.mxu0 %v5123_v18  ;;  %10241 = vmatpush3.bf16.msra.mxu0 %v11471_v47  ;;  %v11482_v47 = vld [vmem:[%s14447_s3 + $0xb8] sm:$0xff]   ;;  %v5124_v14 = vpack.c.bf16 %v5112_v35, %v13547_v51  ;;  %v7048_v35 = vmul.f32 %v14655_v57, %v13549_v37 }
 0x282   : > { %10242 = vmatprep.subr.bf16.mxu0 %v11473_v3  ;;  %v13782_v18 = vld [vmem:[#allocation3 + $0x109] sm:$0xff]  ;;  %v5125_v61 = vpack.c.bf16 %v5114_v42, %v13581_v12 }
 0x283   : > { %10507 = vmatpush3.bf16.msra.mxu1 %v11478_v2  ;;  %v11477_v2 = vld [vmem:[%s14447_s3 + $0xd8] sm:$0xff]   ;;  %v8335_v10 = vpack.c.bf16 %v13780_v56, %v13782_v18  ;;  %v7061_v37 = vpack.c.bf16 %v7048_v35, %v13611_v62 }
 0x284   : > { %10508 = vmatprep.subr.bf16.mxu1 %v11480_v49 }
 0x285   : > { %10243 = vmatpush3.bf16.msra.mxu0 %v11473_v3  ;;  %10493 = vmatmul.mubr.bf16.gmra.mrb[28].mxu1 %v6680_v9  ;;  %v7046_v9 = vmul.f32 %v14654_v24, %v13536_v32  ;;  %v11484_v3 = vld [vmem:[%s14447_s3 + $0xc0] sm:$0xff]   ;;  %v5118_v32 = vmul.f32 %v12466_v52, %v13534_v36 }
 0x286   : > { %10244 = vmatprep.subr.bf16.mxu0 %v11475_v34  ;;  %10512 = vmatprep.mubr.bf16.mxu1 %v7059_v60  ;;  %v5116_v60 = vmul.f32 %v12445_v40, %v13521_v29 }
 0x287   : > { %10509 = vmatpush3.bf16.msra.mxu1 %v11480_v49  ;;  %v11479_v49 = vld [vmem:[%s14447_s3 + $0xe0] sm:$0xff]   ;;  %v7060_v42 = vpack.c.bf16 %v7046_v9, %v13601_v1  ;;  %v5127_v36 = vpack.c.bf16 %v5118_v32, %v13599_v44  ;;  %v5120_v9 = vmul.f32 %v12594_v55, %v13567_v17  ;;  %v7054_v32 = vmul.f32 %v12445_v40, %v13636_v8 }
 0x288   : > { %10229 = vmatmul.mubr.bf16.gmra.mrb[20].mxu0 %v5124_v14  ;;  %10510 = vmatprep.subr.bf16.mxu1 %v11482_v47  ;;  %v5126_v29 = vpack.c.bf16 %v5116_v60, %v13583_v20  ;;  %v11481_v14 = vld [vmem:[%s14447_s3 + $0xe8] sm:$0xff]   ;;  %v11490_v60 = vld [vmem:[%s14447_s3 + $0xd8] sm:$0xff]  }
 0x289   : > { %10232 = vmatprep.mubr.bf16.mxu0 %v5125_v61  ;;  %10245 = vmatpush3.bf16.msra.mxu0 %v11475_v34  ;;  %v11486_v34 = vld [vmem:[%s14447_s3 + $0xc8] sm:$0xff]   ;;  %v7052_v61 = vmul.f32 %v12381_v59, %v13613_v48  ;;  %v5128_v17 = vpack.c.bf16 %v5120_v9, %v13634_v45 }
 0x28a   : > { %10246 = vmatprep.subr.bf16.mxu0 %v11477_v2  ;;  %v14697_v9 = vld [vmem:[#allocation15_spill] sm:$0xff] }
 0x28b   : > { %10511 = vmatpush3.bf16.msra.mxu1 %v11482_v47  ;;  %v7050_v47 = vmul.f32 %v12366_v7, %v13585_v6  ;;  %v5322_v6 = vmul.f32 %v11834_v28, %v13394_v54  ;;  %v7063_v48 = vpack.c.bf16 %v7052_v61, %v13688_v23  ;;  %v11494_v61 = vld [vmem:[%s14447_s3 + $0xe8] sm:$0xff]  }
 0x28c   : > { %10528 = vmatprep.subr.bf16.mxu1 %v11484_v3 }
 0x28d   : > { %10247 = vmatpush3.bf16.msra.mxu0 %v11477_v2  ;;  %v11488_v2 = vld [vmem:[%s14447_s3 + $0xd0] sm:$0xff]   ;;  %v7062_v35 = vpack.c.bf16 %v7050_v47, %v13647_v22  ;;  %v5338_v54 = vpack.c.bf16 %v13403_v38, %v5322_v6  ;;  %v14696_v47 = vld [vmem:[#allocation11_spill] sm:$0xff] }
 0x28e   : > { %10248 = vmatprep.subr.bf16.mxu0 %v11479_v49  ;;  %10513 = vmatmul.mubr.bf16.vlgmr.msra.gmra.mrb[16].mxu1 %v7060_v42  ;;  %v11492_v42 = vld [vmem:[%s14447_s3 + $0xe0] sm:$0xff]   ;;  %v11489_v6 = vld [vmem:[%s14447_s3 + $0x108] sm:$0xff]  }
 0x28f   : > { %10516 = vmatprep.mubr.bf16.mxu1 %v7061_v37  ;;  %10529 = vmatpush3.bf16.msra.mxu1 %v11484_v3  ;;  %v11483_v3 = vld [vmem:[%s14447_s3 + $0xf0] sm:$0xff]   ;;  %v14693_v37 = vld [vmem:[#allocation17_spill] sm:$0xff] }
 0x290   : > { %10233 = vmatmul.mubr.bf16.gmra.mrb[24].mxu0 %v5126_v29  ;;  %10530 = vmatprep.subr.bf16.mxu1 %v11486_v34  ;;  %v14694_v29 = vld [vmem:[#allocation10_spill] sm:$0xff] }
 0x291   : > { %10236 = vmatprep.mubr.bf16.mxu0 %v5127_v36  ;;  %10249 = vmatpush3.bf16.msra.mxu0 %v11479_v49  ;;  %v11485_v49 = vld [vmem:[%s14447_s3 + $0xf8] sm:$0xff]   ;;  %v5324_v38 = vmul.f32 %v14694_v29, %v14693_v37 }
 0x292   : > { %10250 = vmatprep.subr.bf16.mxu0 %v11481_v14  ;;  %v14695_v36 = vld [vmem:[#allocation21_spill] sm:$0xff] }
 0x293   : > { %10531 = vmatpush3.bf16.msra.mxu1 %v11486_v34  ;;  %v7056_v34 = vmul.f32 %v12466_v52, %v13649_v13  ;;  %v5326_v8 = vmul.f32 %v14696_v47, %v14695_v36  ;;  %v14702_v37 = vld [vmem:[#allocation13_spill] sm:$0xff]  ;;  %v14703_v36 = vld [vmem:[#allocation22_spill] sm:$0xff] }
 0x294   : > { %10532 = vmatprep.subr.bf16.mxu1 %v11488_v2 }
 0x295   : > { %10251 = vmatpush3.bf16.msra.mxu0 %v11481_v14  ;;  %v11487_v14 = vld [vmem:[%s14447_s3 + $0x100] sm:$0xff]   ;;  %v7065_v13 = vpack.c.bf16 %v7056_v34, %v13701_v30  ;;  %v14701_v34 = vld [vmem:[#allocation16_spill] sm:$0xff] }
 0x296   : > { %10252 = vmatprep.subr.bf16.mxu0 %v11483_v3  ;;  %10517 = vmatmul.mubr.bf16.gmra.mrb[20].mxu1 %v7062_v35  ;;  %v14698_v35 = vld [vmem:[#allocation26_spill] sm:$0xff] }
 0x297   : > { %10520 = vmatprep.mubr.bf16.mxu1 %v7063_v48  ;;  %10533 = vmatpush3.bf16.msra.mxu1 %v11488_v2  ;;  %v7064_v2 = vpack.c.bf16 %v7054_v32, %v13690_v19  ;;  %v14699_v48 = vld [vmem:[#allocation34_spill] sm:$0xff] }
 0x298   : > { %10237 = vmatmul.mubr.bf16.gmra.mrb[28].mxu0 %v5128_v17  ;;  %10534 = vmatprep.subr.bf16.mxu1 %v11490_v60  ;;  %v7058_v17 = vmul.f32 %v12594_v55, %v14699_v48  ;;  %v11493_v48 = vld [vmem:[%s14447_s3 + $0x118] sm:$0xff]  }
 0x299   : > { %10253 = vmatpush3.bf16.msra.mxu0 %v11483_v3  ;;  %10256 = vmatprep.mubr.bf16.mxu0 %v5338_v54  ;;  %v5339_v3 = vpack.c.bf16 %v14697_v9, %v5324_v38  ;;  %v14700_v54 = vld [vmem:[#allocation19_spill] sm:$0xff]  ;;  %v5328_v38 = vmul.f32 %v14702_v37, %v14701_v34  ;;  %v14705_v9 = vld [vmem:[#allocation29_spill] sm:$0xff] }
 0x29a   : > { %10254 = vmatprep.subr.bf16.mxu0 %v11485_v49  ;;  %v7260_v32 = vmul.f32 %v11834_v28, %v14700_v54  ;;  %v14707_v54 = vld [vmem:[#allocation28_spill] sm:$0xff]  ;;  %v14709_v34 = vld [vmem:[#allocation33_spill] sm:$0xff] }
 0x29b   : > { %10535 = vmatpush3.bf16.msra.mxu1 %v11490_v60  ;;  %v5340_v60 = vpack.c.bf16 %v14698_v35, %v5326_v8  ;;  %v14704_v8 = vld [vmem:[#allocation14_spill] sm:$0xff]  ;;  %v14706_v35 = vld [vmem:[#allocation31_spill] sm:$0xff] }
 0x29c   : > { %10536 = vmatprep.subr.bf16.mxu1 %v11492_v42 }
 0x29d   : > { %10255 = vmatpush3.bf16.msra.mxu0 %v11485_v49  ;;  %v11496_v49 = vld [vmem:[%s14447_s3 + $0xf0] sm:$0xff]  }
 0x29e   : > { %10272 = vmatprep.subr.bf16.mxu0 %v11487_v14  ;;  %10521 = vmatmul.mubr.bf16.gmra.mrb[24].mxu1 %v7064_v2  ;;  %v5330_v2 = vmul.f32 %v14704_v8, %v14703_v36  ;;  %v14710_v36 = vld [vmem:[#allocation43_spill] sm:$0xff] }
 0x29f   : > { %10524 = vmatprep.mubr.bf16.mxu1 %v7065_v13  ;;  %10537 = vmatpush3.bf16.msra.mxu1 %v11492_v42  ;;  %v11491_v42 = vld [vmem:[%s14447_s3 + $0x110] sm:$0xff]   ;;  %v7066_v13 = vpack.c.bf16 %v7058_v17, %v13711_v50  ;;  %v14708_v17 = vld [vmem:[#allocation37_spill] sm:$0xff] }
 0x2a0   : > { %10257 = vmatmul.mubr.bf16.vlgmr.msra.gmra.mrb[16].mxu0 %v5339_v3  ;;  %10538 = vmatprep.subr.bf16.mxu1 %v11494_v61  ;;  %v7276_v3 = vpack.c.bf16 %v14705_v9, %v7260_v32  ;;  %v7264_v32 = vmul.f32 %v14696_v47, %v14708_v17 }
 0x2a1   : > { %10260 = vmatprep.mubr.bf16.mxu0 %v5340_v60  ;;  %10273 = vmatpush3.bf16.msra.mxu0 %v11487_v14  ;;  %v11498_v14 = vld [vmem:[%s14447_s3 + $0xf8] sm:$0xff]   ;;  %v5341_v60 = vpack.c.bf16 %v14706_v35, %v5328_v38  ;;  %v5332_v38 = vmul.f32 %v14616_v21, %v14709_v34  ;;  %v11499_v34 = vld [vmem:[%s14447_s3 + $0x130] sm:$0xff]  }
 0x2a2   : > { %10274 = vmatprep.subr.bf16.mxu0 %v11489_v6 }
 0x2a3   : > { %10539 = vmatpush3.bf16.msra.mxu1 %v11494_v61  ;;  %v5342_v61 = vpack.c.bf16 %v14707_v54, %v5330_v2  ;;  %v5334_v2 = vmul.f32 %v12183_v58, %v14710_v36  ;;  %v14713_v54 = vld [vmem:[#allocation20_spill] sm:$0xff] }
 0x2a4   : > { %10540 = vmatprep.subr.bf16.mxu1 %v11496_v49  ;;  %v14716_v36 = vld [vmem:[#allocation24_spill] sm:$0xff] }
 0x2a5   : > { %10275 = vmatpush3.bf16.msra.mxu0 %v11489_v6  ;;  %v11500_v6 = vld [vmem:[%s14447_s3 + $0x100] sm:$0xff]  }
 0x2a6   : > { %10276 = vmatprep.subr.bf16.mxu0 %v11491_v42  ;;  %10525 = vmatmul.mubr.bf16.gmra.mrb[28].mxu1 %v7066_v13  ;;  %v14711_v13 = vld [vmem:[#allocation44_spill] sm:$0xff] }
 0x2a7   : > { %10541 = vmatpush3.bf16.msra.mxu1 %v11496_v49  ;;  %10544 = vmatprep.mubr.bf16.mxu1 %v7276_v3  ;;  %v11495_v49 = vld [vmem:[%s14447_s3 + $0x120] sm:$0xff]   ;;  %v7278_v9 = vpack.c.bf16 %v14711_v13, %v7264_v32  ;;  %v14712_v3 = vld [vmem:[#allocation39_spill] sm:$0xff]  ;;  %v7268_v32 = vmul.f32 %v14704_v8, %v13686_v53  ;;  %v11501_v53 = vld [vmem:[%s14447_s3 + $0x138] sm:$0xff]  }
 0x2a8   : > { %10261 = vmatmul.mubr.bf16.gmra.mrb[20].mxu0 %v5341_v60  ;;  %10542 = vmatprep.subr.bf16.mxu1 %v11498_v14  ;;  %v5343_v35 = vpack.c.bf16 %v14712_v3, %v5332_v38  ;;  %v11497_v60 = vld [vmem:[%s14447_s3 + $0x128] sm:$0xff]   ;;  %v14720_v3 = vld [vmem:[#allocation18_spill] sm:$0xff] }
 0x2a9   : > { %10264 = vmatprep.mubr.bf16.mxu0 %v5342_v61  ;;  %10277 = vmatpush3.bf16.msra.mxu0 %v11491_v42  ;;  %v11502_v42 = vld [vmem:[%s14447_s3 + $0x108] sm:$0xff]   ;;  %v7280_v38 = vpack.c.bf16 %v13719_v33, %v7268_v32  ;;  %v11508_v33 = vld [vmem:[%s14447_s3 + $0x120] sm:$0xff]  }
 0x2aa   : > { %10278 = vmatprep.subr.bf16.mxu0 %v11493_v48  ;;  %v14714_v61 = vld [vmem:[#allocation23_spill] sm:$0xff] }
 0x2ab   : > { %10543 = vmatpush3.bf16.msra.mxu1 %v11498_v14  ;;  %v14715_v17 = vpack.c.bf16 %v14713_v54, %v14714_v61  ;;  %v5344_v14 = vpack.c.bf16 %v13669_v15, %v5334_v2  ;;  %v5524_v15 = vld [vmem:[#allocation3 + $0x20] sm:$0xff]  ;;  %v14717_v2 = vld [vmem:[#allocation30_spill] sm:$0xff] }
 0x2ac   : > { %10560 = vmatprep.subr.bf16.mxu1 %v11500_v6  ;;  %v14718_v13 = vpack.c.bf16 %v14716_v36, %v14717_v2  ;;  %v11503_v54 = vld [vmem:[%s14447_s3 + $0x140] sm:$0xff]   ;;  %v7462_v36 = vld [vmem:[#allocation3 + $0xa0] sm:$0xff] }
 0x2ad   : > { %10279 = vmatpush3.bf16.msra.mxu0 %v11493_v48  ;;  %v11504_v48 = vld [vmem:[%s14447_s3 + $0x110] sm:$0xff]   ;;  %v5526_v61 = vld [vmem:[#allocation3 + $0x30] sm:$0xff] }
 0x2ae   : > { %10280 = vmatprep.subr.bf16.mxu0 %v11495_v49  ;;  %10545 = vmatmul.mubr.bf16.vlgmr.msra.gmra.mrb[16].mxu1 %v14715_v17  ;;  %v5528_v17 = vld [vmem:[#allocation3 + $0x40] sm:$0xff]  ;;  %v5530_v2 = vld [vmem:[#allocation3 + $0x50] sm:$0xff] }
 0x2af   : > { %10548 = vmatprep.mubr.bf16.mxu1 %v7278_v9  ;;  %10561 = vmatpush3.bf16.msra.mxu1 %v11500_v6  ;;  %v11506_v6 = vld [vmem:[%s14447_s3 + $0x118] sm:$0xff]  }
 0x2b0   : > { %10265 = vmatmul.mubr.bf16.gmra.mrb[24].mxu0 %v5343_v35  ;;  %10562 = vmatprep.subr.bf16.mxu1 %v11502_v42  ;;  %v14719_v9 = vld [vmem:[#allocation25_spill] sm:$0xff] }
 0x2b1   : > { %10268 = vmatprep.mubr.bf16.mxu0 %v5344_v14  ;;  %10281 = vmatpush3.bf16.msra.mxu0 %v11495_v49  ;;  %v5523_v49 = vld [vmem:[#allocation3 + $0x18] sm:$0xff]  ;;  %v14721_v35 = vpack.c.bf16 %v14719_v9, %v14720_v3  ;;  %v11514_v9 = vld [vmem:[%s14447_s3 + $0x138] sm:$0xff]  }
 0x2b2   : > { %10282 = vmatprep.subr.bf16.mxu0 %v11497_v60  ;;  %v11510_v14 = vld [vmem:[%s14447_s3 + $0x128] sm:$0xff]   ;;  %v5529_v3 = vld [vmem:[#allocation3 + $0x48] sm:$0xff] }
 0x2b3   : > { %10563 = vmatpush3.bf16.msra.mxu1 %v11502_v42  ;;  %v5539_v42 = vpack.c.bf16 %v5524_v15, %v5523_v49  ;;  %v11505_v15 = vld [vmem:[%s14447_s3 + $0x148] sm:$0xff]  }
 0x2b4   : > { %10564 = vmatprep.subr.bf16.mxu1 %v11504_v48 }
 0x2b5   : > { %10283 = vmatpush3.bf16.msra.mxu0 %v11497_v60  ;;  %v7272_v60 = vmul.f32 %v12183_v58, %v13744_v46  ;;  %v5527_v46 = vld [vmem:[#allocation3 + $0x38] sm:$0xff] }
 0x2b6   : > { %10284 = vmatprep.subr.bf16.mxu0 %v11499_v34  ;;  %10549 = vmatmul.mubr.bf16.gmra.mrb[20].mxu1 %v14718_v13  ;;  %v13952_v49 = vpack.c.bf16 %v5528_v17, %v5527_v46  ;;  %v5532_v13 = vld [vmem:[#allocation3 + $0x60] sm:$0xff]  ;;  %v11516_v17 = vld [vmem:[%s14447_s3 + $0x140] sm:$0xff]  }
 0x2b7   : > { %10552 = vmatprep.mubr.bf16.mxu1 %v7280_v38  ;;  %10565 = vmatpush3.bf16.msra.mxu1 %v11504_v48  ;;  %v5525_v48 = vld [vmem:[#allocation3 + $0x28] sm:$0xff]  ;;  %v7282_v32 = vpack.c.bf16 %v13757_v39, %v7272_v60  ;;  %v7274_v39 = vmul.f32 %v14624_v27, %v13726_v11  ;;  %v7461_v11 = vld [vmem:[#allocation3 + $0x98] sm:$0xff]  ;;  %v5534_v46 = vld [vmem:[#allocation3 + $0x70] sm:$0xff] }
 0x2b8   : > { %10269 = vmatmul.mubr.bf16.gmra.mrb[28].mxu0 %v14721_v35  ;;  %10566 = vmatprep.subr.bf16.mxu1 %v11506_v6  ;;  %v13968_v35 = vpack.c.bf16 %v7462_v36, %v7461_v11  ;;  %v5531_v60 = vld [vmem:[#allocation3 + $0x58] sm:$0xff] }
 0x2b9   : > { %10285 = vmatpush3.bf16.msra.mxu0 %v11499_v34  ;;  %10288 = vmatprep.mubr.bf16.mxu0 %v5539_v42  ;;  %v13944_v34 = vpack.c.bf16 %v5526_v61, %v5525_v48  ;;  %v7283_v42 = vpack.c.bf16 %v13746_v43, %v7274_v39  ;;  %v13975_v61 = vpack.c.bf16 %v5532_v13, %v5531_v60  ;;  %v11511_v48 = vld [vmem:[%s14447_s3 + $0x160] sm:$0xff]   ;;  %v7465_v39 = vld [vmem:[#allocation3 + $0xb8] sm:$0xff]  ;;  %v11515_v60 = vld [vmem:[%s14447_s3 + $0x170] sm:$0xff]  }
 0x2ba   : > { %10286 = vmatprep.subr.bf16.mxu0 %v11501_v53  ;;  %v5535_v13 = vld [vmem:[#allocation3 + $0x78] sm:$0xff] }
 0x2bb   : > { %10567 = vmatpush3.bf16.msra.mxu1 %v11506_v6  ;;  %v14722_v6 = vld [vmem:[#allocation27_spill] sm:$0xff] }
 0x2bc   : > { %10568 = vmatprep.subr.bf16.mxu1 %v11508_v33  ;;  %v14723_v38 = vpack.c.bf16 %v13483_v31, %v14722_v6  ;;  %v11507_v31 = vld [vmem:[%s14447_s3 + $0x150] sm:$0xff]  }
 0x2bd   : > { %10287 = vmatpush3.bf16.msra.mxu0 %v11501_v53  ;;  %v11512_v53 = vld [vmem:[%s14447_s3 + $0x130] sm:$0xff]  }
 0x2be   : > { %10304 = vmatprep.subr.bf16.mxu0 %v11503_v54  ;;  %10553 = vmatmul.mubr.bf16.gmra.mrb[24].mxu1 %v14723_v38  ;;  %v5536_v6 = vld [vmem:[#allocation3 + $0x80] sm:$0xff] }
 0x2bf   : > { %10556 = vmatprep.mubr.bf16.mxu1 %v7282_v32  ;;  %10569 = vmatpush3.bf16.msra.mxu1 %v11508_v33  ;;  %v13970_v33 = vpack.c.bf16 %v5530_v2, %v5529_v3  ;;  %v7466_v32 = vld [vmem:[#allocation3 + $0xc0] sm:$0xff]  ;;  %v13999_v11 = vpack.c.bf16 %v5536_v6, %v5535_v13  ;;  %v7468_v3 = vld [vmem:[#allocation3 + $0xd0] sm:$0xff]  ;;  %v14724_v13 = vld [vmem:[#allocation35_spill] sm:$0xff] }
 0x2c0   : > { %10289 = vmatmul.mubr.bf16.vlgmr.msra.gmra.mrb[16].mxu0 %v13944_v34  ;;  %10570 = vmatprep.subr.bf16.mxu1 %v11510_v14  ;;  %v13991_v36 = vpack.c.bf16 %v7466_v32, %v7465_v39 }
 0x2c1   : > { %10292 = vmatprep.mubr.bf16.mxu0 %v13952_v49  ;;  %10305 = vmatpush3.bf16.msra.mxu0 %v11503_v54  ;;  %v11509_v54 = vld [vmem:[%s14447_s3 + $0x158] sm:$0xff]  }
 0x2c2   : > { %10306 = vmatprep.subr.bf16.mxu0 %v11505_v15 }
 0x2c3   : > { %10571 = vmatpush3.bf16.msra.mxu1 %v11510_v14  ;;  %v7464_v14 = vld [vmem:[#allocation3 + $0xb0] sm:$0xff] }
 0x2c4   : > { %10572 = vmatprep.subr.bf16.mxu1 %v11512_v53 }
 0x2c5   : > { %10307 = vmatpush3.bf16.msra.mxu0 %v11505_v15  ;;  %v7463_v15 = vld [vmem:[#allocation3 + $0xa8] sm:$0xff] }
 0x2c6   : > { %10308 = vmatprep.subr.bf16.mxu0 %v11507_v31  ;;  %10557 = vmatmul.mubr.bf16.gmra.mrb[28].mxu1 %v7283_v42  ;;  %v13986_v38 = vpack.c.bf16 %v7464_v14, %v7463_v15  ;;  %v11513_v42 = vld [vmem:[%s14447_s3 + $0x168] sm:$0xff]   ;;  %v5538_v14 = vld [vmem:[#allocation3 + $0x90] sm:$0xff]  ;;  %v11522_v15 = vld [vmem:[%s14447_s3 + $0x158] sm:$0xff]  }
 0x2c7   : > { %10573 = vmatpush3.bf16.msra.mxu1 %v11512_v53  ;;  %10576 = vmatprep.mubr.bf16.mxu1 %v13968_v35  ;;  %v11518_v53 = vld [vmem:[%s14447_s3 + $0x148] sm:$0xff]  }
 0x2c8   : > { %10293 = vmatmul.mubr.bf16.gmra.mrb[20].mxu0 %v13970_v33  ;;  %10574 = vmatprep.subr.bf16.mxu1 %v11514_v9 }
 0x2c9   : > { %10296 = vmatprep.mubr.bf16.mxu0 %v13975_v61  ;;  %10309 = vmatpush3.bf16.msra.mxu0 %v11507_v31  ;;  %v5533_v31 = vld [vmem:[#allocation3 + $0x68] sm:$0xff] }
 0x2ca   : > { %10310 = vmatprep.subr.bf16.mxu0 %v11509_v54  ;;  %v13993_v2 = vpack.c.bf16 %v5534_v46, %v5533_v31  ;;  %v7469_v46 = vld [vmem:[#allocation3 + $0xd8] sm:$0xff]  ;;  %v11524_v31 = vld [vmem:[%s14447_s3 + $0x160] sm:$0xff]  }
 0x2cb   : > { %10575 = vmatpush3.bf16.msra.mxu1 %v11514_v9  ;;  %v11520_v9 = vld [vmem:[%s14447_s3 + $0x150] sm:$0xff]  }
 0x2cc   : > { %10592 = vmatprep.subr.bf16.mxu1 %v11516_v17 }
 0x2cd   : > { %10311 = vmatpush3.bf16.msra.mxu0 %v11509_v54  ;;  %v7470_v54 = vld [vmem:[#allocation3 + $0xe0] sm:$0xff] }
 0x2ce   : > { %10312 = vmatprep.subr.bf16.mxu0 %v11511_v48  ;;  %10577 = vmatmul.mubr.bf16.vlgmr.msra.gmra.mrb[16].mxu1 %v13986_v38  ;;  %v14015_v6 = vpack.c.bf16 %v7470_v54, %v7469_v46  ;;  %v11519_v54 = vld [vmem:[%s14447_s3 + $0x180] sm:$0xff]   ;;  %v7473_v46 = vld [vmem:[#allocation3 + $0xf8] sm:$0xff] }
 0x2cf   : > { %10580 = vmatprep.mubr.bf16.mxu1 %v13991_v36  ;;  %10593 = vmatpush3.bf16.msra.mxu1 %v11516_v17  ;;  %v7467_v17 = vld [vmem:[#allocation3 + $0xc8] sm:$0xff] }
 0x2d0   : > { %10297 = vmatmul.mubr.bf16.gmra.mrb[24].mxu0 %v13993_v2  ;;  %10594 = vmatprep.subr.bf16.mxu1 %v11518_v53  ;;  %v14010_v32 = vpack.c.bf16 %v7468_v3, %v7467_v17  ;;  %v7472_v3 = vld [vmem:[#allocation3 + $0xf0] sm:$0xff] }
 0x2d1   : > { %10300 = vmatprep.mubr.bf16.mxu0 %v13999_v11  ;;  %10313 = vmatpush3.bf16.msra.mxu0 %v11511_v48  ;;  %v5537_v48 = vld [vmem:[#allocation3 + $0x88] sm:$0xff] }
 0x2d2   : > { %10314 = vmatprep.subr.bf16.mxu0 %v11513_v42  ;;  %v14017_v39 = vpack.c.bf16 %v5538_v14, %v5537_v48  ;;  %v7474_v14 = vld [vmem:[#allocation3 + $0x100] sm:$0xff]  ;;  %v11521_v48 = vld [vmem:[%s14447_s3 + $0x188] sm:$0xff]  }
 0x2d3   : > { %10595 = vmatpush3.bf16.msra.mxu1 %v11518_v53  ;;  %v11517_v53 = vld [vmem:[%s14447_s3 + $0x178] sm:$0xff]  }
 0x2d4   : > { %10596 = vmatprep.subr.bf16.mxu1 %v11520_v9 }
 0x2d5   : > { %10315 = vmatpush3.bf16.msra.mxu0 %v11513_v42  ;;  %v14725_v42 = vpack.c.bf16 %v14724_v13, %v13515_v16  ;;  %v14039_v16 = vpack.c.bf16 %v7474_v14, %v7473_v46  ;;  %v7476_v14 = vld [vmem:[#allocation3 + $0x110] sm:$0xff]  ;;  %v11530_v46 = vld [vmem:[%s14447_s3 + $0x178] sm:$0xff]  }
 0x2d6   : > { %10316 = vmatprep.subr.bf16.mxu0 %v11515_v60  ;;  %10581 = vmatmul.mubr.bf16.gmra.mrb[20].mxu1 %v14010_v32 }
 0x2d7   : > { %10584 = vmatprep.mubr.bf16.mxu1 %v14015_v6  ;;  %10597 = vmatpush3.bf16.msra.mxu1 %v11520_v9  ;;  %v7471_v9 = vld [vmem:[#allocation3 + $0xe8] sm:$0xff] }
 0x2d8   : > { %10301 = vmatmul.mubr.bf16.gmra.mrb[28].mxu0 %v14017_v39  ;;  %10598 = vmatprep.subr.bf16.mxu1 %v11522_v15  ;;  %v14034_v17 = vpack.c.bf16 %v7472_v3, %v7471_v9  ;;  %v7475_v9 = vld [vmem:[#allocation3 + $0x108] sm:$0xff] }
 0x2d9   : > { %10317 = vmatpush3.bf16.msra.mxu0 %v11515_v60  ;;  %10320 = vmatprep.mubr.bf16.mxu0 %v14725_v42  ;;  %v11526_v60 = vld [vmem:[%s14447_s3 + $0x168] sm:$0xff]   ;;  %v14728_v42 = vld [vmem:[#allocation38_spill] sm:$0xff] }
 0x2da   : > { %10318 = vmatprep.subr.bf16.mxu0 %v11517_v53  ;;  %v14729_v3 = vpack.c.bf16 %v14728_v42, %v13547_v51  ;;  %v11525_v51 = vld [vmem:[%s14447_s3 + $0x198] sm:$0xff]   ;;  %v14734_v42 = vld [vmem:[#allocation42_spill] sm:$0xff] }
 0x2db   : > { %10599 = vmatpush3.bf16.msra.mxu1 %v11522_v15  ;;  %v14726_v15 = vld [vmem:[#allocation12_spill] sm:$0xff] }
 0x2dc   : > { %10600 = vmatprep.subr.bf16.mxu1 %v11524_v31  ;;  %v14727_v13 = vpack.c.bf16 %v14726_v15, %v13517_v63  ;;  %v14058_v63 = vpack.c.bf16 %v7476_v14, %v7475_v9  ;;  %v14732_v15 = vld [vmem:[#allocation40_spill] sm:$0xff] }
 0x2dd   : > { %10319 = vmatpush3.bf16.msra.mxu0 %v11517_v53  ;;  %v11528_v53 = vld [vmem:[%s14447_s3 + $0x170] sm:$0xff]  }
 0x2de   : > { %10336 = vmatprep.subr.bf16.mxu0 %v11519_v54  ;;  %10585 = vmatmul.mubr.bf16.gmra.mrb[24].mxu1 %v14034_v17 }
 0x2df   : > { %10588 = vmatprep.mubr.bf16.mxu1 %v14039_v16  ;;  %10601 = vmatpush3.bf16.msra.mxu1 %v11524_v31  ;;  %v11523_v31 = vld [vmem:[%s14447_s3 + $0x190] sm:$0xff]  }
 0x2e0   : > { %10321 = vmatmul.mubr.bf16.vlgmr.msra.gmra.mrb[16].mxu0 %v14727_v13  ;;  %10602 = vmatprep.subr.bf16.mxu1 %v11526_v60  ;;  %v14733_v13 = vpack.c.bf16 %v14732_v15, %v13581_v12  ;;  %v11534_v12 = vld [vmem:[%s14447_s3 + $0x188] sm:$0xff]   ;;  %v14742_v15 = vld [vmem:[#allocation45_spill] sm:$0xff] }
 0x2e1   : > { %10324 = vmatprep.mubr.bf16.mxu0 %v14729_v3  ;;  %10337 = vmatpush3.bf16.msra.mxu0 %v11519_v54  ;;  %v14730_v54 = vld [vmem:[#allocation46_spill] sm:$0xff]  ;;  %v14735_v3 = vpack.c.bf16 %v14734_v42, %v13583_v20  ;;  %v14736_v20 = vld [vmem:[#allocation47_spill] sm:$0xff]  ;;  %v14744_v42 = vpack.c.bf16 %v13679_v5, %v13688_v23 }
 0x2e2   : > { %10338 = vmatprep.subr.bf16.mxu0 %v11521_v48  ;;  %v14737_v14 = vpack.c.bf16 %v14736_v20, %v13611_v62  ;;  %v11531_v62 = vld [vmem:[%s14447_s3 + $0x1b0] sm:$0xff]   ;;  %v11535_v23 = vld [vmem:[%s14447_s3 + $0x1c0] sm:$0xff]  }
 0x2e3   : > { %10603 = vmatpush3.bf16.msra.mxu1 %v11526_v60  ;;  %v14731_v60 = vpack.c.bf16 %v14730_v54, %v13601_v1  ;;  %v11527_v1 = vld [vmem:[%s14447_s3 + $0x1a0] sm:$0xff]   ;;  %v14745_v20 = vld [vmem:[#allocation36_spill] sm:$0xff] }
 0x2e4   : > { %10604 = vmatprep.subr.bf16.mxu1 %v11528_v53 }
 0x2e5   : > { %10339 = vmatpush3.bf16.msra.mxu0 %v11521_v48  ;;  %v11532_v48 = vld [vmem:[%s14447_s3 + $0x180] sm:$0xff]  }
 0x2e6   : > { %10340 = vmatprep.subr.bf16.mxu0 %v11523_v31  ;;  %10589 = vmatmul.mubr.bf16.gmra.mrb[28].mxu1 %v14058_v63 }
 0x2e7   : > { %10605 = vmatpush3.bf16.msra.mxu1 %v11528_v53  ;;  %10608 = vmatprep.mubr.bf16.mxu1 %v14731_v60  ;;  %v11529_v53 = vld [vmem:[%s14447_s3 + $0x1a8] sm:$0xff]   ;;  %v5941_v60 = vld [vmem:[#allocation3 + $0x27] sm:$0xff] }
 0x2e8   : > { %10325 = vmatmul.mubr.bf16.gmra.mrb[20].mxu0 %v14733_v13  ;;  %10606 = vmatprep.subr.bf16.mxu1 %v11530_v46  ;;  %v14743_v13 = vpack.c.bf16 %v14742_v15, %v13634_v45  ;;  %v11533_v45 = vld [vmem:[%s14447_s3 + $0x1b8] sm:$0xff]   ;;  %v14749_v15 = vpack.c.bf16 %v13694_v26, %v13701_v30 }
 0x2e9   : > { %10328 = vmatprep.mubr.bf16.mxu0 %v14735_v3  ;;  %10341 = vmatpush3.bf16.msra.mxu0 %v11523_v31  ;;  %v14738_v31 = vld [vmem:[#allocation32_spill] sm:$0xff] }
 0x2ea   : > { %10342 = vmatprep.subr.bf16.mxu0 %v11525_v51  ;;  %v14739_v9 = vpack.c.bf16 %v14738_v31, %v13647_v22  ;;  %v5957_v22 = vmul.f32 %v11834_v28, %v5941_v60  ;;  %v5945_v31 = vld [vmem:[#allocation3 + $0x47] sm:$0xff]  ;;  %v5946_v60 = vld [vmem:[#allocation3 + $0x4f] sm:$0xff] }
 0x2eb   : > { %10607 = vmatpush3.bf16.msra.mxu1 %v11530_v46  ;;  %v14740_v46 = vld [vmem:[#allocation41_spill] sm:$0xff] }
 0x2ec   : > { %10624 = vmatprep.subr.bf16.mxu1 %v11532_v48  ;;  %v14741_v54 = vpack.c.bf16 %v14740_v46, %v13599_v44  ;;  %v11538_v44 = vld [vmem:[%s14447_s3 + $0x198] sm:$0xff]   ;;  %v5961_v46 = vmul.f32 %v14696_v47, %v5945_v31 }
 0x2ed   : > { %10343 = vmatpush3.bf16.msra.mxu0 %v11525_v51  ;;  %v11536_v51 = vld [vmem:[%s14447_s3 + $0x190] sm:$0xff]   ;;  %v11541_v31 = vld [vmem:[%s14447_s3 + $0x1d8] sm:$0xff]  }
 0x2ee   : > { %10344 = vmatprep.subr.bf16.mxu0 %v11527_v1  ;;  %10609 = vmatmul.mubr.bf16.vlgmr.msra.gmra.mrb[16].mxu1 %v14737_v14  ;;  %v14747_v14 = vld [vmem:[#allocation48_spill] sm:$0xff] }
 0x2ef   : > { %10612 = vmatprep.mubr.bf16.mxu1 %v14739_v9  ;;  %10625 = vmatpush3.bf16.msra.mxu1 %v11532_v48  ;;  %v5942_v48 = vld [vmem:[#allocation3 + $0x2f] sm:$0xff] }
 0x2f0   : > { %10329 = vmatmul.mubr.bf16.gmra.mrb[24].mxu0 %v14741_v54  ;;  %10626 = vmatprep.subr.bf16.mxu1 %v11534_v12  ;;  %v5973_v3 = vpack.c.bf16 %v5942_v48, %v5957_v22  ;;  %v11540_v9 = vld [vmem:[%s14447_s3 + $0x1a0] sm:$0xff]   ;;  %v5949_v48 = vld [vmem:[#allocation3 + $0x67] sm:$0xff] }
 0x2f1   : > { %10332 = vmatprep.mubr.bf16.mxu0 %v14743_v13  ;;  %10345 = vmatpush3.bf16.msra.mxu0 %v11527_v1  ;;  %v5943_v1 = vld [vmem:[#allocation3 + $0x37] sm:$0xff]  ;;  %v7879_v13 = vld [vmem:[#allocation3 + $0xa7] sm:$0xff] }
 0x2f2   : > { %10346 = vmatprep.subr.bf16.mxu0 %v11529_v53  ;;  %v5959_v5 = vmul.f32 %v14694_v29, %v5943_v1  ;;  %v5947_v22 = vld [vmem:[#allocation3 + $0x57] sm:$0xff]  ;;  %v7895_v26 = vmul.f32 %v11834_v28, %v7879_v13  ;;  %v7880_v1 = vld [vmem:[#allocation3 + $0xaf] sm:$0xff]  ;;  %v5952_v13 = vld [vmem:[#allocation3 + $0x7f] sm:$0xff] }
 0x2f3   : > { %10627 = vmatpush3.bf16.msra.mxu1 %v11534_v12  ;;  %v14746_v12 = vpack.c.bf16 %v14745_v20, %v13690_v19  ;;  %v5944_v19 = vld [vmem:[#allocation3 + $0x3f] sm:$0xff]  ;;  %v5963_v30 = vmul.f32 %v14702_v37, %v5947_v22  ;;  %v11546_v20 = vld [vmem:[%s14447_s3 + $0x1b8] sm:$0xff]  }
 0x2f4   : > { %10628 = vmatprep.subr.bf16.mxu1 %v11536_v51  ;;  %v5974_v54 = vpack.c.bf16 %v5944_v19, %v5959_v5  ;;  %v7911_v28 = vpack.c.bf16 %v7880_v1, %v7895_v26  ;;  %v5953_v19 = vld [vmem:[#allocation3 + $0x87] sm:$0xff]  ;;  %v7884_v22 = vld [vmem:[#allocation3 + $0xcf] sm:$0xff]  ;;  %v11545_v26 = vld [vmem:[%s14447_s3 + $0x1e8] sm:$0xff]  }
 0x2f5   : > { %10347 = vmatpush3.bf16.msra.mxu0 %v11529_v53  ;;  %v14748_v53 = vpack.c.bf16 %v14747_v14, %v13632_v41  ;;  %v11542_v41 = vld [vmem:[%s14447_s3 + $0x1a8] sm:$0xff]  }
 0x2f6   : > { %10348 = vmatprep.subr.bf16.mxu0 %v11531_v62  ;;  %10613 = vmatmul.mubr.bf16.gmra.mrb[20].mxu1 %v14744_v42  ;;  %v11544_v42 = vld [vmem:[%s14447_s3 + $0x1b0] sm:$0xff]  }
 0x2f7   : > { %10616 = vmatprep.mubr.bf16.mxu1 %v14746_v12  ;;  %10629 = vmatpush3.bf16.msra.mxu1 %v11536_v51  ;;  %v11537_v51 = vld [vmem:[%s14447_s3 + $0x1c8] sm:$0xff]  }
 0x2f8   : > { %10333 = vmatmul.mubr.bf16.gmra.mrb[28].mxu0 %v14748_v53  ;;  %10630 = vmatprep.subr.bf16.mxu1 %v11538_v44  ;;  %v7881_v12 = vld [vmem:[#allocation3 + $0xb7] sm:$0xff]  ;;  %v5950_v53 = vld [vmem:[#allocation3 + $0x6f] sm:$0xff] }
 0x2f9   : > { %10349 = vmatpush3.bf16.msra.mxu0 %v11531_v62  ;;  %10352 = vmatprep.mubr.bf16.mxu0 %v5973_v3  ;;  %v5975_v62 = vpack.c.bf16 %v5946_v60, %v5961_v46  ;;  %v5965_v3 = vmul.f32 %v14704_v8, %v5949_v48  ;;  %v7897_v46 = vmul.f32 %v14694_v29, %v7881_v12  ;;  %v7885_v48 = vld [vmem:[#allocation3 + $0xd7] sm:$0xff] }
 0x2fa   : > { %10350 = vmatprep.subr.bf16.mxu0 %v11533_v45 }
 0x2fb   : > { %10631 = vmatpush3.bf16.msra.mxu1 %v11538_v44  ;;  %v14750_v44 = vpack.c.bf16 %v13698_v4, %v13711_v50  ;;  %v11539_v50 = vld [vmem:[%s14447_s3 + $0x1d0] sm:$0xff]   ;;  %v5977_v5 = vpack.c.bf16 %v5950_v53, %v5965_v3 }
 0x2fc   : > { %10632 = vmatprep.subr.bf16.mxu1 %v11540_v9  ;;  %v5948_v4 = vld [vmem:[#allocation3 + $0x5f] sm:$0xff] }
 0x2fd   : > { %10351 = vmatpush3.bf16.msra.mxu0 %v11533_v45  ;;  %v7693_v45 = vmul.f32 %v12594_v55, %v13764_v25  ;;  %v5976_v14 = vpack.c.bf16 %v5948_v4, %v5963_v30  ;;  %v7901_v4 = vmul.f32 %v14702_v37, %v7885_v48  ;;  %v11552_v3 = vld [vmem:[%s14447_s3 + $0x1d0] sm:$0xff]   ;;  %v7888_v37 = vld [vmem:[#allocation3 + $0xef] sm:$0xff] }
 0x2fe   : > { %10368 = vmatprep.subr.bf16.mxu0 %v11535_v23  ;;  %10617 = vmatmul.mubr.bf16.gmra.mrb[24].mxu1 %v14749_v15  ;;  %v11543_v15 = vld [vmem:[%s14447_s3 + $0x1e0] sm:$0xff]   ;;  %v5956_v53 = vld [vmem:[#allocation3 + $0x9f] sm:$0xff] }
 0x2ff   : > { %10620 = vmatprep.mubr.bf16.mxu1 %v14750_v44  ;;  %10633 = vmatpush3.bf16.msra.mxu1 %v11540_v9  ;;  %v7701_v25 = vpack.c.bf16 %v7693_v45, %v13782_v18  ;;  %v7883_v9 = vld [vmem:[#allocation3 + $0xc7] sm:$0xff]  ;;  %v11550_v44 = vld [vmem:[%s14447_s3 + $0x1c8] sm:$0xff]  }
 0x300   : > { %10353 = vmatmul.mubr.bf16.vlgmr.msra.gmra.mrb[16].mxu0 %v5974_v54  ;;  %10634 = vmatprep.subr.bf16.mxu1 %v11542_v41  ;;  %v7882_v54 = vld [vmem:[#allocation3 + $0xbf] sm:$0xff]  ;;  %v7899_v60 = vmul.f32 %v14696_v47, %v7883_v9  ;;  %v7889_v9 = vld [vmem:[#allocation3 + $0xf7] sm:$0xff] }
 0x301   : > { %10356 = vmatprep.mubr.bf16.mxu0 %v5975_v62  ;;  %10369 = vmatpush3.bf16.msra.mxu0 %v11535_v23  ;;  %v5951_v23 = vld [vmem:[#allocation3 + $0x77] sm:$0xff]  ;;  %v5969_v62 = vmul.f32 %v12183_v58, %v5953_v19  ;;  %v7912_v29 = vpack.c.bf16 %v7882_v54, %v7897_v46  ;;  %v7887_v58 = vld [vmem:[#allocation3 + $0xe7] sm:$0xff]  ;;  %v7890_v46 = vld [vmem:[#allocation3 + $0xff] sm:$0xff] }
 0x302   : > { %10370 = vmatprep.subr.bf16.mxu0 %v11537_v51  ;;  %v7913_v47 = vpack.c.bf16 %v7884_v22, %v7899_v60  ;;  %v7903_v1 = vmul.f32 %v14704_v8, %v7887_v58  ;;  %v11556_v19 = vld [vmem:[%s14447_s3 + $0x1e0] sm:$0xff]   ;;  %v11563_v48 = vld [vmem:[%s14447_s3 + $0x230] sm:$0xff]  }
 0x303   : > { %10635 = vmatpush3.bf16.msra.mxu1 %v11542_v41  ;;  %v11548_v41 = vld [vmem:[%s14447_s3 + $0x1c0] sm:$0xff]  }
 0x304   : > { %10636 = vmatprep.subr.bf16.mxu1 %v11544_v42  ;;  %v7893_v60 = vld [vmem:[#allocation3 + $0x117] sm:$0xff] }
 0x305   : > { %10371 = vmatpush3.bf16.msra.mxu0 %v11537_v51  ;;  %v5967_v51 = vmul.f32 %v14616_v21, %v5951_v23  ;;  %v7905_v23 = vmul.f32 %v14616_v21, %v7889_v9  ;;  %v11558_v21 = vld [vmem:[%s14447_s3 + $0x1e8] sm:$0xff]   ;;  %v11569_v58 = vld [vmem:[%s14447_s3 + $0x220] sm:$0xff]  }
 0x306   : > { %10372 = vmatprep.subr.bf16.mxu0 %v11539_v50  ;;  %10621 = vmatmul.mubr.bf16.gmra.mrb[28].mxu1 %v7701_v25  ;;  %v7886_v25 = vld [vmem:[#allocation3 + $0xdf] sm:$0xff] }
 0x307   : > { %10637 = vmatpush3.bf16.msra.mxu1 %v11544_v42  ;;  %10640 = vmatprep.mubr.bf16.mxu1 %v7911_v28  ;;  %v5978_v45 = vpack.c.bf16 %v5952_v13, %v5967_v51  ;;  %v5954_v42 = vld [vmem:[#allocation3 + $0x8f] sm:$0xff]  ;;  %v11547_v28 = vld [vmem:[%s14447_s3 + $0x1f0] sm:$0xff]   ;;  %v7914_v12 = vpack.c.bf16 %v7886_v25, %v7901_v4  ;;  %v7916_v54 = vpack.c.bf16 %v7890_v46, %v7905_v23 }
 0x308   : > { %10357 = vmatmul.mubr.bf16.gmra.mrb[20].mxu0 %v5976_v14  ;;  %10638 = vmatprep.subr.bf16.mxu1 %v11546_v20  ;;  %v5979_v30 = vpack.c.bf16 %v5954_v42, %v5969_v62  ;;  %v11554_v14 = vld [vmem:[%s14447_s3 + $0x1d8] sm:$0xff]   ;;  %v7909_v13 = vmul.f32 %v14624_v27, %v7893_v60  ;;  %v11560_v62 = vld [vmem:[%s14447_s3 + $0x1f0] sm:$0xff]  }
 0x309   : > { %10360 = vmatprep.mubr.bf16.mxu0 %v5977_v5  ;;  %10373 = vmatpush3.bf16.msra.mxu0 %v11539_v50  ;;  %v5955_v50 = vld [vmem:[#allocation3 + $0x97] sm:$0xff]  ;;  %v11549_v5 = vld [vmem:[%s14447_s3 + $0x1f8] sm:$0xff]  }
 0x30a   : > { %10374 = vmatprep.subr.bf16.mxu0 %v11541_v31  ;;  %v14751_v51 = vld [vmem:[#allocation49_spill] sm:$0xff]  ;;  %v6365_v9 = vld [vmem:[#allocation3 + $0x59] sm:$0xff] }
 0x30b   : > { %10639 = vmatpush3.bf16.msra.mxu1 %v11546_v20  ;;  %v5971_v20 = vmul.f32 %v14624_v27, %v5955_v50  ;;  %v11562_v27 = vld [vmem:[%s14447_s3 + $0x1f8] sm:$0xff]  }
 0x30c   : > { %10656 = vmatprep.subr.bf16.mxu1 %v11548_v41  ;;  %v6362_v42 = vld [vmem:[#allocation3 + $0x41] sm:$0xff]  ;;  %v6363_v4 = vld [vmem:[#allocation3 + $0x49] sm:$0xff] }
 0x30d   : > { %10375 = vmatpush3.bf16.msra.mxu0 %v11541_v31  ;;  %v7915_v31 = vpack.c.bf16 %v7888_v37, %v7903_v1  ;;  %v5980_v8 = vpack.c.bf16 %v5956_v53, %v5971_v20  ;;  %v6366_v1 = vld [vmem:[#allocation3 + $0x61] sm:$0xff]  ;;  %v6368_v20 = vld [vmem:[#allocation3 + $0x71] sm:$0xff] }
 0x30e   : > { %10376 = vmatprep.subr.bf16.mxu0 %v11543_v15  ;;  %10641 = vmatmul.mubr.bf16.vlgmr.msra.gmra.mrb[16].mxu1 %v7912_v29  ;;  %v7894_v29 = vld [vmem:[#allocation3 + $0x11f] sm:$0xff]  ;;  %v6382_v37 = vmul.f32 %v12366_v7, %v6366_v1  ;;  %v6384_v53 = vmul.f32 %v12381_v59, %v6368_v20 }
 0x30f   : > { %10644 = vmatprep.mubr.bf16.mxu1 %v7913_v47  ;;  %10657 = vmatpush3.bf16.msra.mxu1 %v11548_v41  ;;  %v11551_v41 = vld [vmem:[%s14447_s3 + $0x200] sm:$0xff]   ;;  %v7918_v22 = vpack.c.bf16 %v7894_v29, %v7909_v13  ;;  %v11567_v47 = vld [vmem:[%s14447_s3 + $0x210] sm:$0xff]  }
 0x310   : > { %10361 = vmatmul.mubr.bf16.gmra.mrb[24].mxu0 %v5978_v45  ;;  %10658 = vmatprep.subr.bf16.mxu1 %v11550_v44  ;;  %v6394_v23 = vpack.c.bf16 %v6382_v37, %v6365_v9  ;;  %v6369_v29 = vld [vmem:[#allocation3 + $0x79] sm:$0xff] }
 0x311   : > { %10364 = vmatprep.mubr.bf16.mxu0 %v5979_v30  ;;  %10377 = vmatpush3.bf16.msra.mxu0 %v11543_v15  ;;  %v14752_v15 = vpack.c.bf16 %v13746_v43, %v14751_v51  ;;  %v11555_v43 = vld [vmem:[%s14447_s3 + $0x210] sm:$0xff]   ;;  %v6378_v30 = vmul.f32 %v14654_v24, %v6362_v42 }
 0x312   : > { %10378 = vmatprep.subr.bf16.mxu0 %v11545_v26 }
 0x313   : > { %10659 = vmatpush3.bf16.msra.mxu1 %v11550_v44  ;;  %v11559_v44 = vld [vmem:[%s14447_s3 + $0x220] sm:$0xff]  }
 0x314   : > { %10660 = vmatprep.subr.bf16.mxu1 %v11552_v3 }
 0x315   : > { %10379 = vmatpush3.bf16.msra.mxu0 %v11545_v26  ;;  %v6364_v26 = vld [vmem:[#allocation3 + $0x51] sm:$0xff] }
 0x316   : > { %10380 = vmatprep.subr.bf16.mxu0 %v11547_v28  ;;  %10645 = vmatmul.mubr.bf16.gmra.mrb[20].mxu1 %v7914_v12 }
 0x317   : > { %10648 = vmatprep.mubr.bf16.mxu1 %v7915_v31  ;;  %10661 = vmatpush3.bf16.msra.mxu1 %v11552_v3  ;;  %v8298_v3 = vld [vmem:[#allocation3 + $0xb1] sm:$0xff]  ;;  %v11572_v31 = vld [vmem:[%s14447_s3 + $0x238] sm:$0xff]  }
 0x318   : > { %10365 = vmatmul.mubr.bf16.gmra.mrb[28].mxu0 %v5980_v8  ;;  %10662 = vmatprep.subr.bf16.mxu1 %v11554_v14  ;;  %v8314_v12 = vmul.f32 %v14653_v0, %v8298_v3 }
 0x319   : > { %10381 = vmatpush3.bf16.msra.mxu0 %v11547_v28  ;;  %10384 = vmatprep.mubr.bf16.mxu0 %v13944_v34  ;;  %v11553_v34 = vld [vmem:[%s14447_s3 + $0x208] sm:$0xff]   ;;  %v11571_v28 = vld [vmem:[%s14447_s3 + $0x230] sm:$0xff]  }
 0x31a   : > { %10382 = vmatprep.subr.bf16.mxu0 %v11549_v5 }
 0x31b   : > { %10663 = vmatpush3.bf16.msra.mxu1 %v11554_v14  ;;  %v11575_v14 = vld [vmem:[#allocation2 + $0x8] sm:$0xff] }
 0x31c   : > { %10664 = vmatprep.subr.bf16.mxu1 %v11556_v19 }
 0x31d   : > { %10383 = vmatpush3.bf16.msra.mxu0 %v11549_v5  ;;  %v8300_v5 = vld [vmem:[#allocation3 + $0xc1] sm:$0xff] }
 0x31e   : > { %10400 = vmatprep.subr.bf16.mxu0 %v11551_v41  ;;  %10649 = vmatmul.mubr.bf16.gmra.mrb[24].mxu1 %v7916_v54  ;;  %v6372_v54 = vld [vmem:[#allocation3 + $0x91] sm:$0xff] }
 0x31f   : > { %10652 = vmatprep.mubr.bf16.mxu1 %v14752_v15  ;;  %10665 = vmatpush3.bf16.msra.mxu1 %v11556_v19  ;;  %v6367_v19 = vld [vmem:[#allocation3 + $0x69] sm:$0xff]  ;;  %v6388_v51 = vmul.f32 %v12466_v52, %v6372_v54  ;;  %v8299_v15 = vld [vmem:[#allocation3 + $0xb9] sm:$0xff] }
 0x320   : > { %10385 = vmatmul.mubr.bf16.vlgmr.msra.gmra.mrb[16].mxu0 %v13952_v49  ;;  %10666 = vmatprep.subr.bf16.mxu1 %v11558_v21  ;;  %v11557_v49 = vld [vmem:[%s14447_s3 + $0x218] sm:$0xff]   ;;  %v6395_v46 = vpack.c.bf16 %v6384_v53, %v6367_v19 }
 0x321   : > { %10388 = vmatprep.mubr.bf16.mxu0 %v13970_v33  ;;  %10401 = vmatpush3.bf16.msra.mxu0 %v11551_v41  ;;  %v11564_v33 = vld [vmem:[%s14447_s3 + $0x200] sm:$0xff]   ;;  %v6370_v41 = vld [vmem:[#allocation3 + $0x81] sm:$0xff] }
 0x322   : > { %10402 = vmatprep.subr.bf16.mxu0 %v11553_v34 }
 0x323   : > { %10667 = vmatpush3.bf16.msra.mxu1 %v11558_v21  ;;  %v8316_v21 = vmul.f32 %v14654_v24, %v8300_v5  ;;  %v6374_v24 = vld [vmem:[#allocation3 + $0xa1] sm:$0xff] }
 0x324   : > { %10668 = vmatprep.subr.bf16.mxu1 %v11560_v62 }
 0x325   : > { %10403 = vmatpush3.bf16.msra.mxu0 %v11553_v34  ;;  %v6386_v34 = vmul.f32 %v12445_v40, %v6370_v41  ;;  %v8330_v13 = vpack.c.bf16 %v8316_v21, %v8299_v15 }
 0x326   : > { %10404 = vmatprep.subr.bf16.mxu0 %v11555_v43  ;;  %10653 = vmatmul.mubr.bf16.gmra.mrb[28].mxu1 %v7918_v22  ;;  %v8304_v22 = vld [vmem:[#allocation3 + $0xe1] sm:$0xff] }
 0x327   : > { %10669 = vmatpush3.bf16.msra.mxu1 %v11560_v62  ;;  %10672 = vmatprep.mubr.bf16.mxu1 %v13986_v38  ;;  %v11566_v38 = vld [vmem:[%s14447_s3 + $0x208] sm:$0xff]   ;;  %v8301_v62 = vld [vmem:[#allocation3 + $0xc9] sm:$0xff] }
 0x328   : > { %10389 = vmatmul.mubr.bf16.gmra.mrb[20].mxu0 %v13975_v61  ;;  %10670 = vmatprep.subr.bf16.mxu1 %v11562_v27  ;;  %v11561_v61 = vld [vmem:[%s14447_s3 + $0x228] sm:$0xff]  }
 0x329   : > { %10392 = vmatprep.mubr.bf16.mxu0 %v13993_v2  ;;  %10405 = vmatpush3.bf16.msra.mxu0 %v11555_v43  ;;  %v6360_v2 = vld [vmem:[#allocation3 + $0x31] sm:$0xff] }
 0x32a   : > { %10406 = vmatprep.subr.bf16.mxu0 %v11557_v49 }
 0x32b   : > { %10671 = vmatpush3.bf16.msra.mxu1 %v11562_v27  ;;  %v6396_v27 = vpack.c.bf16 %v6386_v34, %v6369_v29  ;;  %v8532_v34 = vld [vmem:[%s11806_s14 + $0x90] sm:$0xff] }
 0x32c   : > { %10688 = vmatprep.subr.bf16.mxu1 %v11564_v33  ;;  %v6603_v29 = vld [vmem:[%s11806_s14 + $0x50] sm:$0xff] }
 0x32d   : > { %10407 = vmatpush3.bf16.msra.mxu0 %v11557_v49  ;;  %v6371_v49 = vld [vmem:[#allocation3 + $0x89] sm:$0xff] }
 0x32e   : > { %10408 = vmatprep.subr.bf16.mxu0 %v11559_v44  ;;  %10673 = vmatmul.mubr.bf16.vlgmr.msra.gmra.mrb[16].mxu1 %v13991_v36  ;;  %v6376_v36 = vmul.f32 %v14653_v0, %v6360_v2  ;;  %v8302_v0 = vld [vmem:[#allocation3 + $0xd1] sm:$0xff] }
 0x32f   : > { %10676 = vmatprep.mubr.bf16.mxu1 %v14010_v32  ;;  %10689 = vmatpush3.bf16.msra.mxu1 %v11564_v33  ;;  %v6359_v32 = vld [vmem:[#allocation3 + $0x29] sm:$0xff]  ;;  %v8318_v60 = vmul.f32 %v14655_v57, %v8302_v0  ;;  %v8306_v33 = vld [vmem:[#allocation3 + $0xf1] sm:$0xff] }
 0x330   : > { %10393 = vmatmul.mubr.bf16.gmra.mrb[24].mxu0 %v13999_v11  ;;  %10690 = vmatprep.subr.bf16.mxu1 %v11566_v38  ;;  %v11568_v11 = vld [vmem:[%s14447_s3 + $0x218] sm:$0xff]   ;;  %v6391_v45 = vpack.c.bf16 %v6376_v36, %v6359_v32  ;;  %v8322_v52 = vmul.f32 %v12381_v59, %v8306_v33  ;;  %v6598_v0 = vld [vmem:[%s11806_s14 + $0x28] sm:$0xff] }
 0x331   : > { %10396 = vmatprep.mubr.bf16.mxu0 %v14017_v39  ;;  %10409 = vmatpush3.bf16.msra.mxu0 %v11559_v44  ;;  %v11565_v39 = vld [vmem:[%s14447_s3 + $0x238] sm:$0xff]   ;;  %v8331_v43 = vpack.c.bf16 %v8318_v60, %v8301_v62  ;;  %v6397_v44 = vpack.c.bf16 %v6388_v51, %v6371_v49 }
 0x332   : > { %10410 = vmatprep.subr.bf16.mxu0 %v11561_v61 }
 0x333   : > { %10691 = vmatpush3.bf16.msra.mxu1 %v11566_v38  ;;  %v6390_v38 = vmul.f32 %v12594_v55, %v6374_v24 }
 0x334   : > { %10692 = vmatprep.subr.bf16.mxu1 %v11567_v47 }
 0x335   : > { %10411 = vmatpush3.bf16.msra.mxu0 %v11561_v61  ;;  %v8303_v61 = vld [vmem:[#allocation3 + $0xd9] sm:$0xff] }
 0x336   : > { %10412 = vmatprep.subr.bf16.mxu0 %v11563_v48  ;;  %10677 = vmatmul.mubr.bf16.gmra.mrb[20].mxu1 %v14015_v6  ;;  %v6380_v6 = vmul.f32 %v14655_v57, %v6364_v26  ;;  %v8320_v57 = vmul.f32 %v12366_v7, %v8304_v22  ;;  %v8311_v26 = vld [vmem:[#allocation3 + $0x119] sm:$0xff] }
 0x337   : > { %10680 = vmatprep.mubr.bf16.mxu1 %v14034_v17  ;;  %10693 = vmatpush3.bf16.msra.mxu1 %v11567_v47  ;;  %v11570_v17 = vld [vmem:[%s14447_s3 + $0x228] sm:$0xff]   ;;  %v8305_v47 = vld [vmem:[#allocation3 + $0xe9] sm:$0xff] }
 0x338   : > { %10397 = vmatmul.mubr.bf16.gmra.mrb[28].mxu0 %v13968_v35  ;;  %10694 = vmatprep.subr.bf16.mxu1 %v11568_v11  ;;  %v6361_v35 = vld [vmem:[#allocation3 + $0x39] sm:$0xff]  ;;  %v6393_v25 = vpack.c.bf16 %v6380_v6, %v6363_v4  ;;  %v8332_v2 = vpack.c.bf16 %v8320_v57, %v8303_v61  ;;  %v8333_v36 = vpack.c.bf16 %v8322_v52, %v8305_v47  ;;  %v6604_v47 = vld [vmem:[%s11806_s14 + $0x58] sm:$0xff] }
 0x339   : > { %10413 = vmatpush3.bf16.msra.mxu0 %v11563_v48  ;;  %10416 = vmatprep.mubr.bf16.mxu0 %v6391_v45  ;;  %v6392_v50 = vpack.c.bf16 %v6378_v30, %v6361_v35  ;;  %v6373_v48 = vld [vmem:[#allocation3 + $0x99] sm:$0xff]  ;;  %v8312_v45 = vld [vmem:[#allocation3 + $0x121] sm:$0xff]  ;;  %v14290_v30 = vstv %s8680_s23  ;;  %v6593_v35 = vld [vmem:[%s11806_s14] sm:$0xff] }
 0x33a   : > { %10414 = vmatprep.subr.bf16.mxu0 %v11565_v39  ;;  %v6398_v32 = vpack.c.bf16 %v6390_v38, %v6373_v48  ;;  %v8328_v42 = vmul.f32 %v12594_v55, %v8312_v45  ;;  %v6595_v6 = vld [vmem:[%s11806_s14 + $0x10] sm:$0xff]  ;;  %v8531_v38 = vld [vmem:[%s11806_s14 + $0x88] sm:$0xff] }
 0x33b   : > { %10695 = vmatpush3.bf16.msra.mxu1 %v11568_v11  ;;  %v8308_v11 = vld [vmem:[#allocation3 + $0x101] sm:$0xff] }
 0x33c   : > { %10696 = vmatprep.subr.bf16.mxu1 %v11569_v58  ;;  %v8324_v7 = vmul.f32 %v12445_v40, %v8308_v11 }
 0x33d   : > { %10415 = vmatpush3.bf16.msra.mxu0 %v11565_v39  ;;  %v8307_v39 = vld [vmem:[#allocation3 + $0xf9] sm:$0xff] }
 0x33e   : > { %10681 = vmatmul.mubr.bf16.gmra.mrb[24].mxu1 %v14039_v16  ;;  %v8119_v16 = vpack.c.bf16 %v11575_v14, %v11575_v14  ;;  %v8334_v59 = vpack.c.bf16 %v8324_v7, %v8307_v39  ;;  %v6599_v14 = vld [vmem:[%s11806_s14 + $0x30] sm:$0xff]  ;;  %v6602_v39 = vld [vmem:[%s11806_s14 + $0x48] sm:$0xff] }
 0x33f   : > { %10684 = vmatprep.mubr.bf16.mxu1 %v14058_v63  ;;  %10697 = vmatpush3.bf16.msra.mxu1 %v11569_v58  ;;  %v8297_v63 = vld [vmem:[#allocation3 + $0xa9] sm:$0xff]  ;;  %v8336_v58 = vpack.c.bf16 %v8328_v42, %v8311_v26 }
 0x340   : > { %10417 = vmatmul.mubr.bf16.vlgmr.msra.gmra.mrb[16].mxu0 %v6392_v50  ;;  %10698 = vmatprep.subr.bf16.mxu1 %v11570_v17  ;;  %v8329_v8 = vpack.c.bf16 %v8314_v12, %v8297_v63  ;;  %v6597_v63 = vld [vmem:[%s11806_s14 + $0x20] sm:$0xff] }
 0x341   : > { %10420 = vmatprep.mubr.bf16.mxu0 %v6393_v25  ;;  %v6594_v25 = vld [vmem:[%s11806_s14 + $0x8] sm:$0xff] }
 0x343   : > { %10699 = vmatpush3.bf16.msra.mxu1 %v11570_v17 }
 0x344   : > { %10700 = vmatprep.subr.bf16.mxu1 %v11571_v28 }
 0x346   : > { %10685 = vmatmul.mubr.bf16.gmra.mrb[28].mxu1 %v8119_v16 }
 0x347   : > { %10701 = vmatpush3.bf16.msra.mxu1 %v11571_v28  ;;  %10704 = vmatprep.mubr.bf16.mxu1 %v8329_v8  ;;  %v6600_v8 = vld [vmem:[%s11806_s14 + $0x38] sm:$0xff] }
 0x348   : > { %10421 = vmatmul.mubr.bf16.gmra.mrb[20].mxu0 %v6394_v23  ;;  %10702 = vmatprep.subr.bf16.mxu1 %v11572_v31 }
 0x349   : > { %10424 = vmatprep.mubr.bf16.mxu0 %v6395_v46 }
 0x34b   : > { %10703 = vmatpush3.bf16.msra.mxu1 %v11572_v31 }
 0x34e   : > { %10705 = vmatmul.mubr.bf16.vlgmr.msra.gmra.mrb[16].mxu1 %v8330_v13  ;;  %v8530_v13 = vld [vmem:[%s11806_s14 + $0x80] sm:$0xff] }
 0x34f   : > { %10708 = vmatprep.mubr.bf16.mxu1 %v8331_v43 }
 0x350   : > { %10425 = vmatmul.mubr.bf16.gmra.mrb[24].mxu0 %v6396_v27  ;;  %v8533_v27 = vld [vmem:[%s11806_s14 + $0x98] sm:$0xff] }
 0x351   : > { %10428 = vmatprep.mubr.bf16.mxu0 %v6397_v44  ;;  %v6601_v44 = vld [vmem:[%s11806_s14 + $0x40] sm:$0xff] }
 0x356   : > { %10709 = vmatmul.mubr.bf16.gmra.mrb[20].mxu1 %v8332_v2 }
 0x357   : > { %10712 = vmatprep.mubr.bf16.mxu1 %v8333_v36 }
 0x358   : > { %10429 = vmatmul.mubr.bf16.gmra.mrb[28].mxu0 %v6398_v32 }
 0x35e   : > { %10713 = vmatmul.mubr.bf16.gmra.mrb[24].mxu1 %v8334_v59 }
 0x35f   : > { %10716 = vmatprep.mubr.bf16.mxu1 %v8335_v10  ;;  %v6596_v10 = vld [vmem:[%s11806_s14 + $0x18] sm:$0xff] }
 0x366   : > { %10717 = vmatmul.mubr.bf16.gmra.mrb[28].mxu1 %v8336_v58 }
 0x413   : > { %v10418_v40 = vpop.f32.mrb[16].mxu0 }
 0x414   : > { %v6579_v17 = vmul.f32 %v10418_v40, %v14290_v30  ;;  %v6497_v55 = vpop.f32.mrb[17].mxu0 }
 0x415   : > { %v6577_v56 = vmul.f32 %v14290_v30, %v6497_v55  ;;  %v10419_v18 = vpop.f32.mrb[18].mxu0 }
 0x416   : > { %v6611_v50 = vadd.f32 %v6595_v6, %v6579_v17  ;;  %v6580_v4 = vmul.f32 %v10419_v18, %v14290_v30  ;;  %v6500_v3 = vpop.f32.mrb[19].mxu0  ;;  %v8536_v17 = vld [vmem:[%s11806_s14 + $0xb0] sm:$0xff] }
 0x417   : > { %v6609_v1 = vadd.f32 %v6593_v35, %v6577_v56  ;;  %v6578_v20 = vmul.f32 %v14290_v30, %v6500_v3  ;;  %v8534_v56 = vld [vmem:[%s11806_s14 + $0xa0] sm:$0xff]  ;;  %v8537_v3 = vld [vmem:[%s11806_s14 + $0xb8] sm:$0xff] }
 0x418   : > { %6627 = vst [vmem:[%s14302_s29 + $0x10] sm:$0xff] %v6611_v50  ;;  %v6612_v28 = vadd.f32 %v6596_v10, %v6580_v4  ;;  %v6607_v10 = vld [vmem:[%s11806_s14 + $0x70] sm:$0xff] }
 0x419   : > { %6625 = vst [vmem:[%s14302_s29] sm:$0xff] %v6609_v1  ;;  %v6610_v12 = vadd.f32 %v6594_v25, %v6578_v20  ;;  %v6605_v20 = vld [vmem:[%s11806_s14 + $0x60] sm:$0xff] }
 0x41a   : > { %6628 = vst [vmem:[%s14302_s29 + $0x18] sm:$0xff] %v6612_v28 }
 0x41b   : > { %6626 = vst [vmem:[%s14302_s29 + $0x8] sm:$0xff] %v6610_v12  ;;  %v10422_v37 = vpop.f32.mrb[20].mxu0 }
 0x41c   : > { %v6583_v16 = vmul.f32 %v10422_v37, %v14290_v30  ;;  %v6513_v53 = vpop.f32.mrb[21].mxu0 }
 0x41d   : > { %v6581_v31 = vmul.f32 %v14290_v30, %v6513_v53  ;;  %v10423_v9 = vpop.f32.mrb[22].mxu0 }
 0x41e   : > { %v6615_v5 = vadd.f32 %v6599_v14, %v6583_v16  ;;  %v6584_v23 = vmul.f32 %v10423_v9, %v14290_v30  ;;  %v6516_v19 = vpop.f32.mrb[23].mxu0  ;;  %v8535_v14 = vld [vmem:[%s11806_s14 + $0xa8] sm:$0xff] }
 0x41f   : > { %v6613_v46 = vadd.f32 %v6597_v63, %v6581_v31  ;;  %v6582_v41 = vmul.f32 %v14290_v30, %v6516_v19  ;;  %v6608_v63 = vld [vmem:[%s11806_s14 + $0x78] sm:$0xff]  ;;  %v6606_v19 = vld [vmem:[%s11806_s14 + $0x68] sm:$0xff] }
 0x420   : > { %6631 = vst [vmem:[%s14302_s29 + $0x30] sm:$0xff] %v6615_v5  ;;  %v6616_v54 = vadd.f32 %v6600_v8, %v6584_v23 }
 0x421   : > { %6629 = vst [vmem:[%s14302_s29 + $0x20] sm:$0xff] %v6613_v46  ;;  %v6614_v21 = vadd.f32 %v6598_v0, %v6582_v41  ;;  %v10706_v60 = vpop.f32.mrb[16].mxu1 }
 0x422   : > { %6632 = vst [vmem:[%s14302_s29 + $0x38] sm:$0xff] %v6616_v54  ;;  %v8516_v51 = vmul.f32 %v10706_v60, %v14290_v30  ;;  %v8435_v15 = vpop.f32.mrb[17].mxu1 }
 0x423   : > { %6630 = vst [vmem:[%s14302_s29 + $0x28] sm:$0xff] %v6614_v21  ;;  %v10426_v62 = vpop.f32.mrb[24].mxu0  ;;  %v8514_v43 = vmul.f32 %v8435_v15, %v14290_v30  ;;  %v10707_v22 = vpop.f32.mrb[18].mxu1 }
 0x424   : > { %v6587_v49 = vmul.f32 %v10426_v62, %v14290_v30  ;;  %v6529_v33 = vpop.f32.mrb[25].mxu0  ;;  %v8548_v24 = vadd.f32 %v8532_v34, %v8516_v51  ;;  %v8517_v57 = vmul.f32 %v10707_v22, %v14290_v30  ;;  %v8438_v52 = vpop.f32.mrb[19].mxu1  ;;  %v8540_v51 = vld [vmem:[%s11806_s14 + $0xd0] sm:$0xff]  ;;  %v8538_v62 = vld [vmem:[%s11806_s14 + $0xc0] sm:$0xff]  ;;  %v8541_v22 = vld [vmem:[%s11806_s14 + $0xd8] sm:$0xff] }
 0x425   : > { %v6585_v61 = vmul.f32 %v14290_v30, %v6529_v33  ;;  %v10427_v2 = vpop.f32.mrb[26].mxu0  ;;  %v8546_v48 = vadd.f32 %v8530_v13, %v8514_v43  ;;  %v8515_v36 = vmul.f32 %v8438_v52, %v14290_v30 }
 0x426   : > { %v6619_v11 = vadd.f32 %v6603_v29, %v6587_v49  ;;  %v6588_v32 = vmul.f32 %v10427_v2, %v14290_v30  ;;  %v6532_v7 = vpop.f32.mrb[27].mxu0  ;;  %8564 = vst [vmem:[%s14302_s29 + $0x90] sm:$0xff] %v8548_v24  ;;  %v8549_v45 = vadd.f32 %v8533_v27, %v8517_v57  ;;  %v8544_v2 = vld [vmem:[%s11806_s14 + $0xf0] sm:$0xff] }
 0x427   : > { %v6617_v59 = vadd.f32 %v6601_v44, %v6585_v61  ;;  %v6586_v42 = vmul.f32 %v14290_v30, %v6532_v7  ;;  %8562 = vst [vmem:[%s14302_s29 + $0x80] sm:$0xff] %v8546_v48  ;;  %v8547_v26 = vadd.f32 %v8531_v38, %v8515_v36  ;;  %v8539_v44 = vld [vmem:[%s11806_s14 + $0xc8] sm:$0xff]  ;;  %v8542_v36 = vld [vmem:[%s11806_s14 + $0xe0] sm:$0xff]  ;;  %v8545_v7 = vld [vmem:[%s11806_s14 + $0xf8] sm:$0xff] }
 0x428   : > { %6635 = vst [vmem:[%s14302_s29 + $0x50] sm:$0xff] %v6619_v11  ;;  %v6620_v58 = vadd.f32 %v6604_v47, %v6588_v32  ;;  %8565 = vst [vmem:[%s14302_s29 + $0x98] sm:$0xff] %v8549_v45 }
 0x429   : > { %6633 = vst [vmem:[%s14302_s29 + $0x40] sm:$0xff] %v6617_v59  ;;  %v6618_v40 = vadd.f32 %v6602_v39, %v6586_v42  ;;  %8563 = vst [vmem:[%s14302_s29 + $0x88] sm:$0xff] %v8547_v26  ;;  %v10710_v6 = vpop.f32.mrb[20].mxu1  ;;  %v8543_v42 = vld [vmem:[%s11806_s14 + $0xe8] sm:$0xff]  ;;  %s11591_s14 = scalar_lea.vmem %s14396_s5, 4096 }
 0x42a   : > { %6636 = vst [vmem:[%s14302_s29 + $0x58] sm:$0xff] %v6620_v58  ;;  %v8520_v55 = vmul.f32 %v10710_v6, %v14290_v30  ;;  %v8451_v35 = vpop.f32.mrb[21].mxu1  ;;  %p11592_p10 = scmp.ne.s32.totalorder %s14396_s5, %s11591_s14  ;;  %p11599_p0 = scmp.lt.s32.totalorder %s11597_s11, %s11591_s14 }
 0x42b   : > { %6634 = vst [vmem:[%s14302_s29 + $0x48] sm:$0xff] %v6618_v40  ;;  %v10430_v18 = vpop.f32.mrb[28].mxu0  ;;  %v8518_v50 = vmul.f32 %v8451_v35, %v14290_v30  ;;  %v10711_v4 = vpop.f32.mrb[22].mxu1 }
 0x42c   : > { %v6591_v25 = vmul.f32 %v10430_v18, %v14290_v30  ;;  %v6545_v1 = vpop.f32.mrb[29].mxu0  ;;  %v8552_v28 = vadd.f32 %v8536_v17, %v8520_v55  ;;  %v8521_v12 = vmul.f32 %v10711_v4, %v14290_v30  ;;  %v8454_v37 = vpop.f32.mrb[23].mxu1  ;;  %p11593_p11 = pnand %p11592_p10, %p11728_p5  ;;  %p11600_p1 = por %p11599_p0, %p11598_p13 }
 0x42d   : > { %v6589_v16 = vmul.f32 %v14290_v30, %v6545_v1  ;;  %v10431_v53 = vpop.f32.mrb[30].mxu0  ;;  %v8550_v31 = vadd.f32 %v8534_v56, %v8518_v50  ;;  %v8519_v9 = vmul.f32 %v8454_v37, %v14290_v30 }
 0x42e   : > { %v6623_v8 = vadd.f32 %v6607_v10, %v6591_v25  ;;  %v6592_v5 = vmul.f32 %v10431_v53, %v14290_v30  ;;  %v6548_v23 = vpop.f32.mrb[31].mxu0  ;;  %8568 = vst [vmem:[%s14302_s29 + $0xb0] sm:$0xff] %v8552_v28  ;;  %v8553_v0 = vadd.f32 %v8537_v3, %v8521_v12  ;;  %p11594_p12 = pneg %p11593_p11 }
 0x42f   : > { %v6621_v46 = vadd.f32 %v6605_v20, %v6589_v16  ;;  %v6590_v41 = vmul.f32 %v14290_v30, %v6548_v23  ;;  %8566 = vst [vmem:[%s14302_s29 + $0xa0] sm:$0xff] %v8550_v31  ;;  %v8551_v54 = vadd.f32 %v8535_v14, %v8519_v9 }
 0x430   : > { %6639 = vst [vmem:[%s14302_s29 + $0x70] sm:$0xff] %v6623_v8  ;;  %v6624_v21 = vadd.f32 %v6608_v63, %v6592_v5  ;;  %8569 = vst [vmem:[%s14302_s29 + $0xb8] sm:$0xff] %v8553_v0  ;;  %p11601_p2 = pnand %p11600_p1, %p11594_p12 }
 0x431   : > { %6637 = vst [vmem:[%s14302_s29 + $0x60] sm:$0xff] %v6621_v46  ;;  %v6622_v60 = vadd.f32 %v6606_v19, %v6590_v41  ;;  %8567 = vst [vmem:[%s14302_s29 + $0xa8] sm:$0xff] %v8551_v54  ;;  %v10714_v34 = vpop.f32.mrb[24].mxu1 }
 0x432   : > { %6640 = vst [vmem:[%s14302_s29 + $0x78] sm:$0xff] %v6624_v21  ;;  %v8524_v15 = vmul.f32 %v10714_v34, %v14290_v30  ;;  %v8467_v13 = vpop.f32.mrb[25].mxu1 }
 0x433   : > { %6638 = vst [vmem:[%s14302_s29 + $0x68] sm:$0xff] %v6622_v60  ;;  %v8522_v29 = vmul.f32 %v8467_v13, %v14290_v30  ;;  %v10715_v43 = vpop.f32.mrb[26].mxu1 }
 0x434   : > { %v8556_v27 = vadd.f32 %v8540_v51, %v8524_v15  ;;  %v8525_v49 = vmul.f32 %v10715_v43, %v14290_v30  ;;  %v8470_v33 = vpop.f32.mrb[27].mxu1 }
 0x435   : > { %v8554_v24 = vadd.f32 %v8538_v62, %v8522_v29  ;;  %v8523_v57 = vmul.f32 %v8470_v33, %v14290_v30 }
 0x436   : > { %8572 = vst [vmem:[%s14302_s29 + $0xd0] sm:$0xff] %v8556_v27  ;;  %v8557_v52 = vadd.f32 %v8541_v22, %v8525_v49 }
 0x437   : > { %8570 = vst [vmem:[%s14302_s29 + $0xc0] sm:$0xff] %v8554_v24  ;;  %v8555_v38 = vadd.f32 %v8539_v44, %v8523_v57 }
 0x438   : > { %8573 = vst [vmem:[%s14302_s29 + $0xd8] sm:$0xff] %v8557_v52 }
 0x439   : > { %8571 = vst [vmem:[%s14302_s29 + $0xc8] sm:$0xff] %v8555_v38  ;;  %v10718_v61 = vpop.f32.mrb[28].mxu1 }
 0x43a   : > { %v8528_v47 = vmul.f32 %v10718_v61, %v14290_v30  ;;  %v8483_v48 = vpop.f32.mrb[29].mxu1 }
 0x43b   : > { %v8526_v11 = vmul.f32 %v8483_v48, %v14290_v30  ;;  %v10719_v32 = vpop.f32.mrb[30].mxu1 }
 0x43c   : > { %v8560_v39 = vadd.f32 %v8544_v2, %v8528_v47  ;;  %v8529_v45 = vmul.f32 %v10719_v32, %v14290_v30  ;;  %v8486_v59 = vpop.f32.mrb[31].mxu1 }
 0x43d   : > { %v8558_v26 = vadd.f32 %v8542_v36, %v8526_v11  ;;  %v8527_v58 = vmul.f32 %v8486_v59, %v14290_v30 }
 0x43e   : > { %8576 = vst [vmem:[%s14302_s29 + $0xf0] sm:$0xff] %v8560_v39  ;;  %v8561_v40 = vadd.f32 %v8545_v7, %v8529_v45 }
 0x43f   : > { %8574 = vst [vmem:[%s14302_s29 + $0xe0] sm:$0xff] %v8558_v26  ;;  %v8559_v6 = vadd.f32 %v8543_v42, %v8527_v58 }
 0x440   : > { %8577 = vst [vmem:[%s14302_s29 + $0xf8] sm:$0xff] %v8561_v40 }
 0x441   : > { %8575 = vst [vmem:[%s14302_s29 + $0xe8] sm:$0xff] %v8559_v6 }
 0x442   : > { %11604 = shalt.err (!%p11601_p2)
}
 0x443   : > { %s11605_s12 = scalar_lea.hbm %s14394_s8, 4096  ;;  %s11609_s22 = scalar_lea.hbm %s14448_s4, 8192 }
 0x444   : > { %p11606_p3 = scmp.ne.s32.totalorder %s14394_s8, %s11605_s12  ;;  %p11610_p8 = scmp.lt.u32.totalorder %s14394_s8, %s14448_s4 }
 0x445   : > { %p11611_p9 = scmp.lt.u32.totalorder %s11609_s22, %s11605_s12  ;;  %p11613_p11 = scmp.lt.u32.totalorder %s11605_s12, %s14394_s8 }
 0x446   : > { %p11607_p4 = pnand %p11606_p3, %p11728_p5 }
 0x447   : > { %p11612_p10 = por %p11611_p9, %p11610_p8 }
 0x448   : > { %p11608_p7 = pneg %p11607_p4 }
 0x449   : > { %p11614_p12 = por %p11613_p11, %p11612_p10 }
 0x44b   : > { %p11615_p13 = pnand %p11614_p12, %p11608_p7 }
 0x44d   : > { %11618 = shalt.err (!%p11615_p13)
}
 0x44e   : > { %s11663_s28 = smov 128   ;;  %s11664_s29 = smov 8  }
 0x44f   : > { %11236 = dma.vmem_to_hbm [thread:$0]  (%p11728_p5), %s14396_s5, 4096, %s14394_s8, %s14403_s19, %s11663_s28, %s11663_s28, %s11664_s29  }
 0x450 PF: > { %p11248_p0 = scmp.ge.s32.totalorder %s11657_s18, 2  ;;  %s8607_s30 = sand.u32 1, %s11645_s15  }
 0x451   : > { %s8608_s6 = scalar_lea.sflag [#allocation5], %s8607_s30 }
 0x452   : > { %p11243_p1 = pnand %p11248_p0, %p11732_p6 }
 0x454   : > { %11640 = dma.done.wait (!%p11243_p1), %s8608_s6, 4096  }
 0x455   : > { %11642 = vsyncadd (!%p11243_p1), %s8608_s6, 4294963200  ;;  %p15_p2 = scmp.ge.s32.totalorder %s11715_s21, 4   ;;  %s14753_s15 = smov %s11649_s16 }
 0x456   : > { %s14754_s16 = smov %s11653_s17  ;;  %s14755_s17 = smov %s11726_s24 }
 0x457   : > { %s14756_s18 = smov %s11715_s21  ;;  %17 = sbr.rel (!%p15_p2) target bundleno = 4 (0x4), region = 76 }
 0x45e   :  { %8613 = vsyncpa [#allocation5], 1 }
 0x45f   :  { %8615 = vsyncpa [#allocation5 + $0x1], 1 }
 0x460   :  { %8616 = vsyncpa [#allocation6], 1 }
 0x461   :  { %8618 = vsyncpa [#allocation6 + $0x1], 1 }

</bundles_post_ra>
